<compile_context>
chip_gen: v7x
topology: tpu7x:2x2x1
jax: 0.10.0
libtpu: 0.0.40
codegen_flags: <defaults>
</compile_context>

<pallas_src>
import math
from functools import partial

import jax
import jax.numpy as jnp
from jax import lax
from jax.experimental import pallas as pl
from jax.experimental.pallas import tpu as pltpu

LANE = 128  # TPU lane width; channel dims are padded to this for lane-dense I/O.


def _round_up(x, m):
    return ((x + m - 1) // m) * m


def _layernorm(t, gamma, beta, true_c, eps=1e-5):
    # `t` is zero-padded along the last dim beyond `true_c`.  Use the true
    # channel count as divisor and the E[x^2]-E[x]^2 form so the padded lanes
    # contribute nothing; gamma/beta are zero-padded so padded lanes stay 0.
    inv_c = 1.0 / true_c
    mu = jnp.sum(t, axis=-1, keepdims=True) * inv_c
    ms = jnp.sum(t * t, axis=-1, keepdims=True) * inv_c
    var = ms - mu * mu
    return (t - mu) * lax.rsqrt(var + eps) * gamma + beta


# ----------------------------------------------------------------------------
# Kernels
# ----------------------------------------------------------------------------
def make_attn_kernel(num_heads, head_dim, C, Cp, N):
    def kernel(x_ref, xg_ref, g1_ref, b1_ref, wqkv_ref, wp_ref, bp_ref,
               ox_ref, oxg_ref):
        x = x_ref[0]                       # (N, Cp) f32, lanes >= C are zero
        xg = xg_ref[0]
        gamma = g1_ref[...]                # read once (hoisted)
        beta = b1_ref[...]

        xn = _layernorm(x, gamma, beta, C)     # norm1(x)
        xgn = _layernorm(xg, gamma, beta, C)   # norm1(xg)

        # Stack the two query streams so the projection / scores / PV all run
        # on a single M = 2N operand.  K/V come from the x stream only.
        s_in = jnp.concatenate([xn, xgn], axis=0)            # (2N, Cp)
        qkv = jnp.dot(s_in, wqkv_ref[...],
                      preferred_element_type=jnp.float32)    # (2N, 3*Cp)
        q = qkv[:, :Cp]            # queries for both streams (scale pre-folded)
        k = qkv[:N, Cp:2 * Cp]     # keys   from the x stream
        v = qkv[:N, 2 * Cp:]       # values from the x stream

        col = lax.broadcasted_iota(jnp.int32, (1, Cp), 1)
        out = jnp.zeros((2 * N, Cp), jnp.float32)
        for h in range(num_heads):
            m = ((col >= h * head_dim) & (col < (h + 1) * head_dim)
                 ).astype(jnp.float32)
            kh = k * m                 # masked once, shared by both streams
            vh = v * m
            # q left unmasked: contracting against kh only touches head-h lanes.
            s = lax.dot_general(q, kh, (((1,), (1,)), ((), ())),
                                preferred_element_type=jnp.float32)   # (2N, N)
            e = jnp.exp(s - jnp.max(s, axis=-1, keepdims=True))
            p = e * pl.reciprocal(jnp.sum(e, axis=-1, keepdims=True),
                                  approx=True)
            out = out + jnp.dot(p, vh, preferred_element_type=jnp.float32)

        att = jnp.dot(out, wp_ref[...],
                      preferred_element_type=jnp.float32) + bp_ref[...]
        ox_ref[0] = (x + att[:N]).astype(ox_ref.dtype)    # x = x + drop_path(att)
        oxg_ref[0] = att[N:].astype(oxg_ref.dtype)        # xg = drop_path(attg)

    return kernel


def make_mlp_kernel(H, W, C, Cp, hidden_p, Bt, PAD):
    N = H * W

    def kernel(t_ref, g2_ref, b2_ref, w1_ref, b1_ref, dw_ref, dwb_ref,
               w2_ref, bias2_ref, o_ref, conv_scr):
        t = t_ref[...]                                 # (Bt, N, Cp)
        t2 = t.reshape(Bt * N, Cp)
        tn = _layernorm(t2, g2_ref[...], b2_ref[...], C)   # norm2

        # fc1 on the merged (Bt*N, Cp) operand
        h1 = jnp.dot(tn, w1_ref[...],
                     preferred_element_type=jnp.float32) + b1_ref[...]

        # Depthwise 3x3 conv (stride 1, pad 1) on the (H, W) image each item's
        # flat N axis represents.  h1 is written into a zero-padded VMEM
        # scratch; each tap is one sublane-offset load + one multiply-add.
        # Vertical out-of-image taps read the zero padding; horizontal
        # boundary masks are folded into the per-tap weight rows (built once).
        xx = lax.broadcasted_iota(jnp.int32, (N, 1), 0) % W     # output column
        mask_l = (xx >= 1).astype(jnp.float32)                  # dx-1 == -1
        mask_r = (xx <= W - 2).astype(jnp.float32)              # dx-1 == +1
        wm, offs = [], []
        for dy in range(3):
            for dx in range(3):
                idx = dy * 3 + dx
                wvec = dw_ref[idx:idx + 1, :]                   # (1, hidden_p)
                if dx == 0:
                    wm.append(mask_l * wvec)
                elif dx == 2:
                    wm.append(mask_r * wvec)
                else:
                    wm.append(wvec)
                offs.append((dy - 1) * W + (dx - 1))

        zpad = jnp.zeros((PAD, hidden_p), jnp.float32)
        conv_parts = []
        for i in range(Bt):
            conv_scr[i, :PAD, :] = zpad
            conv_scr[i, PAD + N:, :] = zpad
            conv_scr[i, PAD:PAD + N, :] = h1[i * N:(i + 1) * N, :]
            acc = jnp.zeros((N, hidden_p), jnp.float32)
            for tap in range(9):
                shifted = conv_scr[i, PAD + offs[tap]:PAD + offs[tap] + N, :]
                acc = acc + shifted * wm[tap]
            conv_parts.append(acc)
        conv = jnp.concatenate(conv_parts, axis=0) + dwb_ref[...]  # (Bt*N, Hp)

        # GELU activation
        # TODO(synk): PyTorch nn.GELU uses exact erf; tanh approximation here.
        c0 = 0.7978845608028654  # sqrt(2/pi)
        g = 0.5 * conv * (1.0 + jnp.tanh(c0 * (conv + 0.044715 * conv * conv * conv)))

        # fc2 + residual
        out = jnp.dot(g, w2_ref[...],
                      preferred_element_type=jnp.float32) + bias2_ref[...]
        o_ref[...] = (t + out.reshape(Bt, N, Cp)).astype(o_ref.dtype)

    return kernel


# ----------------------------------------------------------------------------
# Wrapper
# ----------------------------------------------------------------------------
@partial(jax.jit, static_argnums=(3, 4, 5))
def block_forward(x, xg, p, H, W, num_heads):
    B, N, C = x.shape
    hidden = p["w1"].shape[1]
    head_dim = C // num_heads
    scale = head_dim ** (-0.5)
    dt = x.dtype

    Cp = _round_up(C, LANE)
    Hp = _round_up(hidden, LANE)

    def pad2(a, rows, cols):
        return jnp.zeros((rows, cols), a.dtype).at[:a.shape[0], :a.shape[1]].set(a)

    # lane-dense activations: zero-pad channels to Cp
    x_p = jnp.pad(x, ((0, 0), (0, 0), (0, Cp - C)))
    xg_p = jnp.pad(xg, ((0, 0), (0, 0), (0, Cp - C)))

    g1_p = pad2(p["g1"], 1, Cp); b1_p = pad2(p["b1"], 1, Cp)
    g2_p = pad2(p["g2"], 1, Cp); b2_p = pad2(p["b2"], 1, Cp)
    # fused [q | k | v] projection, attention scale folded into the q block
    wqkv_p = (jnp.zeros((Cp, 3 * Cp), dt)
              .at[:C, :C].set(p["wq"] * scale)
              .at[:C, Cp:Cp + C].set(p["wkv"][:, :C])
              .at[:C, 2 * Cp:2 * Cp + C].set(p["wkv"][:, C:]))
    wp_p = pad2(p["wp"], Cp, Cp); bp_p = pad2(p["bp"], 1, Cp)
    w1_p = pad2(p["w1"], Cp, Hp); b1fc_p = pad2(p["b1fc"], 1, Hp)
    dw_p = pad2(p["dw"], 9, Hp);  dwb_p = pad2(p["dwb"], 1, Hp)
    w2_p = pad2(p["w2"], Hp, Cp); b2fc_p = pad2(p["b2fc"], 1, Cp)

    seq_spec = pl.BlockSpec((1, N, Cp), lambda b: (b, 0, 0))

    def full_spec(arr):
        return pl.BlockSpec(arr.shape, lambda b: (0,) * arr.ndim)

    # ---- attention (one program per batch element; >=2 programs keeps both
    #      v7x TensorCores busy; both streams stacked to M = 2N inside) -------
    attn_call = pl.pallas_call(
        make_attn_kernel(num_heads, head_dim, C, Cp, N),
        out_shape=(jax.ShapeDtypeStruct((B, N, Cp), dt),
                   jax.ShapeDtypeStruct((B, N, Cp), dt)),
        grid=(B,),
        in_specs=[seq_spec, seq_spec,
                  full_spec(g1_p), full_spec(b1_p),
                  full_spec(wqkv_p), full_spec(wp_p), full_spec(bp_p)],
        out_specs=(seq_spec, seq_spec),
        input_output_aliases={0: 0, 1: 1},     # write residual/output in place
        compiler_params=pltpu.CompilerParams(
            dimension_semantics=("parallel",)),
    )
    x1_p, attg_p = attn_call(x_p, xg_p, g1_p, b1_p, wqkv_p, wp_p, bp_p)

    # ---- mlp: both branches fused into one call; 2 stacked items per step ---
    t_stacked = jnp.concatenate([x1_p, attg_p], axis=0)    # (2B, N, Cp)
    Bt = 2                                                 # 2B is always even
    mlp_grid = (2 * B) // Bt
    mlp_seq_spec = pl.BlockSpec((Bt, N, Cp), lambda i: (i, 0, 0))
    PAD = _round_up(W + 1, 8)

    mlp_call = pl.pallas_call(
        make_mlp_kernel(H, W, C, Cp, Hp, Bt, PAD),
        out_shape=jax.ShapeDtypeStruct((2 * B, N, Cp), dt),
        grid=(mlp_grid,),
        in_specs=[mlp_seq_spec,
                  full_spec(g2_p), full_spec(b2_p),
                  full_spec(w1_p), full_spec(b1fc_p),
                  full_spec(dw_p), full_spec(dwb_p),
                  full_spec(w2_p), full_spec(b2fc_p)],
        out_specs=mlp_seq_spec,
        scratch_shapes=[pltpu.VMEM((Bt, N + 2 * PAD, Hp), jnp.float32)],
        input_output_aliases={0: 0},
        compiler_params=pltpu.CompilerParams(
            dimension_semantics=("parallel",)),
    )
    y = mlp_call(t_stacked, g2_p, b2_p, w1_p, b1fc_p, dw_p, dwb_p, w2_p, b2fc_p)

    x_out = y[:B, :, :C]       # x  = x1  + mlp(norm2(x1))
    xg_out = y[B:, :, :C]      # xg = attg + mlp(norm2(attg))
    return x_out, xg_out


# ----------------------------------------------------------------------------
# Pure-JAX reference (same semantics, for a correctness check)
# ----------------------------------------------------------------------------
def reference_block(x, xg, p, H, W, num_heads):
    C = x.shape[-1]
    hd = C // num_heads
    scale = hd ** (-0.5)

    def ln(t, g, b):
        mu = t.mean(-1, keepdims=True)
        var = ((t - mu) ** 2).mean(-1, keepdims=True)
        return (t - mu) / jnp.sqrt(var + 1e-5) * g + b

    def attn(xn, xgn):
        B, N, _ = xn.shape
        q = (xn @ p["wq"]).reshape(B, N, num_heads, hd).transpose(0, 2, 1, 3)
        qg = (xgn @ p["wq"]).reshape(B, N, num_heads, hd).transpose(0, 2, 1, 3)
        kv = xn @ p["wkv"]
        k = kv[..., :C].reshape(B, N, num_heads, hd).transpose(0, 2, 1, 3)
        v = kv[..., C:].reshape(B, N, num_heads, hd).transpose(0, 2, 1, 3)

        def one(qq):
            s = jnp.einsum("bhnd,bhmd->bhnm", qq, k) * scale
            pr = jax.nn.softmax(s, -1)
            o = jnp.einsum("bhnm,bhmd->bhnd", pr, v)
            o = o.transpose(0, 2, 1, 3).reshape(B, N, C)
            return o @ p["wp"] + p["bp"][0]

        return one(q), one(qg)

    def mlp(t):
        B, N, _ = t.shape
        hidden = p["w1"].shape[1]
        h1 = t @ p["w1"] + p["b1fc"][0]
        img = h1.reshape(B, H, W, hidden)
        dwk = p["dw"].reshape(3, 3, hidden)[:, :, None, :]   # (3,3,1,hidden)
        conv = lax.conv_general_dilated(
            img, dwk, window_strides=(1, 1), padding="SAME",
            dimension_numbers=("NHWC", "HWIO", "NHWC"),
            feature_group_count=hidden)
        conv = conv + p["dwb"][0]
        h2 = conv.reshape(B, N, hidden)
        c = 0.7978845608028654
        g = 0.5 * h2 * (1.0 + jnp.tanh(c * (h2 + 0.044715 * h2 ** 3)))
        return g @ p["w2"] + p["b2fc"][0]

    xn, xgn = ln(x, p["g1"], p["b1"]), ln(xg, p["g1"], p["b1"])
    att, attg = attn(xn, xgn)
    x1 = x + att
    x2 = x1 + mlp(ln(x1, p["g2"], p["b2"]))
    xg1 = attg
    xg2 = xg1 + mlp(ln(xg1, p["g2"], p["b2"]))
    return x2, xg2


# ----------------------------------------------------------------------------
# Deterministic parameter init (synthetic; shapes follow the module __init__)
# ----------------------------------------------------------------------------
def init_params(key, C, hidden):
    ks = jax.random.split(key, 8)
    f32 = jnp.float32
    return {
        # norm1 / norm2 (LayerNorm(dim))
        "g1": jnp.ones((1, C), f32), "b1": jnp.zeros((1, C), f32),
        "g2": jnp.ones((1, C), f32), "b2": jnp.zeros((1, C), f32),
        # Attention: q (C->C, no bias), kv (C->2C, no bias), proj (C->C, bias)
        "wq": (0.02 * jax.random.normal(ks[0], (C, C))).astype(f32),
        "wkv": (0.02 * jax.random.normal(ks[1], (C, 2 * C))).astype(f32),
        "wp": (0.02 * jax.random.normal(ks[2], (C, C))).astype(f32),
        "bp": (0.02 * jax.random.normal(ks[3], (1, C))).astype(f32),
        # Mlp: fc1 (C->hidden), dwconv 3x3 depthwise (hidden), fc2 (hidden->C)
        "w1": (0.02 * jax.random.normal(ks[4], (C, hidden))).astype(f32),
        "b1fc": (0.02 * jax.random.normal(ks[5], (1, hidden))).astype(f32),
        "dw": (math.sqrt(2.0 / 9.0)
               * jax.random.normal(ks[6], (9, hidden))).astype(f32),
        "dwb": (0.02 * jax.random.normal(ks[7], (1, hidden))).astype(f32),
        "w2": (0.02 * jax.random.normal(jax.random.fold_in(key, 100),
                                        (hidden, C))).astype(f32),
        "b2fc": (0.02 * jax.random.normal(jax.random.fold_in(key, 101),
                                          (1, C))).astype(f32),
    }


if __name__ == "__main__":
    B, H, W = 2, 8, 8
    C, num_heads = 32, 4
    mlp_ratio = 4
    N = H * W
    hidden = int(C * mlp_ratio)

    key = jax.random.PRNGKey(0)
    kx, kxg, kp = jax.random.split(key, 3)
    x = jax.random.normal(kx, (B, N, C), jnp.float32)
    xg = jax.random.normal(kxg, (B, N, C), jnp.float32)
    params = init_params(kp, C, hidden)

    out_x, out_xg = block_forward(x, xg, params, H, W, num_heads)
    jax.block_until_ready((out_x, out_xg))

    ref_x, ref_xg = reference_block(x, xg, params, H, W, num_heads)
    assert bool(jnp.allclose(out_x, ref_x, atol=2e-3, rtol=2e-3)), "x mismatch"
    assert bool(jnp.allclose(out_xg, ref_xg, atol=2e-3, rtol=2e-3)), "xg mismatch"

    print("KERNEL_OK")
</pallas_src>

<mosaic_0001>
module attributes {stable_mosaic.version = 11 : i64} {
  func.func @kernel(%arg0: i32, %arg1: memref<1x64x128xf32, #tpu.memory_space<vmem>>, %arg2: memref<1x64x128xf32, #tpu.memory_space<vmem>>, %arg3: memref<1x128xf32, #tpu.memory_space<vmem>>, %arg4: memref<1x128xf32, #tpu.memory_space<vmem>>, %arg5: memref<128x384xf32, #tpu.memory_space<vmem>>, %arg6: memref<128x128xf32, #tpu.memory_space<vmem>>, %arg7: memref<1x128xf32, #tpu.memory_space<vmem>>, %arg8: memref<1x64x128xf32, #tpu.memory_space<vmem>>, %arg9: memref<1x64x128xf32, #tpu.memory_space<vmem>>) attributes {dimension_semantics = [#tpu.dimension_semantics<parallel>], iteration_bounds = array<i64: 2>, scalar_prefetch = 0 : i64, scratch_operands = 0 : i64, tpu.core_type = #tpu.core_type<tc>, window_params = [{transform_indices = @transform_0, window_bounds = array<i64: 1, 64, 128>}, {transform_indices = @transform_1, window_bounds = array<i64: 1, 64, 128>}, {pipeline_mode = #tpu.pipeline_mode<synchronous>, transform_indices = @transform_2, window_bounds = array<i64: 1, 128>}, {pipeline_mode = #tpu.pipeline_mode<synchronous>, transform_indices = @transform_3, window_bounds = array<i64: 1, 128>}, {pipeline_mode = #tpu.pipeline_mode<synchronous>, transform_indices = @transform_4, window_bounds = array<i64: 128, 384>}, {pipeline_mode = #tpu.pipeline_mode<synchronous>, transform_indices = @transform_5, window_bounds = array<i64: 128, 128>}, {pipeline_mode = #tpu.pipeline_mode<synchronous>, transform_indices = @transform_6, window_bounds = array<i64: 1, 128>}, {transform_indices = @transform_7, window_bounds = array<i64: 1, 64, 128>}, {transform_indices = @transform_8, window_bounds = array<i64: 1, 64, 128>}]} {
    %c0 = arith.constant 0 : index
    %c0_0 = arith.constant 0 : index
    %c0_1 = arith.constant 0 : index
    %0 = vector.load %arg1[%c0, %c0_0, %c0_1] : memref<1x64x128xf32, #tpu.memory_space<vmem>>, vector<1x64x128xf32>
    %1 = vector.shape_cast %0 : vector<1x64x128xf32> to vector<64x128xf32>
    %c0_2 = arith.constant 0 : index
    %c0_3 = arith.constant 0 : index
    %c0_4 = arith.constant 0 : index
    %2 = vector.load %arg2[%c0_2, %c0_3, %c0_4] : memref<1x64x128xf32, #tpu.memory_space<vmem>>, vector<1x64x128xf32>
    %3 = vector.shape_cast %2 : vector<1x64x128xf32> to vector<64x128xf32>
    %c0_5 = arith.constant 0 : index
    %c0_6 = arith.constant 0 : index
    %4 = vector.load %arg3[%c0_5, %c0_6] : memref<1x128xf32, #tpu.memory_space<vmem>>, vector<1x128xf32>
    %c0_7 = arith.constant 0 : index
    %c0_8 = arith.constant 0 : index
    %5 = vector.load %arg4[%c0_7, %c0_8] : memref<1x128xf32, #tpu.memory_space<vmem>>, vector<1x128xf32>
    %cst = arith.constant dense<0.000000e+00> : vector<64xf32>
    %6 = vector.multi_reduction <add>, %1, %cst [1] : vector<64x128xf32> to vector<64xf32>
    %7 = vector.shape_cast %6 : vector<64xf32> to vector<64x1xf32>
    %cst_9 = arith.constant 3.125000e-02 : f32
    %8 = vector.broadcast %cst_9 : f32 to vector<64x1xf32>
    %9 = arith.mulf %7, %8 : vector<64x1xf32>
    %10 = arith.mulf %1, %1 : vector<64x128xf32>
    %cst_10 = arith.constant dense<0.000000e+00> : vector<64xf32>
    %11 = vector.multi_reduction <add>, %10, %cst_10 [1] : vector<64x128xf32> to vector<64xf32>
    %12 = vector.shape_cast %11 : vector<64xf32> to vector<64x1xf32>
    %cst_11 = arith.constant 3.125000e-02 : f32
    %13 = vector.broadcast %cst_11 : f32 to vector<64x1xf32>
    %14 = arith.mulf %12, %13 : vector<64x1xf32>
    %15 = arith.mulf %9, %9 : vector<64x1xf32>
    %16 = arith.subf %14, %15 : vector<64x1xf32>
    %17 = vector.broadcast %9 : vector<64x1xf32> to vector<64x128xf32>
    %18 = arith.subf %1, %17 : vector<64x128xf32>
    %cst_12 = arith.constant 9.99999974E-6 : f32
    %19 = vector.broadcast %cst_12 : f32 to vector<64x1xf32>
    %20 = arith.addf %16, %19 : vector<64x1xf32>
    %21 = math.rsqrt %20 : vector<64x1xf32>
    %22 = vector.broadcast %21 : vector<64x1xf32> to vector<64x128xf32>
    %23 = arith.mulf %18, %22 : vector<64x128xf32>
    %24 = vector.broadcast %4 : vector<1x128xf32> to vector<64x128xf32>
    %25 = arith.mulf %23, %24 : vector<64x128xf32>
    %26 = vector.broadcast %5 : vector<1x128xf32> to vector<64x128xf32>
    %27 = arith.addf %25, %26 : vector<64x128xf32>
    %cst_13 = arith.constant dense<0.000000e+00> : vector<64xf32>
    %28 = vector.multi_reduction <add>, %3, %cst_13 [1] : vector<64x128xf32> to vector<64xf32>
    %29 = vector.shape_cast %28 : vector<64xf32> to vector<64x1xf32>
    %cst_14 = arith.constant 3.125000e-02 : f32
    %30 = vector.broadcast %cst_14 : f32 to vector<64x1xf32>
    %31 = arith.mulf %29, %30 : vector<64x1xf32>
    %32 = arith.mulf %3, %3 : vector<64x128xf32>
    %cst_15 = arith.constant dense<0.000000e+00> : vector<64xf32>
    %33 = vector.multi_reduction <add>, %32, %cst_15 [1] : vector<64x128xf32> to vector<64xf32>
    %34 = vector.shape_cast %33 : vector<64xf32> to vector<64x1xf32>
    %cst_16 = arith.constant 3.125000e-02 : f32
    %35 = vector.broadcast %cst_16 : f32 to vector<64x1xf32>
    %36 = arith.mulf %34, %35 : vector<64x1xf32>
    %37 = arith.mulf %31, %31 : vector<64x1xf32>
    %38 = arith.subf %36, %37 : vector<64x1xf32>
    %39 = vector.broadcast %31 : vector<64x1xf32> to vector<64x128xf32>
    %40 = arith.subf %3, %39 : vector<64x128xf32>
    %cst_17 = arith.constant 9.99999974E-6 : f32
    %41 = vector.broadcast %cst_17 : f32 to vector<64x1xf32>
    %42 = arith.addf %38, %41 : vector<64x1xf32>
    %43 = math.rsqrt %42 : vector<64x1xf32>
    %44 = vector.broadcast %43 : vector<64x1xf32> to vector<64x128xf32>
    %45 = arith.mulf %40, %44 : vector<64x128xf32>
    %46 = vector.broadcast %4 : vector<1x128xf32> to vector<64x128xf32>
    %47 = arith.mulf %45, %46 : vector<64x128xf32>
    %48 = vector.broadcast %5 : vector<1x128xf32> to vector<64x128xf32>
    %49 = arith.addf %47, %48 : vector<64x128xf32>
    %50 = tpu.concatenate %27, %49 in 0 : vector<64x128xf32>, vector<64x128xf32> -> vector<128x128xf32>
    %c0_18 = arith.constant 0 : index
    %c0_19 = arith.constant 0 : index
    %51 = vector.load %arg5[%c0_18, %c0_19] : memref<128x384xf32, #tpu.memory_space<vmem>>, vector<128x384xf32>
    %cst_20 = arith.constant dense<0.000000e+00> : vector<128x384xf32>
    %52 = tpu.matmul %50, %51, %cst_20 {dimension_numbers = #tpu.dot_dimension_numbers<[1], [0], [0], [1], [0, 0, 1, 1], [], []>} : vector<128x128xf32>, vector<128x384xf32>, vector<128x384xf32> -> vector<128x384xf32>
    %53 = vector.extract_strided_slice %52 {offsets = [0, 0], sizes = [128, 128], strides = [1, 1]} : vector<128x384xf32> to vector<128x128xf32>
    %54 = vector.extract_strided_slice %52 {offsets = [0, 128], sizes = [64, 128], strides = [1, 1]} : vector<128x384xf32> to vector<64x128xf32>
    %55 = vector.extract_strided_slice %52 {offsets = [0, 256], sizes = [64, 128], strides = [1, 1]} : vector<128x384xf32> to vector<64x128xf32>
    %56 = tpu.iota {dimensions = array<i32: 1>} : vector<1x128xi32>
    %cst_21 = arith.constant 0.000000e+00 : f32
    %57 = vector.broadcast %cst_21 : f32 to vector<128x128xf32>
    %c0_i32 = arith.constant 0 : i32
    %58 = vector.broadcast %c0_i32 : i32 to vector<1x128xi32>
    %59 = arith.cmpi sge, %56, %58 : vector<1x128xi32>
    %c8_i32 = arith.constant 8 : i32
    %60 = vector.broadcast %c8_i32 : i32 to vector<1x128xi32>
    %61 = arith.cmpi slt, %56, %60 : vector<1x128xi32>
    %62 = arith.andi %59, %61 : vector<1x128xi1>
    %63 = arith.extui %62 : vector<1x128xi1> to vector<1x128xi32>
    %64 = arith.sitofp %63 : vector<1x128xi32> to vector<1x128xf32>
    %65 = vector.broadcast %64 : vector<1x128xf32> to vector<64x128xf32>
    %66 = arith.mulf %54, %65 : vector<64x128xf32>
    %67 = vector.broadcast %64 : vector<1x128xf32> to vector<64x128xf32>
    %68 = arith.mulf %55, %67 : vector<64x128xf32>
    %cst_22 = arith.constant dense<0.000000e+00> : vector<128x64xf32>
    %69 = tpu.matmul %53, %66, %cst_22 {dimension_numbers = #tpu.dot_dimension_numbers<[1], [1], [0], [0], [0, 0, 1, 0], [], []>} : vector<128x128xf32>, vector<64x128xf32>, vector<128x64xf32> -> vector<128x64xf32>
    %cst_23 = arith.constant dense<0xFF800000> : vector<128xf32>
    %70 = vector.multi_reduction <maximumf>, %69, %cst_23 [1] : vector<128x64xf32> to vector<128xf32>
    %71 = vector.shape_cast %70 : vector<128xf32> to vector<128x1xf32>
    %72 = vector.broadcast %71 : vector<128x1xf32> to vector<128x64xf32>
    %73 = arith.subf %69, %72 : vector<128x64xf32>
    %74 = math.exp %73 : vector<128x64xf32>
    %cst_24 = arith.constant dense<0.000000e+00> : vector<128xf32>
    %75 = vector.multi_reduction <add>, %74, %cst_24 [1] : vector<128x64xf32> to vector<128xf32>
    %76 = vector.shape_cast %75 : vector<128xf32> to vector<128x1xf32>
    %77 = tpu.reciprocal %76 {approx = true} : vector<128x1xf32> -> vector<128x1xf32>
    %78 = vector.broadcast %77 : vector<128x1xf32> to vector<128x64xf32>
    %79 = arith.mulf %74, %78 : vector<128x64xf32>
    %cst_25 = arith.constant dense<0.000000e+00> : vector<128x128xf32>
    %80 = tpu.matmul %79, %68, %cst_25 {dimension_numbers = #tpu.dot_dimension_numbers<[1], [0], [0], [1], [0, 0, 1, 1], [], []>} : vector<128x64xf32>, vector<64x128xf32>, vector<128x128xf32> -> vector<128x128xf32>
    %81 = arith.addf %57, %80 : vector<128x128xf32>
    %c8_i32_26 = arith.constant 8 : i32
    %82 = vector.broadcast %c8_i32_26 : i32 to vector<1x128xi32>
    %83 = arith.cmpi sge, %56, %82 : vector<1x128xi32>
    %c16_i32 = arith.constant 16 : i32
    %84 = vector.broadcast %c16_i32 : i32 to vector<1x128xi32>
    %85 = arith.cmpi slt, %56, %84 : vector<1x128xi32>
    %86 = arith.andi %83, %85 : vector<1x128xi1>
    %87 = arith.extui %86 : vector<1x128xi1> to vector<1x128xi32>
    %88 = arith.sitofp %87 : vector<1x128xi32> to vector<1x128xf32>
    %89 = vector.broadcast %88 : vector<1x128xf32> to vector<64x128xf32>
    %90 = arith.mulf %54, %89 : vector<64x128xf32>
    %91 = vector.broadcast %88 : vector<1x128xf32> to vector<64x128xf32>
    %92 = arith.mulf %55, %91 : vector<64x128xf32>
    %cst_27 = arith.constant dense<0.000000e+00> : vector<128x64xf32>
    %93 = tpu.matmul %53, %90, %cst_27 {dimension_numbers = #tpu.dot_dimension_numbers<[1], [1], [0], [0], [0, 0, 1, 0], [], []>} : vector<128x128xf32>, vector<64x128xf32>, vector<128x64xf32> -> vector<128x64xf32>
    %cst_28 = arith.constant dense<0xFF800000> : vector<128xf32>
    %94 = vector.multi_reduction <maximumf>, %93, %cst_28 [1] : vector<128x64xf32> to vector<128xf32>
    %95 = vector.shape_cast %94 : vector<128xf32> to vector<128x1xf32>
    %96 = vector.broadcast %95 : vector<128x1xf32> to vector<128x64xf32>
    %97 = arith.subf %93, %96 : vector<128x64xf32>
    %98 = math.exp %97 : vector<128x64xf32>
    %cst_29 = arith.constant dense<0.000000e+00> : vector<128xf32>
    %99 = vector.multi_reduction <add>, %98, %cst_29 [1] : vector<128x64xf32> to vector<128xf32>
    %100 = vector.shape_cast %99 : vector<128xf32> to vector<128x1xf32>
    %101 = tpu.reciprocal %100 {approx = true} : vector<128x1xf32> -> vector<128x1xf32>
    %102 = vector.broadcast %101 : vector<128x1xf32> to vector<128x64xf32>
    %103 = arith.mulf %98, %102 : vector<128x64xf32>
    %cst_30 = arith.constant dense<0.000000e+00> : vector<128x128xf32>
    %104 = tpu.matmul %103, %92, %cst_30 {dimension_numbers = #tpu.dot_dimension_numbers<[1], [0], [0], [1], [0, 0, 1, 1], [], []>} : vector<128x64xf32>, vector<64x128xf32>, vector<128x128xf32> -> vector<128x128xf32>
    %105 = arith.addf %81, %104 : vector<128x128xf32>
    %c16_i32_31 = arith.constant 16 : i32
    %106 = vector.broadcast %c16_i32_31 : i32 to vector<1x128xi32>
    %107 = arith.cmpi sge, %56, %106 : vector<1x128xi32>
    %c24_i32 = arith.constant 24 : i32
    %108 = vector.broadcast %c24_i32 : i32 to vector<1x128xi32>
    %109 = arith.cmpi slt, %56, %108 : vector<1x128xi32>
    %110 = arith.andi %107, %109 : vector<1x128xi1>
    %111 = arith.extui %110 : vector<1x128xi1> to vector<1x128xi32>
    %112 = arith.sitofp %111 : vector<1x128xi32> to vector<1x128xf32>
    %113 = vector.broadcast %112 : vector<1x128xf32> to vector<64x128xf32>
    %114 = arith.mulf %54, %113 : vector<64x128xf32>
    %115 = vector.broadcast %112 : vector<1x128xf32> to vector<64x128xf32>
    %116 = arith.mulf %55, %115 : vector<64x128xf32>
    %cst_32 = arith.constant dense<0.000000e+00> : vector<128x64xf32>
    %117 = tpu.matmul %53, %114, %cst_32 {dimension_numbers = #tpu.dot_dimension_numbers<[1], [1], [0], [0], [0, 0, 1, 0], [], []>} : vector<128x128xf32>, vector<64x128xf32>, vector<128x64xf32> -> vector<128x64xf32>
    %cst_33 = arith.constant dense<0xFF800000> : vector<128xf32>
    %118 = vector.multi_reduction <maximumf>, %117, %cst_33 [1] : vector<128x64xf32> to vector<128xf32>
    %119 = vector.shape_cast %118 : vector<128xf32> to vector<128x1xf32>
    %120 = vector.broadcast %119 : vector<128x1xf32> to vector<128x64xf32>
    %121 = arith.subf %117, %120 : vector<128x64xf32>
    %122 = math.exp %121 : vector<128x64xf32>
    %cst_34 = arith.constant dense<0.000000e+00> : vector<128xf32>
    %123 = vector.multi_reduction <add>, %122, %cst_34 [1] : vector<128x64xf32> to vector<128xf32>
    %124 = vector.shape_cast %123 : vector<128xf32> to vector<128x1xf32>
    %125 = tpu.reciprocal %124 {approx = true} : vector<128x1xf32> -> vector<128x1xf32>
    %126 = vector.broadcast %125 : vector<128x1xf32> to vector<128x64xf32>
    %127 = arith.mulf %122, %126 : vector<128x64xf32>
    %cst_35 = arith.constant dense<0.000000e+00> : vector<128x128xf32>
    %128 = tpu.matmul %127, %116, %cst_35 {dimension_numbers = #tpu.dot_dimension_numbers<[1], [0], [0], [1], [0, 0, 1, 1], [], []>} : vector<128x64xf32>, vector<64x128xf32>, vector<128x128xf32> -> vector<128x128xf32>
    %129 = arith.addf %105, %128 : vector<128x128xf32>
    %c24_i32_36 = arith.constant 24 : i32
    %130 = vector.broadcast %c24_i32_36 : i32 to vector<1x128xi32>
    %131 = arith.cmpi sge, %56, %130 : vector<1x128xi32>
    %c32_i32 = arith.constant 32 : i32
    %132 = vector.broadcast %c32_i32 : i32 to vector<1x128xi32>
    %133 = arith.cmpi slt, %56, %132 : vector<1x128xi32>
    %134 = arith.andi %131, %133 : vector<1x128xi1>
    %135 = arith.extui %134 : vector<1x128xi1> to vector<1x128xi32>
    %136 = arith.sitofp %135 : vector<1x128xi32> to vector<1x128xf32>
    %137 = vector.broadcast %136 : vector<1x128xf32> to vector<64x128xf32>
    %138 = arith.mulf %54, %137 : vector<64x128xf32>
    %139 = vector.broadcast %136 : vector<1x128xf32> to vector<64x128xf32>
    %140 = arith.mulf %55, %139 : vector<64x128xf32>
    %cst_37 = arith.constant dense<0.000000e+00> : vector<128x64xf32>
    %141 = tpu.matmul %53, %138, %cst_37 {dimension_numbers = #tpu.dot_dimension_numbers<[1], [1], [0], [0], [0, 0, 1, 0], [], []>} : vector<128x128xf32>, vector<64x128xf32>, vector<128x64xf32> -> vector<128x64xf32>
    %cst_38 = arith.constant dense<0xFF800000> : vector<128xf32>
    %142 = vector.multi_reduction <maximumf>, %141, %cst_38 [1] : vector<128x64xf32> to vector<128xf32>
    %143 = vector.shape_cast %142 : vector<128xf32> to vector<128x1xf32>
    %144 = vector.broadcast %143 : vector<128x1xf32> to vector<128x64xf32>
    %145 = arith.subf %141, %144 : vector<128x64xf32>
    %146 = math.exp %145 : vector<128x64xf32>
    %cst_39 = arith.constant dense<0.000000e+00> : vector<128xf32>
    %147 = vector.multi_reduction <add>, %146, %cst_39 [1] : vector<128x64xf32> to vector<128xf32>
    %148 = vector.shape_cast %147 : vector<128xf32> to vector<128x1xf32>
    %149 = tpu.reciprocal %148 {approx = true} : vector<128x1xf32> -> vector<128x1xf32>
    %150 = vector.broadcast %149 : vector<128x1xf32> to vector<128x64xf32>
    %151 = arith.mulf %146, %150 : vector<128x64xf32>
    %cst_40 = arith.constant dense<0.000000e+00> : vector<128x128xf32>
    %152 = tpu.matmul %151, %140, %cst_40 {dimension_numbers = #tpu.dot_dimension_numbers<[1], [0], [0], [1], [0, 0, 1, 1], [], []>} : vector<128x64xf32>, vector<64x128xf32>, vector<128x128xf32> -> vector<128x128xf32>
    %153 = arith.addf %129, %152 : vector<128x128xf32>
    %c0_41 = arith.constant 0 : index
    %c0_42 = arith.constant 0 : index
    %154 = vector.load %arg6[%c0_41, %c0_42] : memref<128x128xf32, #tpu.memory_space<vmem>>, vector<128x128xf32>
    %cst_43 = arith.constant dense<0.000000e+00> : vector<128x128xf32>
    %155 = tpu.matmul %153, %154, %cst_43 {dimension_numbers = #tpu.dot_dimension_numbers<[1], [0], [0], [1], [0, 0, 1, 1], [], []>} : vector<128x128xf32>, vector<128x128xf32>, vector<128x128xf32> -> vector<128x128xf32>
    %c0_44 = arith.constant 0 : index
    %c0_45 = arith.constant 0 : index
    %156 = vector.load %arg7[%c0_44, %c0_45] : memref<1x128xf32, #tpu.memory_space<vmem>>, vector<1x128xf32>
    %157 = vector.broadcast %156 : vector<1x128xf32> to vector<128x128xf32>
    %158 = arith.addf %155, %157 : vector<128x128xf32>
    %159 = vector.extract_strided_slice %158 {offsets = [0, 0], sizes = [64, 128], strides = [1, 1]} : vector<128x128xf32> to vector<64x128xf32>
    %160 = arith.addf %1, %159 : vector<64x128xf32>
    %c0_46 = arith.constant 0 : index
    %c0_47 = arith.constant 0 : index
    %c0_48 = arith.constant 0 : index
    %161 = vector.load %arg8[%c0_46, %c0_47, %c0_48] : memref<1x64x128xf32, #tpu.memory_space<vmem>>, vector<1x64x128xf32>
    %162 = vector.shape_cast %161 : vector<1x64x128xf32> to vector<64x128xf32>
    %163 = vector.shape_cast %160 : vector<64x128xf32> to vector<1x64x128xf32>
    tpu.vector_store %arg8[%c0_46, %c0_47, %c0_48], %163 {strides = array<i32>} : memref<1x64x128xf32, #tpu.memory_space<vmem>>, vector<1x64x128xf32>,
    %164 = vector.extract_strided_slice %158 {offsets = [64, 0], sizes = [64, 128], strides = [1, 1]} : vector<128x128xf32> to vector<64x128xf32>
    %c0_49 = arith.constant 0 : index
    %c0_50 = arith.constant 0 : index
    %c0_51 = arith.constant 0 : index
    %165 = vector.load %arg9[%c0_49, %c0_50, %c0_51] : memref<1x64x128xf32, #tpu.memory_space<vmem>>, vector<1x64x128xf32>
    %166 = vector.shape_cast %165 : vector<1x64x128xf32> to vector<64x128xf32>
    %167 = vector.shape_cast %164 : vector<64x128xf32> to vector<1x64x128xf32>
    tpu.vector_store %arg9[%c0_49, %c0_50, %c0_51], %167 {strides = array<i32>} : memref<1x64x128xf32, #tpu.memory_space<vmem>>, vector<1x64x128xf32>,
    return
  }
  func.func @transform_0(%arg0: i32) -> (i32, i32, i32) {
    %c0_i32 = arith.constant 0 : i32
    %c0_i32_0 = arith.constant 0 : i32
    %c0_i32_1 = arith.constant 0 : i32
    return %arg0, %c0_i32, %c0_i32_0 : i32, i32, i32
  }
  func.func @transform_1(%arg0: i32) -> (i32, i32, i32) {
    %c0_i32 = arith.constant 0 : i32
    %c0_i32_0 = arith.constant 0 : i32
    %c0_i32_1 = arith.constant 0 : i32
    return %arg0, %c0_i32, %c0_i32_0 : i32, i32, i32
  }
  func.func @transform_2(%arg0: i32) -> (i32, i32) {
    %c0_i32 = arith.constant 0 : i32
    %c0_i32_0 = arith.constant 0 : i32
    %c0_i32_1 = arith.constant 0 : i32
    return %c0_i32, %c0_i32_0 : i32, i32
  }
  func.func @transform_3(%arg0: i32) -> (i32, i32) {
    %c0_i32 = arith.constant 0 : i32
    %c0_i32_0 = arith.constant 0 : i32
    %c0_i32_1 = arith.constant 0 : i32
    return %c0_i32, %c0_i32_0 : i32, i32
  }
  func.func @transform_4(%arg0: i32) -> (i32, i32) {
    %c0_i32 = arith.constant 0 : i32
    %c0_i32_0 = arith.constant 0 : i32
    %c0_i32_1 = arith.constant 0 : i32
    return %c0_i32, %c0_i32_0 : i32, i32
  }
  func.func @transform_5(%arg0: i32) -> (i32, i32) {
    %c0_i32 = arith.constant 0 : i32
    %c0_i32_0 = arith.constant 0 : i32
    %c0_i32_1 = arith.constant 0 : i32
    return %c0_i32, %c0_i32_0 : i32, i32
  }
  func.func @transform_6(%arg0: i32) -> (i32, i32) {
    %c0_i32 = arith.constant 0 : i32
    %c0_i32_0 = arith.constant 0 : i32
    %c0_i32_1 = arith.constant 0 : i32
    return %c0_i32, %c0_i32_0 : i32, i32
  }
  func.func @transform_7(%arg0: i32) -> (i32, i32, i32) {
    %c0_i32 = arith.constant 0 : i32
    %c0_i32_0 = arith.constant 0 : i32
    %c0_i32_1 = arith.constant 0 : i32
    return %arg0, %c0_i32, %c0_i32_0 : i32, i32, i32
  }
  func.func @transform_8(%arg0: i32) -> (i32, i32, i32) {
    %c0_i32 = arith.constant 0 : i32
    %c0_i32_0 = arith.constant 0 : i32
    %c0_i32_1 = arith.constant 0 : i32
    return %arg0, %c0_i32, %c0_i32_0 : i32, i32, i32
  }
}

module attributes {stable_mosaic.version = 11 : i64} {
  func.func @kernel(%arg0: i32, %arg1: memref<2x64x128xf32, #tpu.memory_space<vmem>>, %arg2: memref<1x128xf32, #tpu.memory_space<vmem>>, %arg3: memref<1x128xf32, #tpu.memory_space<vmem>>, %arg4: memref<128x128xf32, #tpu.memory_space<vmem>>, %arg5: memref<1x128xf32, #tpu.memory_space<vmem>>, %arg6: memref<9x128xf32, #tpu.memory_space<vmem>>, %arg7: memref<1x128xf32, #tpu.memory_space<vmem>>, %arg8: memref<128x128xf32, #tpu.memory_space<vmem>>, %arg9: memref<1x128xf32, #tpu.memory_space<vmem>>, %arg10: memref<2x64x128xf32, #tpu.memory_space<vmem>>, %arg11: memref<2x96x128xf32, #tpu.memory_space<vmem>>) attributes {dimension_semantics = [#tpu.dimension_semantics<parallel>], iteration_bounds = array<i64: 2>, scalar_prefetch = 0 : i64, scratch_operands = 1 : i64, tpu.core_type = #tpu.core_type<tc>, window_params = [{transform_indices = @transform_0, window_bounds = array<i64: 2, 64, 128>}, {pipeline_mode = #tpu.pipeline_mode<synchronous>, transform_indices = @transform_1, window_bounds = array<i64: 1, 128>}, {pipeline_mode = #tpu.pipeline_mode<synchronous>, transform_indices = @transform_2, window_bounds = array<i64: 1, 128>}, {pipeline_mode = #tpu.pipeline_mode<synchronous>, transform_indices = @transform_3, window_bounds = array<i64: 128, 128>}, {pipeline_mode = #tpu.pipeline_mode<synchronous>, transform_indices = @transform_4, window_bounds = array<i64: 1, 128>}, {pipeline_mode = #tpu.pipeline_mode<synchronous>, transform_indices = @transform_5, window_bounds = array<i64: 9, 128>}, {pipeline_mode = #tpu.pipeline_mode<synchronous>, transform_indices = @transform_6, window_bounds = array<i64: 1, 128>}, {pipeline_mode = #tpu.pipeline_mode<synchronous>, transform_indices = @transform_7, window_bounds = array<i64: 128, 128>}, {pipeline_mode = #tpu.pipeline_mode<synchronous>, transform_indices = @transform_8, window_bounds = array<i64: 1, 128>}, {transform_indices = @transform_9, window_bounds = array<i64: 2, 64, 128>}]} {
    %c0 = arith.constant 0 : index
    %c0_0 = arith.constant 0 : index
    %c0_1 = arith.constant 0 : index
    %0 = vector.load %arg1[%c0, %c0_0, %c0_1] : memref<2x64x128xf32, #tpu.memory_space<vmem>>, vector<2x64x128xf32>
    %1 = vector.shape_cast %0 : vector<2x64x128xf32> to vector<128x128xf32>
    %c0_2 = arith.constant 0 : index
    %c0_3 = arith.constant 0 : index
    %2 = vector.load %arg2[%c0_2, %c0_3] : memref<1x128xf32, #tpu.memory_space<vmem>>, vector<1x128xf32>
    %c0_4 = arith.constant 0 : index
    %c0_5 = arith.constant 0 : index
    %3 = vector.load %arg3[%c0_4, %c0_5] : memref<1x128xf32, #tpu.memory_space<vmem>>, vector<1x128xf32>
    %cst = arith.constant dense<0.000000e+00> : vector<128xf32>
    %4 = vector.multi_reduction <add>, %1, %cst [1] : vector<128x128xf32> to vector<128xf32>
    %5 = vector.shape_cast %4 : vector<128xf32> to vector<128x1xf32>
    %cst_6 = arith.constant 3.125000e-02 : f32
    %6 = vector.broadcast %cst_6 : f32 to vector<128x1xf32>
    %7 = arith.mulf %5, %6 : vector<128x1xf32>
    %8 = arith.mulf %1, %1 : vector<128x128xf32>
    %cst_7 = arith.constant dense<0.000000e+00> : vector<128xf32>
    %9 = vector.multi_reduction <add>, %8, %cst_7 [1] : vector<128x128xf32> to vector<128xf32>
    %10 = vector.shape_cast %9 : vector<128xf32> to vector<128x1xf32>
    %cst_8 = arith.constant 3.125000e-02 : f32
    %11 = vector.broadcast %cst_8 : f32 to vector<128x1xf32>
    %12 = arith.mulf %10, %11 : vector<128x1xf32>
    %13 = arith.mulf %7, %7 : vector<128x1xf32>
    %14 = arith.subf %12, %13 : vector<128x1xf32>
    %15 = vector.broadcast %7 : vector<128x1xf32> to vector<128x128xf32>
    %16 = arith.subf %1, %15 : vector<128x128xf32>
    %cst_9 = arith.constant 9.99999974E-6 : f32
    %17 = vector.broadcast %cst_9 : f32 to vector<128x1xf32>
    %18 = arith.addf %14, %17 : vector<128x1xf32>
    %19 = math.rsqrt %18 : vector<128x1xf32>
    %20 = vector.broadcast %19 : vector<128x1xf32> to vector<128x128xf32>
    %21 = arith.mulf %16, %20 : vector<128x128xf32>
    %22 = vector.broadcast %2 : vector<1x128xf32> to vector<128x128xf32>
    %23 = arith.mulf %21, %22 : vector<128x128xf32>
    %24 = vector.broadcast %3 : vector<1x128xf32> to vector<128x128xf32>
    %25 = arith.addf %23, %24 : vector<128x128xf32>
    %c0_10 = arith.constant 0 : index
    %c0_11 = arith.constant 0 : index
    %26 = vector.load %arg4[%c0_10, %c0_11] : memref<128x128xf32, #tpu.memory_space<vmem>>, vector<128x128xf32>
    %cst_12 = arith.constant dense<0.000000e+00> : vector<128x128xf32>
    %27 = tpu.matmul %25, %26, %cst_12 {dimension_numbers = #tpu.dot_dimension_numbers<[1], [0], [0], [1], [0, 0, 1, 1], [], []>} : vector<128x128xf32>, vector<128x128xf32>, vector<128x128xf32> -> vector<128x128xf32>
    %c0_13 = arith.constant 0 : index
    %c0_14 = arith.constant 0 : index
    %28 = vector.load %arg5[%c0_13, %c0_14] : memref<1x128xf32, #tpu.memory_space<vmem>>, vector<1x128xf32>
    %29 = vector.broadcast %28 : vector<1x128xf32> to vector<128x128xf32>
    %30 = arith.addf %27, %29 : vector<128x128xf32>
    %31 = tpu.iota {dimensions = array<i32: 0>} : vector<64x1xi32>
    %c8_i32 = arith.constant 8 : i32
    %c0_i32 = arith.constant 0 : i32
    %32 = arith.cmpi eq, %c8_i32, %c0_i32 : i32
    %c1_i32 = arith.constant 1 : i32
    %33 = arith.select %32, %c1_i32, %c8_i32 : i32
    %34 = vector.broadcast %33 : i32 to vector<64x1xi32>
    %35 = arith.remsi %31, %34 : vector<64x1xi32>
    %c0_i32_15 = arith.constant 0 : i32
    %36 = vector.broadcast %c0_i32_15 : i32 to vector<64x1xi32>
    %37 = arith.cmpi ne, %35, %36 : vector<64x1xi32>
    %c0_i32_16 = arith.constant 0 : i32
    %38 = vector.broadcast %c0_i32_16 : i32 to vector<64x1xi32>
    %39 = arith.cmpi slt, %35, %38 : vector<64x1xi32>
    %c0_i32_17 = arith.constant 0 : i32
    %40 = arith.cmpi slt, %33, %c0_i32_17 : i32
    %41 = vector.broadcast %40 : i1 to vector<64x1xi1>
    %42 = vector.broadcast %41 : vector<64x1xi1> to vector<64x1xi1>
    %43 = arith.xori %39, %42 : vector<64x1xi1>
    %44 = arith.andi %43, %37 : vector<64x1xi1>
    %45 = vector.broadcast %33 : i32 to vector<64x1xi32>
    %46 = arith.addi %35, %45 : vector<64x1xi32>
    %47 = arith.select %44, %46, %35 : vector<64x1xi1>, vector<64x1xi32>
    %c1_i32_18 = arith.constant 1 : i32
    %48 = vector.broadcast %c1_i32_18 : i32 to vector<64x1xi32>
    %49 = arith.cmpi sge, %47, %48 : vector<64x1xi32>
    %50 = arith.extui %49 : vector<64x1xi1> to vector<64x1xi32>
    %51 = arith.sitofp %50 : vector<64x1xi32> to vector<64x1xf32>
    %c6_i32 = arith.constant 6 : i32
    %52 = vector.broadcast %c6_i32 : i32 to vector<64x1xi32>
    %53 = arith.cmpi sle, %47, %52 : vector<64x1xi32>
    %54 = arith.extui %53 : vector<64x1xi1> to vector<64x1xi32>
    %55 = arith.sitofp %54 : vector<64x1xi32> to vector<64x1xf32>
    %c0_19 = arith.constant 0 : index
    %c0_20 = arith.constant 0 : index
    %56 = vector.load %arg6[%c0_19, %c0_20] : memref<9x128xf32, #tpu.memory_space<vmem>>, vector<1x128xf32>
    %57 = vector.broadcast %51 : vector<64x1xf32> to vector<64x128xf32>
    %58 = vector.broadcast %56 : vector<1x128xf32> to vector<64x128xf32>
    %59 = arith.mulf %57, %58 : vector<64x128xf32>
    %c1 = arith.constant 1 : index
    %c0_21 = arith.constant 0 : index
    %60 = vector.load %arg6[%c1, %c0_21] : memref<9x128xf32, #tpu.memory_space<vmem>>, vector<1x128xf32>
    %c2 = arith.constant 2 : index
    %c0_22 = arith.constant 0 : index
    %61 = vector.load %arg6[%c2, %c0_22] : memref<9x128xf32, #tpu.memory_space<vmem>>, vector<1x128xf32>
    %62 = vector.broadcast %55 : vector<64x1xf32> to vector<64x128xf32>
    %63 = vector.broadcast %61 : vector<1x128xf32> to vector<64x128xf32>
    %64 = arith.mulf %62, %63 : vector<64x128xf32>
    %c3 = arith.constant 3 : index
    %c0_23 = arith.constant 0 : index
    %65 = vector.load %arg6[%c3, %c0_23] : memref<9x128xf32, #tpu.memory_space<vmem>>, vector<1x128xf32>
    %66 = vector.broadcast %51 : vector<64x1xf32> to vector<64x128xf32>
    %67 = vector.broadcast %65 : vector<1x128xf32> to vector<64x128xf32>
    %68 = arith.mulf %66, %67 : vector<64x128xf32>
    %c4 = arith.constant 4 : index
    %c0_24 = arith.constant 0 : index
    %69 = vector.load %arg6[%c4, %c0_24] : memref<9x128xf32, #tpu.memory_space<vmem>>, vector<1x128xf32>
    %c5 = arith.constant 5 : index
    %c0_25 = arith.constant 0 : index
    %70 = vector.load %arg6[%c5, %c0_25] : memref<9x128xf32, #tpu.memory_space<vmem>>, vector<1x128xf32>
    %71 = vector.broadcast %55 : vector<64x1xf32> to vector<64x128xf32>
    %72 = vector.broadcast %70 : vector<1x128xf32> to vector<64x128xf32>
    %73 = arith.mulf %71, %72 : vector<64x128xf32>
    %c6 = arith.constant 6 : index
    %c0_26 = arith.constant 0 : index
    %74 = vector.load %arg6[%c6, %c0_26] : memref<9x128xf32, #tpu.memory_space<vmem>>, vector<1x128xf32>
    %75 = vector.broadcast %51 : vector<64x1xf32> to vector<64x128xf32>
    %76 = vector.broadcast %74 : vector<1x128xf32> to vector<64x128xf32>
    %77 = arith.mulf %75, %76 : vector<64x128xf32>
    %c7 = arith.constant 7 : index
    %c0_27 = arith.constant 0 : index
    %78 = vector.load %arg6[%c7, %c0_27] : memref<9x128xf32, #tpu.memory_space<vmem>>, vector<1x128xf32>
    %c8 = arith.constant 8 : index
    %c0_28 = arith.constant 0 : index
    %79 = vector.load %arg6[%c8, %c0_28] : memref<9x128xf32, #tpu.memory_space<vmem>>, vector<1x128xf32>
    %80 = vector.broadcast %55 : vector<64x1xf32> to vector<64x128xf32>
    %81 = vector.broadcast %79 : vector<1x128xf32> to vector<64x128xf32>
    %82 = arith.mulf %80, %81 : vector<64x128xf32>
    %cst_29 = arith.constant 0.000000e+00 : f32
    %83 = vector.broadcast %cst_29 : f32 to vector<16x128xf32>
    %c0_30 = arith.constant 0 : index
    %c0_31 = arith.constant 0 : index
    %c0_32 = arith.constant 0 : index
    %84 = vector.load %arg11[%c0_30, %c0_31, %c0_32] : memref<2x96x128xf32, #tpu.memory_space<vmem>>, vector<1x16x128xf32>
    %85 = vector.shape_cast %84 : vector<1x16x128xf32> to vector<16x128xf32>
    %86 = vector.shape_cast %83 : vector<16x128xf32> to vector<1x16x128xf32>
    tpu.vector_store %arg11[%c0_30, %c0_31, %c0_32], %86 {strides = array<i32>} : memref<2x96x128xf32, #tpu.memory_space<vmem>>, vector<1x16x128xf32>,
    %c0_33 = arith.constant 0 : index
    %c80 = arith.constant 80 : index
    %c0_34 = arith.constant 0 : index
    %87 = vector.load %arg11[%c0_33, %c80, %c0_34] : memref<2x96x128xf32, #tpu.memory_space<vmem>>, vector<1x16x128xf32>
    %88 = vector.shape_cast %87 : vector<1x16x128xf32> to vector<16x128xf32>
    %89 = vector.shape_cast %83 : vector<16x128xf32> to vector<1x16x128xf32>
    tpu.vector_store %arg11[%c0_33, %c80, %c0_34], %89 {strides = array<i32>} : memref<2x96x128xf32, #tpu.memory_space<vmem>>, vector<1x16x128xf32>,
    %90 = vector.extract_strided_slice %30 {offsets = [0, 0], sizes = [64, 128], strides = [1, 1]} : vector<128x128xf32> to vector<64x128xf32>
    %c0_35 = arith.constant 0 : index
    %c16 = arith.constant 16 : index
    %c0_36 = arith.constant 0 : index
    %91 = vector.load %arg11[%c0_35, %c16, %c0_36] : memref<2x96x128xf32, #tpu.memory_space<vmem>>, vector<1x64x128xf32>
    %92 = vector.shape_cast %91 : vector<1x64x128xf32> to vector<64x128xf32>
    %93 = vector.shape_cast %90 : vector<64x128xf32> to vector<1x64x128xf32>
    tpu.vector_store %arg11[%c0_35, %c16, %c0_36], %93 {strides = array<i32>} : memref<2x96x128xf32, #tpu.memory_space<vmem>>, vector<1x64x128xf32>,
    %cst_37 = arith.constant 0.000000e+00 : f32
    %94 = vector.broadcast %cst_37 : f32 to vector<64x128xf32>
    %c0_38 = arith.constant 0 : index
    %c7_39 = arith.constant 7 : index
    %c0_40 = arith.constant 0 : index
    %95 = vector.load %arg11[%c0_38, %c7_39, %c0_40] : memref<2x96x128xf32, #tpu.memory_space<vmem>>, vector<1x64x128xf32>
    %96 = vector.shape_cast %95 : vector<1x64x128xf32> to vector<64x128xf32>
    %97 = arith.mulf %96, %59 : vector<64x128xf32>
    %98 = arith.addf %94, %97 : vector<64x128xf32>
    %c0_41 = arith.constant 0 : index
    %c8_42 = arith.constant 8 : index
    %c0_43 = arith.constant 0 : index
    %99 = vector.load %arg11[%c0_41, %c8_42, %c0_43] : memref<2x96x128xf32, #tpu.memory_space<vmem>>, vector<1x64x128xf32>
    %100 = vector.shape_cast %99 : vector<1x64x128xf32> to vector<64x128xf32>
    %101 = vector.broadcast %60 : vector<1x128xf32> to vector<64x128xf32>
    %102 = arith.mulf %100, %101 : vector<64x128xf32>
    %103 = arith.addf %98, %102 : vector<64x128xf32>
    %c0_44 = arith.constant 0 : index
    %c9 = arith.constant 9 : index
    %c0_45 = arith.constant 0 : index
    %104 = vector.load %arg11[%c0_44, %c9, %c0_45] : memref<2x96x128xf32, #tpu.memory_space<vmem>>, vector<1x64x128xf32>
    %105 = vector.shape_cast %104 : vector<1x64x128xf32> to vector<64x128xf32>
    %106 = arith.mulf %105, %64 : vector<64x128xf32>
    %107 = arith.addf %103, %106 : vector<64x128xf32>
    %c0_46 = arith.constant 0 : index
    %c15 = arith.constant 15 : index
    %c0_47 = arith.constant 0 : index
    %108 = vector.load %arg11[%c0_46, %c15, %c0_47] : memref<2x96x128xf32, #tpu.memory_space<vmem>>, vector<1x64x128xf32>
    %109 = vector.shape_cast %108 : vector<1x64x128xf32> to vector<64x128xf32>
    %110 = arith.mulf %109, %68 : vector<64x128xf32>
    %111 = arith.addf %107, %110 : vector<64x128xf32>
    %c0_48 = arith.constant 0 : index
    %c16_49 = arith.constant 16 : index
    %c0_50 = arith.constant 0 : index
    %112 = vector.load %arg11[%c0_48, %c16_49, %c0_50] : memref<2x96x128xf32, #tpu.memory_space<vmem>>, vector<1x64x128xf32>
    %113 = vector.shape_cast %112 : vector<1x64x128xf32> to vector<64x128xf32>
    %114 = vector.broadcast %69 : vector<1x128xf32> to vector<64x128xf32>
    %115 = arith.mulf %113, %114 : vector<64x128xf32>
    %116 = arith.addf %111, %115 : vector<64x128xf32>
    %c0_51 = arith.constant 0 : index
    %c17 = arith.constant 17 : index
    %c0_52 = arith.constant 0 : index
    %117 = vector.load %arg11[%c0_51, %c17, %c0_52] : memref<2x96x128xf32, #tpu.memory_space<vmem>>, vector<1x64x128xf32>
    %118 = vector.shape_cast %117 : vector<1x64x128xf32> to vector<64x128xf32>
    %119 = arith.mulf %118, %73 : vector<64x128xf32>
    %120 = arith.addf %116, %119 : vector<64x128xf32>
    %c0_53 = arith.constant 0 : index
    %c23 = arith.constant 23 : index
    %c0_54 = arith.constant 0 : index
    %121 = vector.load %arg11[%c0_53, %c23, %c0_54] : memref<2x96x128xf32, #tpu.memory_space<vmem>>, vector<1x64x128xf32>
    %122 = vector.shape_cast %121 : vector<1x64x128xf32> to vector<64x128xf32>
    %123 = arith.mulf %122, %77 : vector<64x128xf32>
    %124 = arith.addf %120, %123 : vector<64x128xf32>
    %c0_55 = arith.constant 0 : index
    %c24 = arith.constant 24 : index
    %c0_56 = arith.constant 0 : index
    %125 = vector.load %arg11[%c0_55, %c24, %c0_56] : memref<2x96x128xf32, #tpu.memory_space<vmem>>, vector<1x64x128xf32>
    %126 = vector.shape_cast %125 : vector<1x64x128xf32> to vector<64x128xf32>
    %127 = vector.broadcast %78 : vector<1x128xf32> to vector<64x128xf32>
    %128 = arith.mulf %126, %127 : vector<64x128xf32>
    %129 = arith.addf %124, %128 : vector<64x128xf32>
    %c0_57 = arith.constant 0 : index
    %c25 = arith.constant 25 : index
    %c0_58 = arith.constant 0 : index
    %130 = vector.load %arg11[%c0_57, %c25, %c0_58] : memref<2x96x128xf32, #tpu.memory_space<vmem>>, vector<1x64x128xf32>
    %131 = vector.shape_cast %130 : vector<1x64x128xf32> to vector<64x128xf32>
    %132 = arith.mulf %131, %82 : vector<64x128xf32>
    %133 = arith.addf %129, %132 : vector<64x128xf32>
    %c1_59 = arith.constant 1 : index
    %c0_60 = arith.constant 0 : index
    %c0_61 = arith.constant 0 : index
    %134 = vector.load %arg11[%c1_59, %c0_60, %c0_61] : memref<2x96x128xf32, #tpu.memory_space<vmem>>, vector<1x16x128xf32>
    %135 = vector.shape_cast %134 : vector<1x16x128xf32> to vector<16x128xf32>
    %136 = vector.shape_cast %83 : vector<16x128xf32> to vector<1x16x128xf32>
    tpu.vector_store %arg11[%c1_59, %c0_60, %c0_61], %136 {strides = array<i32>} : memref<2x96x128xf32, #tpu.memory_space<vmem>>, vector<1x16x128xf32>,
    %c1_62 = arith.constant 1 : index
    %c80_63 = arith.constant 80 : index
    %c0_64 = arith.constant 0 : index
    %137 = vector.load %arg11[%c1_62, %c80_63, %c0_64] : memref<2x96x128xf32, #tpu.memory_space<vmem>>, vector<1x16x128xf32>
    %138 = vector.shape_cast %137 : vector<1x16x128xf32> to vector<16x128xf32>
    %139 = vector.shape_cast %83 : vector<16x128xf32> to vector<1x16x128xf32>
    tpu.vector_store %arg11[%c1_62, %c80_63, %c0_64], %139 {strides = array<i32>} : memref<2x96x128xf32, #tpu.memory_space<vmem>>, vector<1x16x128xf32>,
    %140 = vector.extract_strided_slice %30 {offsets = [64, 0], sizes = [64, 128], strides = [1, 1]} : vector<128x128xf32> to vector<64x128xf32>
    %c1_65 = arith.constant 1 : index
    %c16_66 = arith.constant 16 : index
    %c0_67 = arith.constant 0 : index
    %141 = vector.load %arg11[%c1_65, %c16_66, %c0_67] : memref<2x96x128xf32, #tpu.memory_space<vmem>>, vector<1x64x128xf32>
    %142 = vector.shape_cast %141 : vector<1x64x128xf32> to vector<64x128xf32>
    %143 = vector.shape_cast %140 : vector<64x128xf32> to vector<1x64x128xf32>
    tpu.vector_store %arg11[%c1_65, %c16_66, %c0_67], %143 {strides = array<i32>} : memref<2x96x128xf32, #tpu.memory_space<vmem>>, vector<1x64x128xf32>,
    %cst_68 = arith.constant 0.000000e+00 : f32
    %144 = vector.broadcast %cst_68 : f32 to vector<64x128xf32>
    %c1_69 = arith.constant 1 : index
    %c7_70 = arith.constant 7 : index
    %c0_71 = arith.constant 0 : index
    %145 = vector.load %arg11[%c1_69, %c7_70, %c0_71] : memref<2x96x128xf32, #tpu.memory_space<vmem>>, vector<1x64x128xf32>
    %146 = vector.shape_cast %145 : vector<1x64x128xf32> to vector<64x128xf32>
    %147 = arith.mulf %146, %59 : vector<64x128xf32>
    %148 = arith.addf %144, %147 : vector<64x128xf32>
    %c1_72 = arith.constant 1 : index
    %c8_73 = arith.constant 8 : index
    %c0_74 = arith.constant 0 : index
    %149 = vector.load %arg11[%c1_72, %c8_73, %c0_74] : memref<2x96x128xf32, #tpu.memory_space<vmem>>, vector<1x64x128xf32>
    %150 = vector.shape_cast %149 : vector<1x64x128xf32> to vector<64x128xf32>
    %151 = vector.broadcast %60 : vector<1x128xf32> to vector<64x128xf32>
    %152 = arith.mulf %150, %151 : vector<64x128xf32>
    %153 = arith.addf %148, %152 : vector<64x128xf32>
    %c1_75 = arith.constant 1 : index
    %c9_76 = arith.constant 9 : index
    %c0_77 = arith.constant 0 : index
    %154 = vector.load %arg11[%c1_75, %c9_76, %c0_77] : memref<2x96x128xf32, #tpu.memory_space<vmem>>, vector<1x64x128xf32>
    %155 = vector.shape_cast %154 : vector<1x64x128xf32> to vector<64x128xf32>
    %156 = arith.mulf %155, %64 : vector<64x128xf32>
    %157 = arith.addf %153, %156 : vector<64x128xf32>
    %c1_78 = arith.constant 1 : index
    %c15_79 = arith.constant 15 : index
    %c0_80 = arith.constant 0 : index
    %158 = vector.load %arg11[%c1_78, %c15_79, %c0_80] : memref<2x96x128xf32, #tpu.memory_space<vmem>>, vector<1x64x128xf32>
    %159 = vector.shape_cast %158 : vector<1x64x128xf32> to vector<64x128xf32>
    %160 = arith.mulf %159, %68 : vector<64x128xf32>
    %161 = arith.addf %157, %160 : vector<64x128xf32>
    %c1_81 = arith.constant 1 : index
    %c16_82 = arith.constant 16 : index
    %c0_83 = arith.constant 0 : index
    %162 = vector.load %arg11[%c1_81, %c16_82, %c0_83] : memref<2x96x128xf32, #tpu.memory_space<vmem>>, vector<1x64x128xf32>
    %163 = vector.shape_cast %162 : vector<1x64x128xf32> to vector<64x128xf32>
    %164 = vector.broadcast %69 : vector<1x128xf32> to vector<64x128xf32>
    %165 = arith.mulf %163, %164 : vector<64x128xf32>
    %166 = arith.addf %161, %165 : vector<64x128xf32>
    %c1_84 = arith.constant 1 : index
    %c17_85 = arith.constant 17 : index
    %c0_86 = arith.constant 0 : index
    %167 = vector.load %arg11[%c1_84, %c17_85, %c0_86] : memref<2x96x128xf32, #tpu.memory_space<vmem>>, vector<1x64x128xf32>
    %168 = vector.shape_cast %167 : vector<1x64x128xf32> to vector<64x128xf32>
    %169 = arith.mulf %168, %73 : vector<64x128xf32>
    %170 = arith.addf %166, %169 : vector<64x128xf32>
    %c1_87 = arith.constant 1 : index
    %c23_88 = arith.constant 23 : index
    %c0_89 = arith.constant 0 : index
    %171 = vector.load %arg11[%c1_87, %c23_88, %c0_89] : memref<2x96x128xf32, #tpu.memory_space<vmem>>, vector<1x64x128xf32>
    %172 = vector.shape_cast %171 : vector<1x64x128xf32> to vector<64x128xf32>
    %173 = arith.mulf %172, %77 : vector<64x128xf32>
    %174 = arith.addf %170, %173 : vector<64x128xf32>
    %c1_90 = arith.constant 1 : index
    %c24_91 = arith.constant 24 : index
    %c0_92 = arith.constant 0 : index
    %175 = vector.load %arg11[%c1_90, %c24_91, %c0_92] : memref<2x96x128xf32, #tpu.memory_space<vmem>>, vector<1x64x128xf32>
    %176 = vector.shape_cast %175 : vector<1x64x128xf32> to vector<64x128xf32>
    %177 = vector.broadcast %78 : vector<1x128xf32> to vector<64x128xf32>
    %178 = arith.mulf %176, %177 : vector<64x128xf32>
    %179 = arith.addf %174, %178 : vector<64x128xf32>
    %c1_93 = arith.constant 1 : index
    %c25_94 = arith.constant 25 : index
    %c0_95 = arith.constant 0 : index
    %180 = vector.load %arg11[%c1_93, %c25_94, %c0_95] : memref<2x96x128xf32, #tpu.memory_space<vmem>>, vector<1x64x128xf32>
    %181 = vector.shape_cast %180 : vector<1x64x128xf32> to vector<64x128xf32>
    %182 = arith.mulf %181, %82 : vector<64x128xf32>
    %183 = arith.addf %179, %182 : vector<64x128xf32>
    %184 = tpu.concatenate %133, %183 in 0 : vector<64x128xf32>, vector<64x128xf32> -> vector<128x128xf32>
    %c0_96 = arith.constant 0 : index
    %c0_97 = arith.constant 0 : index
    %185 = vector.load %arg7[%c0_96, %c0_97] : memref<1x128xf32, #tpu.memory_space<vmem>>, vector<1x128xf32>
    %186 = vector.broadcast %185 : vector<1x128xf32> to vector<128x128xf32>
    %187 = arith.addf %184, %186 : vector<128x128xf32>
    %cst_98 = arith.constant 5.000000e-01 : f32
    %188 = vector.broadcast %cst_98 : f32 to vector<128x128xf32>
    %189 = arith.mulf %188, %187 : vector<128x128xf32>
    %cst_99 = arith.constant 4.471500e-02 : f32
    %190 = vector.broadcast %cst_99 : f32 to vector<128x128xf32>
    %191 = arith.mulf %190, %187 : vector<128x128xf32>
    %192 = arith.mulf %191, %187 : vector<128x128xf32>
    %193 = arith.mulf %192, %187 : vector<128x128xf32>
    %194 = arith.addf %187, %193 : vector<128x128xf32>
    %cst_100 = arith.constant 0.797884583 : f32
    %195 = vector.broadcast %cst_100 : f32 to vector<128x128xf32>
    %196 = arith.mulf %195, %194 : vector<128x128xf32>
    %197 = math.tanh %196 : vector<128x128xf32>
    %cst_101 = arith.constant 1.000000e+00 : f32
    %198 = vector.broadcast %cst_101 : f32 to vector<128x128xf32>
    %199 = arith.addf %198, %197 : vector<128x128xf32>
    %200 = arith.mulf %189, %199 : vector<128x128xf32>
    %c0_102 = arith.constant 0 : index
    %c0_103 = arith.constant 0 : index
    %201 = vector.load %arg8[%c0_102, %c0_103] : memref<128x128xf32, #tpu.memory_space<vmem>>, vector<128x128xf32>
    %cst_104 = arith.constant dense<0.000000e+00> : vector<128x128xf32>
    %202 = tpu.matmul %200, %201, %cst_104 {dimension_numbers = #tpu.dot_dimension_numbers<[1], [0], [0], [1], [0, 0, 1, 1], [], []>} : vector<128x128xf32>, vector<128x128xf32>, vector<128x128xf32> -> vector<128x128xf32>
    %c0_105 = arith.constant 0 : index
    %c0_106 = arith.constant 0 : index
    %203 = vector.load %arg9[%c0_105, %c0_106] : memref<1x128xf32, #tpu.memory_space<vmem>>, vector<1x128xf32>
    %204 = vector.broadcast %203 : vector<1x128xf32> to vector<128x128xf32>
    %205 = arith.addf %202, %204 : vector<128x128xf32>
    %206 = vector.shape_cast %205 : vector<128x128xf32> to vector<2x64x128xf32>
    %207 = arith.addf %0, %206 : vector<2x64x128xf32>
    %c0_107 = arith.constant 0 : index
    %c0_108 = arith.constant 0 : index
    %c0_109 = arith.constant 0 : index
    %208 = vector.load %arg10[%c0_107, %c0_108, %c0_109] : memref<2x64x128xf32, #tpu.memory_space<vmem>>, vector<2x64x128xf32>
    tpu.vector_store %arg10[%c0_107, %c0_108, %c0_109], %207 {strides = array<i32>} : memref<2x64x128xf32, #tpu.memory_space<vmem>>, vector<2x64x128xf32>,
    return
  }
  func.func @transform_0(%arg0: i32) -> (i32, i32, i32) {
    %c0_i32 = arith.constant 0 : i32
    %c0_i32_0 = arith.constant 0 : i32
    %c0_i32_1 = arith.constant 0 : i32
    return %arg0, %c0_i32, %c0_i32_0 : i32, i32, i32
  }
  func.func @transform_1(%arg0: i32) -> (i32, i32) {
    %c0_i32 = arith.constant 0 : i32
    %c0_i32_0 = arith.constant 0 : i32
    %c0_i32_1 = arith.constant 0 : i32
    return %c0_i32, %c0_i32_0 : i32, i32
  }
  func.func @transform_2(%arg0: i32) -> (i32, i32) {
    %c0_i32 = arith.constant 0 : i32
    %c0_i32_0 = arith.constant 0 : i32
    %c0_i32_1 = arith.constant 0 : i32
    return %c0_i32, %c0_i32_0 : i32, i32
  }
  func.func @transform_3(%arg0: i32) -> (i32, i32) {
    %c0_i32 = arith.constant 0 : i32
    %c0_i32_0 = arith.constant 0 : i32
    %c0_i32_1 = arith.constant 0 : i32
    return %c0_i32, %c0_i32_0 : i32, i32
  }
  func.func @transform_4(%arg0: i32) -> (i32, i32) {
    %c0_i32 = arith.constant 0 : i32
    %c0_i32_0 = arith.constant 0 : i32
    %c0_i32_1 = arith.constant 0 : i32
    return %c0_i32, %c0_i32_0 : i32, i32
  }
  func.func @transform_5(%arg0: i32) -> (i32, i32) {
    %c0_i32 = arith.constant 0 : i32
    %c0_i32_0 = arith.constant 0 : i32
    %c0_i32_1 = arith.constant 0 : i32
    return %c0_i32, %c0_i32_0 : i32, i32
  }
  func.func @transform_6(%arg0: i32) -> (i32, i32) {
    %c0_i32 = arith.constant 0 : i32
    %c0_i32_0 = arith.constant 0 : i32
    %c0_i32_1 = arith.constant 0 : i32
    return %c0_i32, %c0_i32_0 : i32, i32
  }
  func.func @transform_7(%arg0: i32) -> (i32, i32) {
    %c0_i32 = arith.constant 0 : i32
    %c0_i32_0 = arith.constant 0 : i32
    %c0_i32_1 = arith.constant 0 : i32
    return %c0_i32, %c0_i32_0 : i32, i32
  }
  func.func @transform_8(%arg0: i32) -> (i32, i32) {
    %c0_i32 = arith.constant 0 : i32
    %c0_i32_0 = arith.constant 0 : i32
    %c0_i32_1 = arith.constant 0 : i32
    return %c0_i32, %c0_i32_0 : i32, i32
  }
  func.func @transform_9(%arg0: i32) -> (i32, i32, i32) {
    %c0_i32 = arith.constant 0 : i32
    %c0_i32_0 = arith.constant 0 : i32
    %c0_i32_1 = arith.constant 0 : i32
    return %arg0, %c0_i32, %c0_i32_0 : i32, i32, i32
  }
}

</mosaic_0001>

<bundles_post_ra>
// kernel: block_forward.3
= control target key start
LH: loop header
LB: loop body
LE: loop exit
PB: predicated region body
PF: predicated region fallthrough
CT: control target
= control target key end

     0   :  { %s2249_s30 = smov 0   ;;  %s3185_s0 = inlined_call_operand.vmem [shape: f32[4,64,128], index: 0, kind: input, shape index: {}, may-alias: {0,9}]   ;;  %s3186_s1 = inlined_call_operand.vmem [shape: f32[1,128], index: 1, kind: input, shape index: {}]   ;;  %s3187_s2 = inlined_call_operand.vmem [shape: f32[1,128], index: 2, kind: input, shape index: {}]   ;;  %s3188_s3 = inlined_call_operand.vmem [shape: f32[128,128], index: 3, kind: input, shape index: {}]   ;;  %s3189_s4 = inlined_call_operand.vmem [shape: f32[1,128], index: 4, kind: input, shape index: {}]   ;;  %s3190_s5 = inlined_call_operand.vmem [shape: f32[9,128], index: 5, kind: input, shape index: {}]   ;;  %s3191_s6 = inlined_call_operand.vmem [shape: f32[1,128], index: 6, kind: input, shape index: {}]   ;;  %s3192_s7 = inlined_call_operand.vmem [shape: f32[128,128], index: 7, kind: input, shape index: {}]   ;;  %s3193_s8 = inlined_call_operand.vmem [shape: f32[1,128], index: 8, kind: input, shape index: {}]   ;;  %s3194_s9 = inlined_call_operand.vmem [shape: f32[4,64,128], index: 9, kind: output, shape index: {}, may-alias: {0,9}]  }
   0x1 LB: > { %s1823_s10 = sadd.s32 4294967295, %s2196_s30   ;;  %p1827_p0 = scmp.ge.s32.totalorder %s2196_s30, 1  ;;  %s2196_s30 = sphi %s2249_s30, %s19_s30  }
   0x2   : > { %p289_p1 = scmp.lt.s32.totalorder %s2196_s30, 3 }
   0x4   : > { %p290_p2 = pnand %p1827_p0, %p289_p1 }
   0x6   : > { %293 = sbr.rel (%p290_p2) target bundleno = 765 (0x2fd), region = 56 }
   0xd   : > { %s1828_s11 = sshll.u32 %s1823_s10, 1  ;;  %v611_v0 = vld [vmem:[%s3188_s3] sm:$0xff]  ;;  %v612_v1 = vld [vmem:[%s3188_s3 + $0x8] sm:$0xff]  ;;  %v613_v13 = vld [vmem:[%s3188_s3 + $0x10] sm:$0xff] }
   0xe   : > { %p328_p3 = scmp.lt.s32.totalorder %s1828_s11, 3  ;;  %v2044_v2 = vpack.c.bf16 %v612_v1, %v611_v0  ;;  %v614_v14 = vld [vmem:[%s3188_s3 + $0x18] sm:$0xff]  ;;  %v615_v18 = vld [vmem:[%s3188_s3 + $0x20] sm:$0xff]  ;;  %v616_v19 = vld [vmem:[%s3188_s3 + $0x28] sm:$0xff] }
   0xf   : > { %v2048_v15 = vpack.c.bf16 %v614_v14, %v613_v13  ;;  %v2052_v20 = vpack.c.bf16 %v616_v19, %v615_v18  ;;  %v617_v23 = vld [vmem:[%s3188_s3 + $0x30] sm:$0xff]  ;;  %v618_v24 = vld [vmem:[%s3188_s3 + $0x38] sm:$0xff]  ;;  %v619_v28 = vld [vmem:[%s3188_s3 + $0x40] sm:$0xff] }
  0x10   : > { %s3331_s11 = smov (!%p328_p3, %s1828_s11), 3  ;;  %2045 = vmatprep.subr.bf16.mxu0 %v2044_v2  ;;  %v2056_v25 = vpack.c.bf16 %v618_v24, %v617_v23  ;;  %v620_v29 = vld [vmem:[%s3188_s3 + $0x48] sm:$0xff]  ;;  %v621_v33 = vld [vmem:[%s3188_s3 + $0x50] sm:$0xff]  ;;  %v622_v34 = vld [vmem:[%s3188_s3 + $0x58] sm:$0xff] }
  0x11   : > { %2047 = vmatpush3.bf16.msra.mxu0 %v2044_v2  ;;  %s1866_s16 = sshll.u32 %s3331_s11, 6  ;;  %v2060_v30 = vpack.c.bf16 %v620_v29, %v619_v28  ;;  %v2064_v37 = vpack.c.bf16 %v622_v34, %v621_v33  ;;  %v623_v38 = vld [vmem:[%s3188_s3 + $0x60] sm:$0xff]  ;;  %v624_v39 = vld [vmem:[%s3188_s3 + $0x68] sm:$0xff]  ;;  %v625_v43 = vld [vmem:[%s3188_s3 + $0x70] sm:$0xff] }
  0x12   : > { %s2271_s19 = scalar_lea.vmem %s3185_s0, %s1866_s16  ;;  %2049 = vmatprep.subr.bf16.mxu0 %v2048_v15  ;;  %v2068_v40 = vpack.c.bf16 %v624_v39, %v623_v38  ;;  %v626_v44 = vld [vmem:[%s3188_s3 + $0x78] sm:$0xff]  ;;  %s3133_s27 = scalar_lea.vmem %s3194_s9, %s1866_s16 }
  0x13   : > { %v2274_v3 = vld [vmem:[%s2271_s19 + $0x18] sm:$0xff]  ;;  %v2277_v4 = vld [vmem:[%s2271_s19] sm:$0xff]  ;;  %v2284_v6 = vld [vmem:[%s2271_s19 + $0x8] sm:$0xff]  ;;  %v2072_v47 = vpack.c.bf16 %v626_v44, %v625_v43 }
  0x14   : > { %365 = vadd.xlane.f32.xlu1 %v2274_v3  ;;  %359 = vadd.xlane.f32.xlu0 %v2277_v4  ;;  %v407_v5 = vmul.f32 %v2277_v4, %v2277_v4  ;;  %v408_v7 = vmul.f32 %v2284_v6, %v2284_v6  ;;  %v2290_v8 = vld [vmem:[%s2271_s19 + $0x10] sm:$0xff]  ;;  %v410_v10 = vmul.f32 %v2274_v3, %v2274_v3  ;;  %v2298_v11 = vld [vmem:[%s2271_s19 + $0x20] sm:$0xff]  ;;  %v2301_v12 = vld [vmem:[%s2271_s19 + $0x28] sm:$0xff] }
  0x15   : > { %v409_v9 = vmul.f32 %v2290_v8, %v2290_v8  ;;  %v411_v16 = vmul.f32 %v2298_v11, %v2298_v11  ;;  %v412_v17 = vmul.f32 %v2301_v12, %v2301_v12  ;;  %2051 = vmatpush3.bf16.msra.mxu0 %v2048_v15  ;;  %v2322_v21 = vld [vmem:[%s2271_s19 + $0x30] sm:$0xff]  ;;  %v2325_v22 = vld [vmem:[%s2271_s19 + $0x38] sm:$0xff]  ;;  %v2346_v31 = vld [vmem:[%s2271_s19 + $0x40] sm:$0xff] }
  0x16   : > { %2053 = vmatprep.subr.bf16.mxu0 %v2052_v20  ;;  %v413_v26 = vmul.f32 %v2322_v21, %v2322_v21  ;;  %v414_v27 = vmul.f32 %v2325_v22, %v2325_v22  ;;  %3236 = vst [vmem:[#allocation3_spill] sm:$0xff] %v2346_v31  ;;  %v2349_v32 = vld [vmem:[%s2271_s19 + $0x48] sm:$0xff]  ;;  %v415_v35 = vmul.f32 %v2346_v31, %v2346_v31  ;;  %v2370_v41 = vld [vmem:[%s2271_s19 + $0x50] sm:$0xff]  ;;  %v2373_v42 = vld [vmem:[%s2271_s19 + $0x58] sm:$0xff] }
  0x17   : > { %3237 = vst [vmem:[#allocation4_spill] sm:$0xff] %v2349_v32  ;;  %v416_v36 = vmul.f32 %v2349_v32, %v2349_v32  ;;  %3238 = vst [vmem:[#allocation5_spill] sm:$0xff] %v2370_v41  ;;  %v417_v45 = vmul.f32 %v2370_v41, %v2370_v41  ;;  %v418_v46 = vmul.f32 %v2373_v42, %v2373_v42  ;;  %v2388_v48 = vld [vmem:[%s2271_s19 + $0x60] sm:$0xff]  ;;  %v2391_v49 = vld [vmem:[%s2271_s19 + $0x68] sm:$0xff] }
  0x18   : > { %361 = vadd.xlane.f32.xlu0 %v2284_v6  ;;  %423 = vadd.xlane.f32.xlu1 %v407_v5  ;;  %3239 = vst [vmem:[#allocation6_spill] sm:$0xff] %v2373_v42  ;;  %3240 = vst [vmem:[#allocation7_spill] sm:$0xff] %v2388_v48  ;;  %v419_v50 = vmul.f32 %v2388_v48, %v2388_v48  ;;  %v420_v51 = vmul.f32 %v2391_v49, %v2391_v49  ;;  %v2400_v52 = vld [vmem:[%s2271_s19 + $0x70] sm:$0xff]  ;;  %v2403_v53 = vld [vmem:[%s2271_s19 + $0x78] sm:$0xff] }
  0x19   : > { %2055 = vmatpush3.bf16.msra.mxu0 %v2052_v20  ;;  %3241 = vst [vmem:[#allocation8_spill] sm:$0xff] %v2391_v49  ;;  %3242 = vst [vmem:[#allocation9_spill] sm:$0xff] %v2400_v52  ;;  %v421_v54 = vmul.f32 %v2400_v52, %v2400_v52  ;;  %v422_v55 = vmul.f32 %v2403_v53, %v2403_v53  ;;  %v2427_v44 = vld [vmem:[%s3186_s1] ss:$0 sm:$0xff] }
  0x1a   : > { %2057 = vmatprep.subr.bf16.mxu0 %v2056_v25  ;;  %3243 = vst [vmem:[#allocation10_spill] sm:$0xff] %v2403_v53 }
  0x1c   : > { %363 = vadd.xlane.f32.xlu0 %v2290_v8  ;;  %425 = vadd.xlane.f32.xlu1 %v408_v7 }
  0x1d   : > { %2059 = vmatpush3.bf16.msra.mxu0 %v2056_v25 }
  0x1e   : > { %2061 = vmatprep.subr.bf16.mxu0 %v2060_v30 }
  0x20   : > { %427 = vadd.xlane.f32.xlu0 %v409_v9  ;;  %429 = vadd.xlane.f32.xlu1 %v410_v10 }
  0x21   : > { %2063 = vmatpush3.bf16.msra.mxu0 %v2060_v30 }
  0x22   : > { %2065 = vmatprep.subr.bf16.mxu0 %v2064_v37 }
  0x24   : > { %367 = vadd.xlane.f32.xlu0 %v2298_v11  ;;  %369 = vadd.xlane.f32.xlu1 %v2301_v12 }
  0x25   : > { %2067 = vmatpush3.bf16.msra.mxu0 %v2064_v37 }
  0x26   : > { %2069 = vmatprep.subr.bf16.mxu0 %v2068_v40 }
  0x28   : > { %431 = vadd.xlane.f32.xlu0 %v411_v16  ;;  %433 = vadd.xlane.f32.xlu1 %v412_v17 }
  0x29   : > { %2071 = vmatpush3.bf16.msra.mxu0 %v2068_v40 }
  0x2a   : > { %2073 = vmatprep.subr.bf16.mxu0 %v2072_v47 }
  0x2c   : > { %371 = vadd.xlane.f32.xlu0 %v2322_v21  ;;  %373 = vadd.xlane.f32.xlu1 %v2325_v22 }
  0x2d   : > { %2075 = vmatpush3.bf16.msra.mxu0 %v2072_v47 }
  0x30   : > { %435 = vadd.xlane.f32.xlu0 %v413_v26  ;;  %437 = vadd.xlane.f32.xlu1 %v414_v27 }
  0x34   : > { %375 = vadd.xlane.f32.xlu0 %v2346_v31  ;;  %377 = vadd.xlane.f32.xlu1 %v2349_v32 }
  0x38   : > { %439 = vadd.xlane.f32.xlu0 %v415_v35  ;;  %441 = vadd.xlane.f32.xlu1 %v416_v36 }
  0x3c   : > { %379 = vadd.xlane.f32.xlu0 %v2370_v41  ;;  %381 = vadd.xlane.f32.xlu1 %v2373_v42 }
  0x40   : > { %443 = vadd.xlane.f32.xlu0 %v417_v45  ;;  %445 = vadd.xlane.f32.xlu1 %v418_v46 }
  0x44   : > { %383 = vadd.xlane.f32.xlu0 %v2388_v48  ;;  %385 = vadd.xlane.f32.xlu1 %v2391_v49 }
  0x48   : > { %447 = vadd.xlane.f32.xlu0 %v419_v50  ;;  %449 = vadd.xlane.f32.xlu1 %v420_v51 }
  0x4c   : > { %387 = vadd.xlane.f32.xlu0 %v2400_v52  ;;  %389 = vadd.xlane.f32.xlu1 %v2403_v53 }
  0x50   : > { %451 = vadd.xlane.f32.xlu0 %v421_v54  ;;  %453 = vadd.xlane.f32.xlu1 %v422_v55 }
  0xa1   : > { %v366_v56 = vpop.xlane.xlu1 %365  ;;  %v360_v57 = vpop.xlane.xlu0 %359 }
  0xa2   : > { %v391_v58 = vmul.f32 0.03125, %v360_v57  ;;  %v2411_v1 = vmul.f32 0.03125, %v366_v56 }
  0xa4   : > { %v471_v61 = vmul.f32 %v391_v58, %v391_v58  ;;  %v474_v15 = vmul.f32 %v2411_v1, %v2411_v1  ;;  %v503_v35 = vsub.f32 %v2277_v4, %v391_v58  ;;  %v2432_v4 = vld [vmem:[%s3187_s2] ss:$0 sm:$0xff] }
  0xa5   : > { %v362_v59 = vpop.xlane.xlu0 %361  ;;  %v424_v60 = vpop.xlane.xlu1 %423 }
  0xa6   : > { %v392_v62 = vmul.f32 0.03125, %v362_v59  ;;  %v455_v63 = vmul.f32 0.03125, %v424_v60 }
  0xa8   : > { %v487_v0 = vsub.f32 %v455_v63, %v471_v61  ;;  %v472_v7 = vmul.f32 %v392_v62, %v392_v62  ;;  %v504_v50 = vsub.f32 %v2284_v6, %v392_v62 }
  0xa9   : > { %v364_v2 = vpop.xlane.xlu0 %363  ;;  %v426_v5 = vpop.xlane.xlu1 %425 }
  0xaa   : > { %v519_v9 = vadd.f32 1e-05, %v487_v0  ;;  %v393_v10 = vmul.f32 0.03125, %v364_v2  ;;  %v456_v13 = vmul.f32 0.03125, %v426_v5 }
  0xac   : > { %2117 = vrsqrt.f32 %v519_v9  ;;  %v488_v14 = vsub.f32 %v456_v13, %v472_v7  ;;  %v473_v18 = vmul.f32 %v393_v10, %v393_v10  ;;  %v505_v6 = vsub.f32 %v2290_v8, %v393_v10 }
  0xad   : > { %v428_v16 = vpop.xlane.xlu0 %427  ;;  %v430_v17 = vpop.xlane.xlu1 %429  ;;  %v506_v9 = vsub.f32 %v2274_v3, %v2411_v1 }
  0xae   : > { %v520_v19 = vadd.f32 1e-05, %v488_v14  ;;  %v457_v20 = vmul.f32 0.03125, %v428_v16  ;;  %v458_v23 = vmul.f32 0.03125, %v430_v17 }
  0xb0   : > { %2119 = vrsqrt.f32 %v520_v19  ;;  %v489_v24 = vsub.f32 %v457_v20, %v473_v18  ;;  %v490_v25 = vsub.f32 %v458_v23, %v474_v15 }
  0xb1   : > { %v368_v26 = vpop.xlane.xlu0 %367  ;;  %v370_v27 = vpop.xlane.xlu1 %369 }
  0xb2   : > { %v521_v28 = vadd.f32 1e-05, %v489_v24  ;;  %v522_v29 = vadd.f32 1e-05, %v490_v25  ;;  %v2415_v30 = vmul.f32 0.03125, %v368_v26  ;;  %v2417_v33 = vmul.f32 0.03125, %v370_v27 }
  0xb4   : > { %2121 = vrsqrt.f32 %v521_v28  ;;  %v476_v34 = vmul.f32 %v2417_v33, %v2417_v33  ;;  %v475_v39 = vmul.f32 %v2415_v30, %v2415_v30 }
  0xb5   : > { %2123 = vrsqrt.f32 %v522_v29  ;;  %v432_v36 = vpop.xlane.xlu0 %431  ;;  %v434_v37 = vpop.xlane.xlu1 %433 }
  0xb6   : > { %v2118_v38 = vpop.eup %2117  ;;  %v459_v40 = vmul.f32 0.03125, %v432_v36  ;;  %v460_v43 = vmul.f32 0.03125, %v434_v37 }
  0xb7   : > { %v551_v45 = vmul.f32 %v2118_v38, %v503_v35 }
  0xb8   : > { %v491_v46 = vsub.f32 %v459_v40, %v475_v39  ;;  %v492_v47 = vsub.f32 %v460_v43, %v476_v34  ;;  %v507_v34 = vsub.f32 %v2298_v11, %v2415_v30  ;;  %v508_v39 = vsub.f32 %v2301_v12, %v2417_v33 }
  0xb9   : > { %v372_v51 = vpop.xlane.xlu0 %371  ;;  %v374_v54 = vpop.xlane.xlu1 %373  ;;  %v573_v55 = vmul.f32 %v2427_v44, %v551_v45 }
  0xba   : > { %v2120_v56 = vpop.eup %2119  ;;  %v523_v57 = vadd.f32 1e-05, %v491_v46  ;;  %v524_v58 = vadd.f32 1e-05, %v492_v47  ;;  %v2436_v59 = vmul.f32 0.03125, %v372_v51  ;;  %v2438_v60 = vmul.f32 0.03125, %v374_v54 }
  0xbb   : > { %v595_v61 = vadd.f32 %v2432_v4, %v573_v55  ;;  %v552_v63 = vmul.f32 %v2120_v56, %v504_v50 }
  0xbc   : > { %2125 = vrsqrt.f32 %v523_v57  ;;  %v478_v0 = vmul.f32 %v2438_v60, %v2438_v60  ;;  %v477_v13 = vmul.f32 %v2436_v59, %v2436_v59 }
  0xbd   : > { %2127 = vrsqrt.f32 %v524_v58  ;;  %v436_v62 = vpop.xlane.xlu0 %435  ;;  %1964 = vmatprep.mubr.f32.mxu0 %v595_v61  ;;  %v438_v2 = vpop.xlane.xlu1 %437  ;;  %v574_v5 = vmul.f32 %v2427_v44, %v552_v63 }
  0xbe   : > { %v2122_v7 = vpop.eup %2121  ;;  %v461_v14 = vmul.f32 0.03125, %v436_v62  ;;  %v462_v15 = vmul.f32 0.03125, %v438_v2 }
  0xbf   : > { %v2124_v16 = vpop.eup %2123  ;;  %v596_v17 = vadd.f32 %v2432_v4, %v574_v5  ;;  %v553_v18 = vmul.f32 %v2122_v7, %v505_v6  ;;  %v510_v7 = vsub.f32 %v2325_v22, %v2438_v60 }
  0xc0   : > { %v493_v8 = vsub.f32 %v461_v14, %v477_v13  ;;  %v494_v10 = vsub.f32 %v462_v15, %v478_v0  ;;  %v554_v19 = vmul.f32 %v2124_v16, %v506_v9  ;;  %v509_v0 = vsub.f32 %v2322_v21, %v2436_v59 }
  0xc1   : > { %v376_v20 = vpop.xlane.xlu0 %375  ;;  %1965 = vmatmul.mubr.f32.vlgmr.msra.gmra.mrb[0].mxu0 %v596_v17  ;;  %v378_v23 = vpop.xlane.xlu1 %377  ;;  %v575_v24 = vmul.f32 %v2427_v44, %v553_v18 }
  0xc2   : > { %v525_v25 = vadd.f32 1e-05, %v493_v8  ;;  %v526_v26 = vadd.f32 1e-05, %v494_v10  ;;  %v2451_v3 = vmul.f32 0.03125, %v376_v20  ;;  %v2453_v1 = vmul.f32 0.03125, %v378_v23 }
  0xc3   : > { %v597_v27 = vadd.f32 %v2432_v4, %v575_v24  ;;  %v576_v28 = vmul.f32 %v2427_v44, %v554_v19 }
  0xc4   : > { %2129 = vrsqrt.f32 %v525_v25  ;;  %v480_v29 = vmul.f32 %v2453_v1, %v2453_v1  ;;  %v479_v40 = vmul.f32 %v2451_v3, %v2451_v3 }
  0xc5   : > { %2131 = vrsqrt.f32 %v526_v26  ;;  %v440_v35 = vpop.xlane.xlu0 %439  ;;  %1967 = vmatprep.mubr.f32.mxu0 %v597_v27  ;;  %v442_v36 = vpop.xlane.xlu1 %441  ;;  %v598_v37 = vadd.f32 %v2432_v4, %v576_v28  ;;  %v511_v26 = vsub.f32 %v2346_v31, %v2451_v3 }
  0xc6   : > { %v2126_v38 = vpop.eup %2125  ;;  %v463_v43 = vmul.f32 0.03125, %v440_v35  ;;  %v464_v45 = vmul.f32 0.03125, %v442_v36  ;;  %v512_v35 = vsub.f32 %v2349_v32, %v2453_v1 }
  0xc7   : > { %v2128_v46 = vpop.eup %2127  ;;  %1968 = vmatmul.mubr.f32.gmra.mrb[2].mxu0 %v598_v37  ;;  %v555_v47 = vmul.f32 %v2126_v38, %v507_v34 }
  0xc8   : > { %v495_v50 = vsub.f32 %v463_v43, %v479_v40  ;;  %v496_v11 = vsub.f32 %v464_v45, %v480_v29  ;;  %v556_v30 = vmul.f32 %v2128_v46, %v508_v39 }
  0xc9   : > { %v380_v51 = vpop.xlane.xlu0 %379  ;;  %v382_v54 = vpop.xlane.xlu1 %381  ;;  %v577_v55 = vmul.f32 %v2427_v44, %v555_v47 }
  0xca   : > { %v527_v56 = vadd.f32 1e-05, %v495_v50  ;;  %v528_v57 = vadd.f32 1e-05, %v496_v11  ;;  %v2467_v58 = vmul.f32 0.03125, %v380_v51  ;;  %v2469_v12 = vmul.f32 0.03125, %v382_v54 }
  0xcb   : > { %v599_v33 = vadd.f32 %v2432_v4, %v577_v55  ;;  %v578_v61 = vmul.f32 %v2427_v44, %v556_v30 }
  0xcc   : > { %2133 = vrsqrt.f32 %v527_v56  ;;  %v482_v63 = vmul.f32 %v2469_v12, %v2469_v12  ;;  %v481_v9 = vmul.f32 %v2467_v58, %v2467_v58 }
  0xcd   : > { %2135 = vrsqrt.f32 %v528_v57  ;;  %v444_v6 = vpop.xlane.xlu0 %443  ;;  %1970 = vmatprep.mubr.f32.mxu0 %v599_v33  ;;  %v446_v62 = vpop.xlane.xlu1 %445  ;;  %v600_v2 = vadd.f32 %v2432_v4, %v578_v61  ;;  %v513_v57 = vsub.f32 %v2370_v41, %v2467_v58 }
  0xce   : > { %v2130_v5 = vpop.eup %2129  ;;  %v465_v13 = vmul.f32 0.03125, %v444_v6  ;;  %v466_v14 = vmul.f32 0.03125, %v446_v62  ;;  %v514_v6 = vsub.f32 %v2373_v42, %v2469_v12 }
  0xcf   : > { %v2132_v15 = vpop.eup %2131  ;;  %1971 = vmatmul.mubr.f32.gmra.mrb[4].mxu0 %v600_v2  ;;  %v557_v16 = vmul.f32 %v2130_v5, %v509_v0 }
  0xd0   : > { %v497_v17 = vsub.f32 %v465_v13, %v481_v9  ;;  %v498_v21 = vsub.f32 %v466_v14, %v482_v63  ;;  %v558_v59 = vmul.f32 %v2132_v15, %v510_v7 }
  0xd1   : > { %v384_v18 = vpop.xlane.xlu0 %383  ;;  %v386_v8 = vpop.xlane.xlu1 %385  ;;  %v579_v10 = vmul.f32 %v2427_v44, %v557_v16 }
  0xd2   : > { %v529_v19 = vadd.f32 1e-05, %v497_v17  ;;  %v530_v20 = vadd.f32 1e-05, %v498_v21  ;;  %v2483_v23 = vmul.f32 0.03125, %v384_v18  ;;  %v2485_v22 = vmul.f32 0.03125, %v386_v8 }
  0xd3   : > { %v601_v60 = vadd.f32 %v2432_v4, %v579_v10  ;;  %v580_v24 = vmul.f32 %v2427_v44, %v558_v59 }
  0xd4   : > { %2137 = vrsqrt.f32 %v529_v19  ;;  %v484_v25 = vmul.f32 %v2485_v22, %v2485_v22  ;;  %v483_v36 = vmul.f32 %v2483_v23, %v2483_v23  ;;  %v515_v18 = vsub.f32 %v2388_v48, %v2483_v23 }
  0xd5   : > { %2139 = vrsqrt.f32 %v530_v20  ;;  %v448_v27 = vpop.xlane.xlu0 %447  ;;  %1973 = vmatprep.mubr.f32.mxu0 %v601_v60  ;;  %v450_v28 = vpop.xlane.xlu1 %449  ;;  %v602_v29 = vadd.f32 %v2432_v4, %v580_v24  ;;  %v516_v10 = vsub.f32 %v2391_v49, %v2485_v22 }
  0xd6   : > { %v2134_v34 = vpop.eup %2133  ;;  %v467_v37 = vmul.f32 0.03125, %v448_v27  ;;  %v468_v38 = vmul.f32 0.03125, %v450_v28 }
  0xd7   : > { %v2136_v39 = vpop.eup %2135  ;;  %1974 = vmatmul.mubr.f32.gmra.mrb[6].mxu0 %v602_v29  ;;  %v559_v40 = vmul.f32 %v2134_v34, %v511_v26 }
  0xd8   : > { %v499_v43 = vsub.f32 %v467_v37, %v483_v36  ;;  %v500_v3 = vsub.f32 %v468_v38, %v484_v25  ;;  %v560_v45 = vmul.f32 %v2136_v39, %v512_v35 }
  0xd9   : > { %v388_v46 = vpop.xlane.xlu0 %387  ;;  %v390_v47 = vpop.xlane.xlu1 %389  ;;  %v581_v50 = vmul.f32 %v2427_v44, %v559_v40  ;;  %v2198_v40 = vmov 0.0  }
  0xda   : > { %v531_v11 = vadd.f32 1e-05, %v499_v43  ;;  %v532_v30 = vadd.f32 1e-05, %v500_v3  ;;  %v405_v51 = vmul.f32 0.03125, %v388_v46  ;;  %v406_v54 = vmul.f32 0.03125, %v390_v47 }
  0xdb   : > { %v603_v1 = vadd.f32 %v2432_v4, %v581_v50  ;;  %v582_v55 = vmul.f32 %v2427_v44, %v560_v45  ;;  %1013 = vst [vmem:[#allocation2] sm:$0xff] %v2198_v40  ;;  %1014 = vst [vmem:[#allocation2 + $0x8] sm:$0xff] %v2198_v40  ;;  %v1567_v3 = vld [vmem:[%s3192_s7 + $0x10] sm:$0xff]  ;;  %v1568_v45 = vld [vmem:[%s3192_s7 + $0x18] sm:$0xff] }
  0xdc   : > { %2141 = vrsqrt.f32 %v531_v11  ;;  %v486_v56 = vmul.f32 %v406_v54, %v406_v54  ;;  %v485_v62 = vmul.f32 %v405_v51, %v405_v51  ;;  %v517_v23 = vsub.f32 %v2400_v52, %v405_v51  ;;  %1212 = vst [vmem:[#allocation2 + $0x60] sm:$0xff] %v2198_v40  ;;  %1213 = vst [vmem:[#allocation2 + $0x68] sm:$0xff] %v2198_v40  ;;  %v1569_v47 = vld [vmem:[%s3192_s7 + $0x20] sm:$0xff]  ;;  %v1570_v50 = vld [vmem:[%s3192_s7 + $0x28] sm:$0xff] }
  0xdd   : > { %2143 = vrsqrt.f32 %v532_v30  ;;  %v452_v33 = vpop.xlane.xlu0 %451  ;;  %1976 = vmatprep.mubr.f32.mxu0 %v603_v1  ;;  %v454_v61 = vpop.xlane.xlu1 %453  ;;  %v604_v63 = vadd.f32 %v2432_v4, %v582_v55  ;;  %v518_v29 = vsub.f32 %v2403_v53, %v406_v54  ;;  %1015 = vst [vmem:[#allocation2 + $0x50] sm:$0xff] %v2198_v40  ;;  %1016 = vst [vmem:[#allocation2 + $0x58] sm:$0xff] %v2198_v40  ;;  %v1571_v30 = vld [vmem:[%s3192_s7 + $0x30] sm:$0xff]  ;;  %v1572_v51 = vld [vmem:[%s3192_s7 + $0x38] sm:$0xff] }
  0xde   : > { %v2138_v0 = vpop.eup %2137  ;;  %v469_v2 = vmul.f32 0.03125, %v452_v33  ;;  %v470_v5 = vmul.f32 0.03125, %v454_v61  ;;  %1214 = vst [vmem:[#allocation2 + $0xb0] sm:$0xff] %v2198_v40  ;;  %1215 = vst [vmem:[#allocation2 + $0xb8] sm:$0xff] %v2198_v40  ;;  %v2080_v46 = vpack.c.bf16 %v1568_v45, %v1567_v3  ;;  %v2084_v11 = vpack.c.bf16 %v1570_v50, %v1569_v47  ;;  %v1573_v1 = vld [vmem:[%s3192_s7 + $0x40] sm:$0xff]  ;;  %v1574_v55 = vld [vmem:[%s3192_s7 + $0x48] sm:$0xff] }
  0xdf   : > { %v2140_v7 = vpop.eup %2139  ;;  %1977 = vmatmul.mubr.f32.gmra.mrb[8].mxu0 %v604_v63  ;;  %v561_v9 = vmul.f32 %v2138_v0, %v513_v57  ;;  %v2088_v54 = vpack.c.bf16 %v1572_v51, %v1571_v30  ;;  %v1575_v57 = vld [vmem:[%s3192_s7 + $0x50] sm:$0xff]  ;;  %v1576_v33 = vld [vmem:[%s3192_s7 + $0x58] sm:$0xff]  ;;  %v1577_v63 = vld [vmem:[%s3192_s7 + $0x60] sm:$0xff] }
  0xe0   : > { %v501_v13 = vsub.f32 %v469_v2, %v485_v62  ;;  %v502_v14 = vsub.f32 %v470_v5, %v486_v56  ;;  %v562_v15 = vmul.f32 %v2140_v7, %v514_v6  ;;  %v2092_v56 = vpack.c.bf16 %v1574_v55, %v1573_v1  ;;  %v1578_v0 = vld [vmem:[%s3192_s7 + $0x68] sm:$0xff]  ;;  %v1579_v62 = vld [vmem:[%s3192_s7 + $0x70] sm:$0xff]  ;;  %v1580_v2 = vld [vmem:[%s3192_s7 + $0x78] sm:$0xff] }
  0xe1   : > { %v583_v58 = vmul.f32 %v2427_v44, %v561_v9  ;;  %v2096_v61 = vpack.c.bf16 %v1576_v33, %v1575_v57  ;;  %v2100_v6 = vpack.c.bf16 %v1578_v0, %v1577_v63  ;;  %v2104_v5 = vpack.c.bf16 %v1580_v2, %v1579_v62  ;;  %v2647_v45 = vld [vmem:[%s3190_s5 + $0x8] ss:$0 sm:$0xff]  ;;  %v2679_v0 = vld [vmem:[%s3189_s4] ss:$0 sm:$0xff] }
  0xe2   : > { %v533_v16 = vadd.f32 1e-05, %v501_v13  ;;  %v534_v17 = vadd.f32 1e-05, %v502_v14  ;;  %v584_v21 = vmul.f32 %v2427_v44, %v562_v15  ;;  %v779_v7 = vlaneseq }
  0xe3   : > { %v605_v59 = vadd.f32 %v2432_v4, %v583_v58 }
  0xe4   : > { %2145 = vrsqrt.f32 %v533_v16  ;;  %v606_v12 = vadd.f32 %v2432_v4, %v584_v21  ;;  %v780_v9 = vshrl.u32 %v779_v7, 7  ;;  %v2584_v21 = vld [vmem:[%s3190_s5] ss:$0 sm:$0xff] }
  0xe5   : > { %2147 = vrsqrt.f32 %v534_v17  ;;  %1979 = vmatprep.mubr.f32.mxu0 %v605_v59 }
  0xe6   : > { %v2142_v8 = vpop.eup %2141  ;;  %1980 = vmatmul.mubr.f32.gmra.mrb[10].mxu0 %v606_v12  ;;  %v792_v13 = vand.u32 7, %v780_v9  ;;  %v781_v14 = vadd.s32 8, %v780_v9  ;;  %v782_v15 = vadd.s32 16, %v780_v9  ;;  %v783_v59 = vadd.s32 24, %v780_v9 }
  0xe7   : > { %v2144_v19 = vpop.eup %2143  ;;  %v563_v20 = vmul.f32 %v2142_v8, %v515_v18  ;;  %v784_v18 = vadd.s32 32, %v780_v9  ;;  %v1025_v8 = vld [vmem:[#allocation2 + $0x7] sm:$0xff]  ;;  %v786_v50 = vadd.s32 48, %v780_v9 }
  0xe8   : > { %v564_v60 = vmul.f32 %v2144_v19, %v516_v10  ;;  %vm884_vm0 = vcmp.ge.s32.totalorder %v792_v13, 1  ;;  %v799_v58 = vand.u32 7, %v781_v14  ;;  %v806_v16 = vand.u32 7, %v782_v15  ;;  %v2592_v10 = vld [vmem:[%s3190_s5 + $0x1] ss:$0 sm:$0xff] }
  0xe9   : > { %v585_v24 = vmul.f32 %v2427_v44, %v563_v20  ;;  %v1837_v17 = vsel %vm884_vm0, 1.0, %v2198_v40  ;;  %vm908_vm3 = vcmp.le.s32.totalorder %v792_v13, 6 }
  0xea   : > { %v586_v25 = vmul.f32 %v2427_v44, %v564_v60  ;;  %vm885_vm1 = vcmp.ge.s32.totalorder %v799_v58, 1  ;;  %vm886_vm2 = vcmp.ge.s32.totalorder %v806_v16, 1  ;;  %vm909_vm4 = vcmp.le.s32.totalorder %v799_v58, 6 }
  0xeb   : > { %v607_v26 = vadd.f32 %v2432_v4, %v585_v24  ;;  %v2587_v12 = vmul.f32 %v2584_v21, %v1837_v17  ;;  %v1838_v19 = vsel %vm885_vm1, 1.0, %v2198_v40  ;;  %v1839_v20 = vsel %vm886_vm2, 1.0, %v2198_v40 }
  0xec   : > { %v608_v27 = vadd.f32 %v2432_v4, %v586_v25  ;;  %v813_v60 = vand.u32 7, %v783_v59  ;;  %vm910_vm5 = vcmp.le.s32.totalorder %v806_v16, 6  ;;  %v1845_v24 = vsel %vm908_vm3, 1.0, %v2198_v40 }
  0xed   : > { %1982 = vmatprep.mubr.f32.mxu0 %v607_v26  ;;  %v1846_v25 = vsel %vm909_vm4, 1.0, %v2198_v40  ;;  %v2601_v26 = vld [vmem:[%s3190_s5 + $0x2] ss:$0 sm:$0xff] }
  0xee   : > { %v2146_v28 = vpop.eup %2145  ;;  %1983 = vmatmul.mubr.f32.gmra.mrb[12].mxu0 %v608_v27  ;;  %v2606_v27 = vld [vmem:[%s3190_s5 + $0x3] ss:$0 sm:$0xff]  ;;  %vm887_vm6 = vcmp.ge.s32.totalorder %v813_v60, 1  ;;  %vm911_vm7 = vcmp.le.s32.totalorder %v813_v60, 6 }
  0xef   : > { %v2148_v22 = vpop.eup %2147  ;;  %v565_v34 = vmul.f32 %v2146_v28, %v517_v23  ;;  %v2611_v23 = vld [vmem:[%s3190_s5 + $0x5] ss:$0 sm:$0xff]  ;;  %v1033_v28 = vmul.f32 %v1025_v8, %v2587_v12  ;;  %v1840_v30 = vsel %vm887_vm6, 1.0, %v2198_v40  ;;  %v2660_v1 = vmul.f32 %v2606_v27, %v1839_v20 }
  0xf0   : > { %v566_v35 = vmul.f32 %v2148_v22, %v518_v29  ;;  %v2615_v29 = vmul.f32 0.0, %v2592_v10  ;;  %v820_v22 = vand.u32 7, %v784_v18  ;;  %v2642_v3 = vmul.f32 %v2611_v23, %v1845_v24  ;;  %v1224_v18 = vld [vmem:[#allocation2 + $0x67] sm:$0xff] }
  0xf1   : > { %v587_v36 = vmul.f32 %v2427_v44, %v565_v34  ;;  %v2618_v34 = vmul.f32 %v2584_v21, %v1838_v19  ;;  %3250 = vst [vmem:[#allocation17_spill] sm:$0xff] %v2660_v1  ;;  %v2663_v55 = vmul.f32 %v2611_v23, %v1846_v25  ;;  %v1848_v57 = vsel %vm911_vm7, 1.0, %v2198_v40 }
  0xf2   : > { %v588_v37 = vmul.f32 %v2427_v44, %v566_v35  ;;  %v1565_v44 = vld [vmem:[%s3192_s7] sm:$0xff]  ;;  %v2621_v35 = vmul.f32 %v2584_v21, %v1839_v20  ;;  %3247 = vst [vmem:[#allocation14_spill] sm:$0xff] %v2642_v3  ;;  %v2653_v47 = vadd.f32 %v2615_v29, %v1033_v28  ;;  %vm888_vm8 = vcmp.ge.s32.totalorder %v820_v22, 1 }
  0xf3   : > { %v609_v38 = vadd.f32 %v2432_v4, %v587_v36  ;;  %v2626_v36 = vld [vmem:[%s3190_s5 + $0x6] ss:$0 sm:$0xff]  ;;  %v1841_v63 = vsel %vm888_vm8, 1.0, %v2198_v40  ;;  %vm912_vm9 = vcmp.le.s32.totalorder %v820_v22, 6  ;;  %v2688_v2 = vmul.f32 %v2584_v21, %v1840_v30 }
  0xf4   : > { %v610_v39 = vadd.f32 %v2432_v4, %v588_v37  ;;  %v1566_v4 = vld [vmem:[%s3192_s7 + $0x8] sm:$0xff]  ;;  %3244 = vst [vmem:[#allocation11_spill] sm:$0xff] %v2621_v35  ;;  %v785_v37 = vadd.s32 40, %v780_v9  ;;  %v2685_v62 = vmul.f32 %v2626_v36, %v1839_v20  ;;  %v2691_v7 = vmul.f32 %v2601_v26, %v1848_v57 }
  0xf5   : > { %1985 = vmatprep.mubr.f32.mxu0 %v609_v38  ;;  %v2076_v43 = vpack.c.bf16 %v1566_v4, %v1565_v44  ;;  %v1847_v38 = vsel %vm910_vm5, 1.0, %v2198_v40  ;;  %v2633_v44 = vmul.f32 %v2601_v26, %v1846_v25  ;;  %v2636_v4 = vmul.f32 %v2606_v27, %v1837_v17 }
  0xf6   : > { %1986 = vmatmul.mubr.f32.gmra.mrb[14].mxu0 %v610_v39  ;;  %v2630_v39 = vmul.f32 %v2601_v26, %v1845_v24  ;;  %v827_v51 = vand.u32 7, %v785_v37  ;;  %v2670_v33 = vmul.f32 %v2611_v23, %v1847_v38  ;;  %v2694_v14 = vmul.f32 %v2647_v45, %v1847_v38 }
  0xf7   : > { %2077 = vmatprep.subr.bf16.mxu1 %v2076_v43  ;;  %3245 = vst [vmem:[#allocation12_spill] sm:$0xff] %v2636_v4  ;;  %v2697_v15 = vmul.f32 %v2606_v27, %v1840_v30  ;;  %v1849_v58 = vsel %vm912_vm9, 1.0, %v2198_v40  ;;  %v2701_v16 = vmul.f32 %v2584_v21, %v1841_v63  ;;  %v2707_v8 = vmul.f32 %v2611_v23, %v1848_v57 }
  0xf8   : > { %2079 = vmatpush3.bf16.msra.mxu1 %v2076_v43  ;;  %v2639_v43 = vmul.f32 %v2606_v27, %v1838_v19  ;;  %3252 = vst [vmem:[#allocation19_spill] sm:$0xff] %v2670_v33  ;;  %vm889_vm10 = vcmp.ge.s32.totalorder %v827_v51, 1  ;;  %vm913_vm11 = vcmp.le.s32.totalorder %v827_v51, 6  ;;  %v2713_v20 = vmul.f32 %v2647_v45, %v1848_v57 }
  0xf9   : > { %2081 = vmatprep.subr.bf16.mxu1 %v2080_v46  ;;  %v2720_v28 = vmul.f32 %v2601_v26, %v1849_v58  ;;  %v1232_v22 = vmul.f32 %v1224_v18, %v2587_v12  ;;  %v2724_v37 = vmul.f32 %v2606_v27, %v1841_v63 }
  0xfa   : > { %3246 = vst [vmem:[#allocation13_spill] sm:$0xff] %v2639_v43  ;;  %3254 = vst [vmem:[#allocation21_spill] sm:$0xff] %v2713_v20 }
  0xfb   : > { %3255 = vst [vmem:[#allocation22_spill] sm:$0xff] %v2724_v37  ;;  %v2760_v49 = vadd.f32 %v1232_v22, %v2615_v29 }
  0xfc   : > { %2083 = vmatpush3.bf16.msra.mxu1 %v2080_v46  ;;  %v2650_v46 = vmul.f32 %v2626_v36, %v1837_v17 }
  0xfd   : > { %2085 = vmatprep.subr.bf16.mxu1 %v2084_v11  ;;  %3264 = vst [vmem:[#allocation31_spill] sm:$0xff] %v2760_v49 }
  0xfe   : > { %3248 = vst [vmem:[#allocation15_spill] sm:$0xff] %v2650_v46 }
 0x100   : > { %2087 = vmatpush3.bf16.msra.mxu1 %v2084_v11  ;;  %v2656_v11 = vmul.f32 %v2601_v26, %v1847_v38  ;;  %v2727_v38 = vmul.f32 %v2611_v23, %v1849_v58 }
 0x101   : > { %2089 = vmatprep.subr.bf16.mxu1 %v2088_v54 }
 0x102   : > { %3249 = vst [vmem:[#allocation16_spill] sm:$0xff] %v2656_v11  ;;  %3256 = vst [vmem:[#allocation23_spill] sm:$0xff] %v2727_v38 }
 0x104   : > { %2091 = vmatpush3.bf16.msra.mxu1 %v2088_v54  ;;  %v787_v54 = vadd.s32 56, %v780_v9 }
 0x105   : > { %2093 = vmatprep.subr.bf16.mxu1 %v2092_v56 }
 0x106   : > { %v841_v9 = vand.u32 7, %v787_v54 }
 0x108   : > { %2095 = vmatpush3.bf16.msra.mxu1 %v2092_v56  ;;  %v2666_v56 = vmul.f32 %v2647_v45, %v1845_v24  ;;  %v1842_v24 = vsel %vm889_vm10, 1.0, %v2198_v40  ;;  %vm891_vm13 = vcmp.ge.s32.totalorder %v841_v9, 1  ;;  %vm915_vm15 = vcmp.le.s32.totalorder %v841_v9, 6 }
 0x109   : > { %2097 = vmatprep.subr.bf16.mxu1 %v2096_v61  ;;  %v2739_v54 = vmul.f32 %v2606_v27, %v1842_v24  ;;  %v1844_v9 = vsel %vm891_vm13, 1.0, %v2198_v40  ;;  %v2753_v53 = vmul.f32 %v2626_v36, %v1842_v24 }
 0x10a   : > { %3251 = vst [vmem:[#allocation18_spill] sm:$0xff] %v2666_v56  ;;  %v2769_v42 = vmul.f32 %v2584_v21, %v1844_v9 }
 0x10b   : > { %3259 = vst [vmem:[#allocation26_spill] sm:$0xff] %v2739_v54  ;;  %3262 = vst [vmem:[#allocation29_spill] sm:$0xff] %v2753_v53 }
 0x10c   : > { %2099 = vmatpush3.bf16.msra.mxu1 %v2096_v61  ;;  %v2673_v61 = vmul.f32 %v2626_v36, %v1838_v19  ;;  %v2710_v19 = vmul.f32 %v2626_v36, %v1840_v30  ;;  %v2733_v30 = vmul.f32 %v2584_v21, %v1842_v24  ;;  %3267 = vst [vmem:[#allocation34_spill] sm:$0xff] %v2769_v42 }
 0x10d   : > { %2101 = vmatprep.subr.bf16.mxu1 %v2100_v6 }
 0x10e   : > { %3253 = vst [vmem:[#allocation20_spill] sm:$0xff] %v2710_v19 }
 0x110   : > { %2103 = vmatpush3.bf16.msra.mxu1 %v2100_v6  ;;  %v2682_v6 = vmul.f32 %v2647_v45, %v1846_v25  ;;  %v1850_v25 = vsel %vm913_vm11, 1.0, %v2198_v40 }
 0x111   : > { %2105 = vmatprep.subr.bf16.mxu1 %v2104_v5  ;;  %v2736_v51 = vmul.f32 %v2601_v26, %v1850_v25  ;;  %v2750_v52 = vmul.f32 %v2611_v23, %v1850_v25  ;;  %v2763_v41 = vmul.f32 %v2647_v45, %v1850_v25  ;;  %v2783_v25 = vld [vmem:[%s3190_s5 + $0x4] ss:$0 sm:$0xff] }
 0x113   : > { %3258 = vst [vmem:[#allocation25_spill] sm:$0xff] %v2736_v51  ;;  %3261 = vst [vmem:[#allocation28_spill] sm:$0xff] %v2750_v52 }
 0x114   : > { %2107 = vmatpush3.bf16.msra.mxu1 %v2104_v5  ;;  %v834_v5 = vand.u32 7, %v786_v50  ;;  %v2730_v50 = vmul.f32 %v2626_v36, %v1841_v63  ;;  %3265 = vst [vmem:[#allocation32_spill] sm:$0xff] %v2763_v41 }
 0x116   : > { %vm890_vm12 = vcmp.ge.s32.totalorder %v834_v5, 1  ;;  %vm914_vm14 = vcmp.le.s32.totalorder %v834_v5, 6  ;;  %3257 = vst [vmem:[#allocation24_spill] sm:$0xff] %v2730_v50  ;;  %v2743_v5 = vmul.f32 %v2647_v45, %v1849_v58 }
 0x117   : > { %v1843_v12 = vsel %vm890_vm12, 1.0, %v2198_v40  ;;  %v1851_v63 = vsel %vm914_vm14, 1.0, %v2198_v40 }
 0x118   : > { %3260 = vst [vmem:[#allocation27_spill] sm:$0xff] %v2743_v5  ;;  %v2772_v24 = vmul.f32 %v2601_v26, %v1851_v63  ;;  %v2778_v29 = vmul.f32 %v2647_v45, %v1851_v63  ;;  %v2800_v32 = vmul.f32 %v2611_v23, %v1851_v63  ;;  %v2803_v41 = vmul.f32 %v2626_v36, %v1843_v12 }
 0x11a   : > { %3268 = vst [vmem:[#allocation35_spill] sm:$0xff] %v2772_v24  ;;  %3270 = vst [vmem:[#allocation37_spill] sm:$0xff] %v2778_v29  ;;  %v2806_v24 = vmul.f32 %v2626_v36, %v1844_v9 }
 0x11b   : > { %3274 = vst [vmem:[#allocation41_spill] sm:$0xff] %v2800_v32  ;;  %3275 = vst [vmem:[#allocation42_spill] sm:$0xff] %v2803_v41 }
 0x11c   : > { %3276 = vst [vmem:[#allocation43_spill] sm:$0xff] %v2806_v24 }
 0x194   : > { %v1966_v13 = vpop.f32.mrb[0].mxu0 }
 0x195   : > { %v2704_v17 = vadd.f32 %v1966_v13, %v2679_v0  ;;  %v700_v59 = vpop.f32.mrb[1].mxu0  ;;  %v1852_v13 = vsel %vm915_vm15, 1.0, %v2198_v40  ;;  %v2766_v40 = vmul.f32 %v2584_v21, %v1843_v12  ;;  %v2788_v21 = vld [vmem:[%s3190_s5 + $0x7] ss:$0 sm:$0xff] }
 0x196   : > { %v701_v60 = vadd.f32 %v2679_v0, %v700_v59  ;;  %v2756_v48 = vmul.f32 %v2647_v45, %v1852_v13  ;;  %v2775_v31 = vmul.f32 %v2611_v23, %v1852_v13  ;;  %v2791_v22 = vmul.f32 %v2601_v26, %v1852_v13 }
 0x197   : > { %1018 = vst [vmem:[#allocation2 + $0x18] sm:$0xff] %v2704_v17  ;;  %3266 = vst [vmem:[#allocation33_spill] sm:$0xff] %v2766_v40  ;;  %v2797_v45 = vmul.f32 %v2606_v27, %v1844_v9  ;;  %v2809_v26 = vmul.f32 0.0, %v2788_v21  ;;  %v1063_v63 = vmul.f32 %v2592_v10, %v2704_v17  ;;  %v1124_v9 = vmul.f32 %v2783_v25, %v2704_v17 }
 0x198   : > { %1017 = vst [vmem:[#allocation2 + $0x10] sm:$0xff] %v701_v60  ;;  %3263 = vst [vmem:[#allocation30_spill] sm:$0xff] %v2756_v48  ;;  %v1062_v23 = vmul.f32 %v2592_v10, %v701_v60  ;;  %v1123_v36 = vmul.f32 %v2783_v25, %v701_v60 }
 0x199   : > { %3269 = vst [vmem:[#allocation36_spill] sm:$0xff] %v2775_v31  ;;  %3271 = vst [vmem:[#allocation38_spill] sm:$0xff] %v2791_v22 }
 0x19a   : > { %v1969_v57 = vpop.f32.mrb[2].mxu0  ;;  %3273 = vst [vmem:[#allocation40_spill] sm:$0xff] %v2797_v45  ;;  %3277 = vst [vmem:[#allocation44_spill] sm:$0xff] %v2809_v26 }
 0x19b   : > { %v716_v59 = vadd.f32 %v1969_v57, %v2679_v0  ;;  %v710_v18 = vpop.f32.mrb[3].mxu0  ;;  %v1194_v57 = vld [vmem:[#allocation2 + $0x51] sm:$0xff] }
 0x19c   : > { %v711_v58 = vadd.f32 %v2679_v0, %v710_v18  ;;  %v2794_v18 = vmul.f32 %v2606_v27, %v1843_v12  ;;  %v2812_v13 = vmul.f32 %v1194_v57, %v2756_v48  ;;  %v1178_v57 = vmul.f32 %v2788_v21, %v2704_v17 }
 0x19d   : > { %1020 = vst [vmem:[#allocation2 + $0x28] sm:$0xff] %v716_v59  ;;  %v2833_v60 = vmul.f32 %v2783_v25, %v716_v59  ;;  %v2836_v22 = vmul.f32 %v2788_v21, %v716_v59 }
 0x19e   : > { %1019 = vst [vmem:[#allocation2 + $0x20] sm:$0xff] %v711_v58  ;;  %3272 = vst [vmem:[#allocation39_spill] sm:$0xff] %v2794_v18  ;;  %v1064_v40 = vmul.f32 %v2592_v10, %v711_v58  ;;  %v1125_v49 = vmul.f32 %v2783_v25, %v711_v58  ;;  %v1179_v53 = vmul.f32 %v2788_v21, %v711_v58 }
 0x19f   : > { %v1026_v29 = vld [vmem:[#allocation2 + $0xf] sm:$0xff]  ;;  %v1027_v31 = vld [vmem:[#allocation2 + $0x17] sm:$0xff]  ;;  %3278 = vst [vmem:[#allocation45_spill] sm:$0xff] %v2812_v13 }
 0x1a0   : > { %v1077_v42 = vld [vmem:[#allocation2 + $0x9] sm:$0xff]  ;;  %v1034_v27 = vmul.f32 %v1026_v29, %v2618_v34  ;;  %v1078_v32 = vld [vmem:[#allocation2 + $0x11] sm:$0xff]  ;;  %v1035_v41 = vmul.f32 %v1027_v31, %v2621_v35  ;;  %v1102_v45 = vmul.f32 %v1026_v29, %v2636_v4  ;;  %v2830_v35 = vmul.f32 %v2592_v10, %v716_v59 }
 0x1a1   : > { %v1085_v12 = vmul.f32 %v1077_v42, %v2630_v39  ;;  %v1086_v26 = vmul.f32 %v1078_v32, %v2633_v44 }
 0x1a2   : > { %v1972_v48 = vpop.f32.mrb[4].mxu0  ;;  %v1070_v13 = vadd.f32 %v1062_v23, %v1034_v27  ;;  %v1103_v23 = vmul.f32 %v1027_v31, %v2639_v43  ;;  %v1071_v59 = vadd.f32 %v1063_v63, %v1035_v41 }
 0x1a3   : > { %v1093_v24 = vadd.f32 %v1085_v12, %v2653_v47  ;;  %v726_v42 = vadd.f32 %v1972_v48, %v2679_v0  ;;  %v720_v18 = vpop.f32.mrb[5].mxu0  ;;  %v1140_v48 = vmul.f32 %v1078_v32, %v2642_v3 }
 0x1a4   : > { %v721_v17 = vadd.f32 %v2679_v0, %v720_v18  ;;  %v1094_v27 = vadd.f32 %v1086_v26, %v1070_v13 }
 0x1a5   : > { %v1110_v47 = vadd.f32 %v1102_v45, %v1093_v24  ;;  %1022 = vst [vmem:[#allocation2 + $0x38] sm:$0xff] %v726_v42  ;;  %v1028_v29 = vld [vmem:[#allocation2 + $0x1f] sm:$0xff]  ;;  %v1157_v45 = vmul.f32 %v1027_v31, %v2650_v46  ;;  %v2848_v43 = vmul.f32 %v2592_v10, %v726_v42  ;;  %v2851_v32 = vmul.f32 %v2783_v25, %v726_v42 }
 0x1a6   : > { %v1079_v12 = vld [vmem:[#allocation2 + $0x19] sm:$0xff]  ;;  %1021 = vst [vmem:[#allocation2 + $0x30] sm:$0xff] %v721_v17  ;;  %v1111_v18 = vadd.f32 %v1103_v23, %v1094_v27  ;;  %v1080_v13 = vld [vmem:[#allocation2 + $0x21] sm:$0xff]  ;;  %v1104_v24 = vmul.f32 %v1028_v29, %v2660_v1  ;;  %v1036_v27 = vmul.f32 %v1028_v29, %v2688_v2  ;;  %v2858_v23 = vmul.f32 %v2788_v21, %v726_v42 }
 0x1a7   : > { %v1087_v4 = vmul.f32 %v1079_v12, %v2656_v11  ;;  %v1131_v26 = vadd.f32 %v1123_v36, %v1110_v47  ;;  %v1141_v58 = vmul.f32 %v1079_v12, %v2663_v55  ;;  %v1195_v63 = vmul.f32 %v1079_v12, %v2666_v56 }
 0x1a8   : > { %v1132_v52 = vadd.f32 %v1124_v9, %v1111_v18  ;;  %v1142_v36 = vmul.f32 %v1080_v13, %v2670_v33  ;;  %v1158_v11 = vmul.f32 %v1028_v29, %v2673_v61  ;;  %v1072_v12 = vadd.f32 %v1064_v40, %v1036_v27 }
 0x1a9   : > { %v1095_v3 = vadd.f32 %v1087_v4, %v1071_v59  ;;  %v1148_v41 = vadd.f32 %v1140_v48, %v1131_v26  ;;  %v1029_v4 = vld [vmem:[#allocation2 + $0x27] sm:$0xff]  ;;  %v1196_v48 = vmul.f32 %v1080_v13, %v2682_v6  ;;  %v1088_v18 = vmul.f32 %v1080_v13, %v2691_v7 }
 0x1aa   : > { %v1975_v31 = vpop.f32.mrb[6].mxu0  ;;  %v1149_v1 = vadd.f32 %v1141_v58, %v1132_v52  ;;  %v2870_v52 = vld [vmem:[%s3191_s6] ss:$0 sm:$0xff]  ;;  %v1159_v29 = vmul.f32 %v1029_v4, %v2685_v62  ;;  %v1105_v40 = vmul.f32 %v1029_v4, %v2697_v15  ;;  %v1037_v13 = vmul.f32 %v1029_v4, %v2701_v16 }
 0x1ab   : > { %v1112_v47 = vadd.f32 %v1104_v24, %v1095_v3  ;;  %v1165_v46 = vadd.f32 %v1157_v45, %v1148_v41  ;;  %v736_v9 = vadd.f32 %v1975_v31, %v2679_v0  ;;  %v730_v59 = vpop.f32.mrb[7].mxu0  ;;  %v1096_v24 = vadd.f32 %v1088_v18, %v1072_v12 }
 0x1ac   : > { %v2865_v26 = vadd.f32 %v2679_v0, %v730_v59  ;;  %v1166_v33 = vadd.f32 %v1158_v11, %v1149_v1  ;;  %v1127_v58 = vmul.f32 %v2783_v25, %v721_v17  ;;  %v1181_v27 = vmul.f32 %v2788_v21, %v721_v17 }
 0x1ad   : > { %v1186_v42 = vadd.f32 %v1178_v57, %v1165_v46  ;;  %v1133_v56 = vadd.f32 %v1125_v49, %v1112_v47  ;;  %1024 = vst [vmem:[#allocation2 + $0x48] sm:$0xff] %v736_v9  ;;  %v1081_v3 = vld [vmem:[#allocation2 + $0x29] sm:$0xff]  ;;  %v1066_v49 = vmul.f32 %v2592_v10, %v721_v17  ;;  %v1113_v57 = vadd.f32 %v1105_v40, %v1096_v24  ;;  %v1082_v24 = vld [vmem:[#allocation2 + $0x31] sm:$0xff] }
 0x1ae   : > { %1023 = vst [vmem:[#allocation2 + $0x40] sm:$0xff] %v2865_v26  ;;  %v1187_v46 = vadd.f32 %v1179_v53, %v1166_v33  ;;  %v1030_v1 = vld [vmem:[#allocation2 + $0x2f] sm:$0xff]  ;;  %v1143_v41 = vmul.f32 %v1081_v3, %v2707_v8  ;;  %v2882_v4 = vmul.f32 %v2783_v25, %v736_v9  ;;  %v1197_v53 = vmul.f32 %v1081_v3, %v2694_v14 }
 0x1af   : > { %v1203_v45 = vadd.f32 %v1195_v63, %v1186_v42  ;;  %v1150_v11 = vadd.f32 %v1142_v36, %v1133_v56  ;;  %v1134_v56 = vadd.f32 %v2833_v60, %v1113_v57  ;;  %v1073_v33 = vadd.f32 %v2830_v35, %v1037_v13  ;;  %v2902_v57 = vld [vmem:[#allocation2 + $0x37] sm:$0xff] }
 0x1b0   : > { %v1204_v47 = vadd.f32 %v1196_v48, %v1187_v46  ;;  %v1089_v63 = vmul.f32 %v1081_v3, %v2720_v28  ;;  %v1160_v48 = vmul.f32 %v1030_v1, %v2710_v19  ;;  %v1106_v60 = vmul.f32 %v1030_v1, %v2724_v37 }
 0x1b1   : > { %v1405_v31 = vadd.f32 %v2870_v52, %v1203_v45  ;;  %v1167_v59 = vadd.f32 %v1159_v29, %v1150_v11  ;;  %v1151_v40 = vadd.f32 %v1143_v41, %v1134_v56  ;;  %v2899_v46 = vmul.f32 %v2788_v21, %v736_v9 }
 0x1b2   : > { %v1978_v36 = vpop.f32.mrb[8].mxu0  ;;  %v1406_v18 = vadd.f32 %v2870_v52, %v1204_v47  ;;  %v1097_v45 = vadd.f32 %v1089_v63, %v1073_v33  ;;  %v1038_v41 = vmul.f32 %v1030_v1, %v2733_v30  ;;  %v1198_v33 = vmul.f32 %v1082_v24, %v2713_v20 }
 0x1b3   : > { %v1437_v12 = vmul.f32 0.044715, %v1405_v31  ;;  %v1188_v17 = vadd.f32 %v2836_v22, %v1167_v59  ;;  %v2892_v42 = vadd.f32 %v1978_v36, %v2679_v0  ;;  %v740_v29 = vpop.f32.mrb[9].mxu0  ;;  %v1168_v11 = vadd.f32 %v1160_v48, %v1151_v40 }
 0x1b4   : > { %v2896_v35 = vadd.f32 %v2679_v0, %v740_v29  ;;  %v1438_v13 = vmul.f32 0.044715, %v1406_v18  ;;  %v1114_v47 = vadd.f32 %v1106_v60, %v1097_v45  ;;  %v1144_v63 = vmul.f32 %v1082_v24, %v2727_v38 }
 0x1b5   : > { %v1453_v3 = vmul.f32 %v1437_v12, %v1405_v31  ;;  %1217 = vst [vmem:[#allocation2 + $0x78] sm:$0xff] %v2892_v42  ;;  %v1205_v22 = vadd.f32 %v1197_v53, %v1188_v17  ;;  %v2908_v36 = vmul.f32 0.5, %v1405_v31  ;;  %v1189_v12 = vadd.f32 %v1181_v27, %v1168_v11  ;;  %v1083_v27 = vld [vmem:[#allocation2 + $0x39] sm:$0xff] }
 0x1b6   : > { %1216 = vst [vmem:[#allocation2 + $0x70] sm:$0xff] %v2896_v35  ;;  %v1454_v56 = vmul.f32 %v1438_v13, %v1406_v18  ;;  %v1135_v53 = vadd.f32 %v1127_v58, %v1114_v47  ;;  %v1161_v29 = vmul.f32 %v2902_v57, %v2730_v50  ;;  %v1074_v1 = vadd.f32 %v1066_v49, %v1038_v41  ;;  %v3279_v50 = vld [vmem:[#allocation28_spill] sm:$0xff] }
 0x1b7   : > { %v1469_v59 = vmul.f32 %v1453_v3, %v1405_v31  ;;  %v1407_v9 = vadd.f32 %v2870_v52, %v1205_v22  ;;  %v2913_v45 = vmul.f32 0.5, %v1406_v18  ;;  %v1206_v3 = vadd.f32 %v1198_v33, %v1189_v12 }
 0x1b8   : > { %v1470_v48 = vmul.f32 %v1454_v56, %v1406_v18  ;;  %v1152_v13 = vadd.f32 %v1144_v63, %v1135_v53  ;;  %v1090_v58 = vmul.f32 %v1082_v24, %v2736_v51  ;;  %v1257_v41 = vmul.f32 %v2592_v10, %v2896_v35 }
 0x1b9   : > { %v1485_v17 = vadd.f32 %v1469_v59, %v1405_v31  ;;  %v1981_v40 = vpop.f32.mrb[10].mxu0  ;;  %v1439_v60 = vmul.f32 0.044715, %v1407_v9  ;;  %v1408_v49 = vadd.f32 %v2870_v52, %v1206_v3  ;;  %v1199_v12 = vmul.f32 %v1083_v27, %v2743_v5  ;;  %v1032_v5 = vld [vmem:[#allocation2 + $0x3f] sm:$0xff] }
 0x1ba   : > { %v2916_v20 = vadd.f32 %v1981_v40, %v2679_v0  ;;  %v750_v19 = vpop.f32.mrb[11].mxu0  ;;  %v1486_v22 = vadd.f32 %v1470_v48, %v1406_v18  ;;  %v1169_v47 = vadd.f32 %v1161_v29, %v1152_v13  ;;  %v1098_v56 = vadd.f32 %v1090_v58, %v1074_v1 }
 0x1bb   : > { %v1501_v38 = vmul.f32 0.7978846, %v1485_v17  ;;  %v2920_v31 = vadd.f32 %v2679_v0, %v750_v19  ;;  %v1455_v11 = vmul.f32 %v1439_v60, %v1407_v9  ;;  %v1440_v63 = vmul.f32 0.044715, %v1408_v49 }
 0x1bc   : > { %1219 = vst [vmem:[#allocation2 + $0x88] sm:$0xff] %v2916_v20  ;;  %v1502_v59 = vmul.f32 0.7978846, %v1486_v22  ;;  %v1190_v19 = vadd.f32 %v2858_v23, %v1169_v47  ;;  %v2930_v48 = vmul.f32 0.5, %v1407_v9  ;;  %v1107_v29 = vmul.f32 %v2902_v57, %v2739_v54 }
 0x1bd   : > { %2149 = vtanh.f32 %v1501_v38  ;;  %1218 = vst [vmem:[#allocation2 + $0x80] sm:$0xff] %v2920_v31  ;;  %v1225_v18 = vld [vmem:[#allocation2 + $0x6f] sm:$0xff]  ;;  %v1471_v24 = vmul.f32 %v1455_v11, %v1407_v9  ;;  %v2934_v38 = vmul.f32 %v2592_v10, %v2865_v26  ;;  %v1456_v40 = vmul.f32 %v1440_v63, %v1408_v49 }
 0x1be   : > { %v1272_v33 = vld [vmem:[#allocation2 + $0x69] sm:$0xff]  ;;  %v1233_v53 = vmul.f32 %v1225_v18, %v2618_v34  ;;  %v1273_v17 = vld [vmem:[#allocation2 + $0x71] sm:$0xff]  ;;  %2151 = vtanh.f32 %v1502_v59  ;;  %v2940_v23 = vmul.f32 %v2783_v25, %v2865_v26  ;;  %v2943_v34 = vmul.f32 0.5, %v1408_v49 }
 0x1bf   : > { %v1487_v1 = vadd.f32 %v1471_v24, %v1407_v9  ;;  %v1280_v60 = vmul.f32 %v1272_v33, %v2630_v39  ;;  %v1207_v3 = vadd.f32 %v1199_v12, %v1190_v19  ;;  %v1115_v13 = vadd.f32 %v1107_v29, %v1098_v56  ;;  %v3280_v56 = vld [vmem:[#allocation12_spill] sm:$0xff]  ;;  %v3281_v12 = vld [vmem:[#allocation14_spill] sm:$0xff] }
 0x1c0   : > { %v1281_v58 = vmul.f32 %v1273_v17, %v2633_v44  ;;  %v1472_v47 = vmul.f32 %v1456_v40, %v1408_v49  ;;  %v1145_v59 = vmul.f32 %v1083_v27, %v3279_v50  ;;  %v1265_v63 = vadd.f32 %v1257_v41, %v1233_v53  ;;  %v3283_v53 = vld [vmem:[#allocation31_spill] sm:$0xff]  ;;  %v3287_v50 = vld [vmem:[#allocation38_spill] sm:$0xff] }
 0x1c1   : > { %v1984_v22 = vpop.f32.mrb[12].mxu0  ;;  %v1503_v11 = vmul.f32 0.7978846, %v1487_v1  ;;  %v1409_v54 = vadd.f32 %v2870_v52, %v1207_v3  ;;  %v1136_v39 = vadd.f32 %v2851_v32, %v1115_v13  ;;  %v2954_v19 = vmul.f32 %v1225_v18, %v3280_v56  ;;  %v1084_v13 = vld [vmem:[#allocation2 + $0x41] sm:$0xff] }
 0x1c2   : > { %v766_v9 = vadd.f32 %v1984_v22, %v2679_v0  ;;  %v760_v24 = vpop.f32.mrb[13].mxu0  ;;  %v1488_v44 = vadd.f32 %v1472_v47, %v1408_v49  ;;  %v2957_v29 = vmul.f32 %v1273_v17, %v3281_v12  ;;  %v3282_v22 = vld [vmem:[#allocation29_spill] sm:$0xff]  ;;  %v1288_v32 = vadd.f32 %v1280_v60, %v3283_v53  ;;  %v3285_v56 = vld [vmem:[#allocation35_spill] sm:$0xff] }
 0x1c3   : > { %v2951_v33 = vadd.f32 %v2679_v0, %v760_v24  ;;  %2153 = vtanh.f32 %v1503_v11  ;;  %v1441_v1 = vmul.f32 0.044715, %v1409_v54  ;;  %v1153_v40 = vadd.f32 %v1145_v59, %v1136_v39  ;;  %v3284_v24 = vld [vmem:[#allocation33_spill] sm:$0xff] }
 0x1c4   : > { %1221 = vst [vmem:[#allocation2 + $0x98] sm:$0xff] %v766_v9  ;;  %v1162_v41 = vmul.f32 %v1032_v5, %v3282_v22  ;;  %v1504_v3 = vmul.f32 0.7978846, %v1488_v44  ;;  %v1039_v18 = vmul.f32 %v2902_v57, %v3284_v24  ;;  %v1091_v11 = vmul.f32 %v1083_v27, %v3285_v56  ;;  %v3286_v22 = vld [vmem:[#allocation32_spill] sm:$0xff] }
 0x1c5   : > { %1220 = vst [vmem:[#allocation2 + $0x90] sm:$0xff] %v2951_v33  ;;  %v2965_v47 = vadd.f32 %v1281_v58, %v1265_v63  ;;  %v1457_v17 = vmul.f32 %v1441_v1, %v1409_v54  ;;  %v1183_v59 = vmul.f32 %v2788_v21, %v2865_v26  ;;  %v2969_v12 = vmul.f32 0.5, %v1409_v54  ;;  %v1101_v56 = vld [vmem:[#allocation2 + $0x47] sm:$0xff] }
 0x1c6   : > { %v1170_v9 = vadd.f32 %v1162_v41, %v1153_v40  ;;  %2155 = vtanh.f32 %v1504_v3  ;;  %v1075_v60 = vadd.f32 %v2848_v43, %v1039_v18  ;;  %v1200_v57 = vmul.f32 %v1084_v13, %v3286_v22  ;;  %v3288_v41 = vld [vmem:[#allocation39_spill] sm:$0xff]  ;;  %v3290_v22 = vld [vmem:[#allocation40_spill] sm:$0xff] }
 0x1c7   : > { %v2150_v49 = vpop.eup %2149  ;;  %v1473_v44 = vmul.f32 %v1457_v17, %v1409_v54  ;;  %v1092_v27 = vmul.f32 %v1084_v13, %v3287_v50  ;;  %v1108_v26 = vmul.f32 %v1032_v5, %v3288_v41  ;;  %v1109_v50 = vmul.f32 %v1101_v56, %v3290_v22  ;;  %v3296_v22 = vld [vmem:[#allocation11_spill] sm:$0xff] }
 0x1c8   : > { %v1533_v39 = vadd.f32 1.0, %v2150_v49  ;;  %v1191_v53 = vadd.f32 %v1183_v59, %v1170_v9  ;;  %v2152_v58 = vpop.eup %2151  ;;  %v1099_v40 = vadd.f32 %v1091_v11, %v1075_v60  ;;  %v3289_v49 = vld [vmem:[#allocation34_spill] sm:$0xff]  ;;  %v1139_v9 = vld [vmem:[#allocation2 + $0x49] sm:$0xff] }
 0x1c9   : > { %v1987_v63 = vpop.f32.mrb[14].mxu0  ;;  %v1040_v3 = vmul.f32 %v1032_v5, %v3289_v49  ;;  %v1534_v43 = vadd.f32 1.0, %v2152_v58  ;;  %v1489_v18 = vadd.f32 %v1473_v44, %v1409_v54  ;;  %v3291_v60 = vld [vmem:[#allocation41_spill] sm:$0xff] }
 0x1ca   : > { %v1549_v1 = vmul.f32 %v1533_v39, %v2908_v36  ;;  %v776_v24 = vadd.f32 %v1987_v63, %v2679_v0  ;;  %v770_v37 = vpop.f32.mrb[15].mxu0  ;;  %v1208_v17 = vadd.f32 %v1200_v57, %v1191_v53  ;;  %v1116_v51 = vadd.f32 %v1108_v26, %v1099_v40  ;;  %v1156_v58 = vld [vmem:[#allocation2 + $0x4f] sm:$0xff]  ;;  %v1226_v54 = vld [vmem:[#allocation2 + $0x77] sm:$0xff] }
 0x1cb   : > { %v771_v59 = vadd.f32 %v2679_v0, %v770_v37  ;;  %v1076_v36 = vadd.f32 %v2934_v38, %v1040_v3  ;;  %v1550_v11 = vmul.f32 %v1534_v43, %v2913_v45  ;;  %v1505_v39 = vmul.f32 0.7978846, %v1489_v18  ;;  %v3292_v37 = vld [vmem:[#allocation36_spill] sm:$0xff]  ;;  %v3293_v57 = vld [vmem:[#allocation42_spill] sm:$0xff]  ;;  %v3295_v18 = vld [vmem:[#allocation43_spill] sm:$0xff] }
 0x1cc   : > { %2020 = vmatprep.mubr.f32.mxu1 %v1549_v1  ;;  %1223 = vst [vmem:[#allocation2 + $0xa8] sm:$0xff] %v776_v24  ;;  %v1410_v5 = vadd.f32 %v2870_v52, %v1208_v17  ;;  %v1146_v63 = vmul.f32 %v1084_v13, %v3291_v60  ;;  %v1137_v0 = vadd.f32 %v2940_v23, %v1116_v51  ;;  %v3294_v24 = vld [vmem:[#allocation37_spill] sm:$0xff]  ;;  %v1274_v3 = vld [vmem:[#allocation2 + $0x79] sm:$0xff] }
 0x1cd   : > { %v2154_v44 = vpop.eup %2153  ;;  %1222 = vst [vmem:[#allocation2 + $0xa0] sm:$0xff] %v771_v59  ;;  %v1147_v53 = vmul.f32 %v1139_v9, %v3292_v37  ;;  %v1163_v1 = vmul.f32 %v1101_v56, %v3293_v57  ;;  %v1100_v40 = vadd.f32 %v1092_v27, %v1076_v36  ;;  %2021 = vmatmul.mubr.f32.vlgmr.msra.gmra.mrb[0].mxu1 %v1550_v11  ;;  %2157 = vtanh.f32 %v1505_v39 }
 0x1ce   : > { %v1535_v38 = vadd.f32 1.0, %v2154_v44  ;;  %v1442_v45 = vmul.f32 0.044715, %v1410_v5  ;;  %v1201_v26 = vmul.f32 %v1139_v9, %v3294_v24  ;;  %v1154_v43 = vadd.f32 %v1146_v63, %v1137_v0 }
 0x1cf   : > { %v1117_v13 = vadd.f32 %v1109_v50, %v1100_v40  ;;  %v1164_v17 = vmul.f32 %v1156_v58, %v3295_v18  ;;  %v1234_v59 = vmul.f32 %v1226_v54, %v3296_v22  ;;  %v1305_v37 = vadd.f32 %v2954_v19, %v1288_v32  ;;  %v3297_v50 = vld [vmem:[#allocation16_spill] sm:$0xff] }
 0x1d0   : > { %v1551_v51 = vmul.f32 %v1535_v38, %v2930_v48  ;;  %v1458_v23 = vmul.f32 %v1442_v45, %v1410_v5  ;;  %v1314_v56 = vmul.f32 %v2783_v25, %v2896_v35  ;;  %v2156_v27 = vpop.eup %2155  ;;  %v1171_v36 = vadd.f32 %v1163_v1, %v1154_v43  ;;  %v3298_v35 = vld [vmem:[#allocation13_spill] sm:$0xff]  ;;  %v1227_v1 = vld [vmem:[#allocation2 + $0x7f] sm:$0xff] }
 0x1d1   : > { %v1138_v11 = vadd.f32 %v2882_v4, %v1117_v13  ;;  %v1258_v9 = vmul.f32 %v2592_v10, %v2892_v42  ;;  %v1282_v39 = vmul.f32 %v1274_v3, %v3297_v50  ;;  %v1536_v63 = vadd.f32 1.0, %v2156_v27  ;;  %v3299_v45 = vld [vmem:[#allocation15_spill] sm:$0xff] }
 0x1d2   : > { %2023 = vmatprep.mubr.f32.mxu1 %v1551_v51  ;;  %v2998_v22 = vmul.f32 0.5, %v1410_v5  ;;  %v1474_v48 = vmul.f32 %v1458_v23, %v1410_v5  ;;  %v1322_v58 = vadd.f32 %v1314_v56, %v1305_v37  ;;  %v1192_v19 = vadd.f32 %v2899_v46, %v1171_v36 }
 0x1d3   : > { %v1155_v32 = vadd.f32 %v1147_v53, %v1138_v11  ;;  %v1266_v44 = vadd.f32 %v1258_v9, %v1234_v59  ;;  %v1298_v0 = vmul.f32 %v1226_v54, %v3298_v35  ;;  %v1552_v4 = vmul.f32 %v1536_v63, %v2943_v34  ;;  %v1275_v34 = vld [vmem:[#allocation2 + $0x81] sm:$0xff]  ;;  %v3301_v11 = vld [vmem:[#allocation18_spill] sm:$0xff] }
 0x1d4   : > { %v1490_v40 = vadd.f32 %v1474_v48, %v1410_v5  ;;  %v1339_v38 = vadd.f32 %v2957_v29, %v1322_v58  ;;  %v1348_v43 = vmul.f32 %v1226_v54, %v3299_v45  ;;  %v1209_v13 = vadd.f32 %v1201_v26, %v1192_v19  ;;  %v3300_v29 = vld [vmem:[#allocation44_spill] sm:$0xff] }
 0x1d5   : > { %v1172_v51 = vadd.f32 %v1164_v17, %v1155_v32  ;;  %v1290_v27 = vadd.f32 %v1282_v39, %v1266_v44  ;;  %v1315_v37 = vmul.f32 %v2783_v25, %v2892_v42  ;;  %2024 = vmatmul.mubr.f32.gmra.mrb[2].mxu1 %v1552_v4  ;;  %v1365_v59 = vmul.f32 %v2788_v21, %v2892_v42  ;;  %v3303_v32 = vld [vmem:[#allocation17_spill] sm:$0xff] }
 0x1d6   : > { %v1506_v46 = vmul.f32 0.7978846, %v1490_v40  ;;  %v1356_v53 = vadd.f32 %v1348_v43, %v1339_v38  ;;  %v1235_v23 = vmul.f32 %v1227_v1, %v2688_v2  ;;  %v1411_v5 = vadd.f32 %v2870_v52, %v1209_v13  ;;  %v3302_v2 = vld [vmem:[#allocation45_spill] sm:$0xff]  ;;  %v3304_v38 = vld [vmem:[#allocation19_spill] sm:$0xff] }
 0x1d7   : > { %v1193_v56 = vadd.f32 %v3300_v29, %v1172_v51  ;;  %v1332_v54 = vmul.f32 %v1274_v3, %v2663_v55  ;;  %v1306_v26 = vadd.f32 %v1298_v0, %v2965_v47  ;;  %v2158_v17 = vpop.eup %2157  ;;  %v1382_v9 = vmul.f32 %v1274_v3, %v3301_v11  ;;  %v1228_v47 = vld [vmem:[#allocation2 + $0x87] sm:$0xff] }
 0x1d8   : > { %2159 = vtanh.f32 %v1506_v46  ;;  %v1373_v36 = vadd.f32 %v1365_v59, %v1356_v53  ;;  %v1259_v50 = vmul.f32 %v2592_v10, %v2920_v31  ;;  %v1537_v42 = vadd.f32 1.0, %v2158_v17  ;;  %v1276_v46 = vld [vmem:[#allocation2 + $0x89] sm:$0xff] }
 0x1d9   : > { %v1443_v39 = vmul.f32 0.044715, %v1411_v5  ;;  %v1210_v63 = vadd.f32 %v3302_v2, %v1193_v56  ;;  %v1283_v48 = vmul.f32 %v1275_v34, %v2691_v7  ;;  %v1299_v55 = vmul.f32 %v1227_v1, %v3303_v32 }
 0x1da   : > { %v1390_v58 = vadd.f32 %v1382_v9, %v1373_v36  ;;  %v1267_v19 = vadd.f32 %v1259_v50, %v1235_v23  ;;  %v1323_v44 = vadd.f32 %v1315_v37, %v1306_v26  ;;  %v1553_v35 = vmul.f32 %v1537_v42, %v2969_v12 }
 0x1db   : > { %v1459_v0 = vmul.f32 %v1443_v39, %v1411_v5  ;;  %v1412_v3 = vadd.f32 %v2870_v52, %v1210_v63  ;;  %v1316_v4 = vmul.f32 %v2783_v25, %v2920_v31  ;;  %v1333_v45 = vmul.f32 %v1275_v34, %v3304_v38 }
 0x1dc   : > { %v1413_v40 = vadd.f32 %v2870_v52, %v1390_v58  ;;  %v1340_v43 = vadd.f32 %v1332_v54, %v1323_v44  ;;  %v1349_v7 = vmul.f32 %v1227_v1, %v2673_v61  ;;  %2026 = vmatprep.mubr.f32.mxu1 %v1553_v35  ;;  %v3027_v13 = vmul.f32 0.5, %v1411_v5 }
 0x1dd   : > { %v1475_v51 = vmul.f32 %v1459_v0, %v1411_v5  ;;  %v1444_v37 = vmul.f32 0.044715, %v1412_v3  ;;  %v1236_v12 = vmul.f32 %v1228_v47, %v2701_v16  ;;  %v1291_v59 = vadd.f32 %v1283_v48, %v1267_v19 }
 0x1de   : > { %v1445_v53 = vmul.f32 0.044715, %v1413_v40  ;;  %v1357_v23 = vadd.f32 %v1349_v7, %v1340_v43  ;;  %v1366_v56 = vmul.f32 %v2788_v21, %v2920_v31  ;;  %v1383_v54 = vmul.f32 %v1275_v34, %v2682_v6  ;;  %v1229_v34 = vld [vmem:[#allocation2 + $0x8f] sm:$0xff] }
 0x1df   : > { %v1491_v26 = vadd.f32 %v1475_v51, %v1411_v5  ;;  %v1460_v17 = vmul.f32 %v1444_v37, %v1412_v3  ;;  %v1260_v61 = vmul.f32 %v2592_v10, %v2916_v20  ;;  %v1284_v11 = vmul.f32 %v1276_v46, %v2720_v28 }
 0x1e0   : > { %v1461_v1 = vmul.f32 %v1445_v53, %v1413_v40  ;;  %v1374_v36 = vadd.f32 %v1366_v56, %v1357_v23  ;;  %v1307_v9 = vadd.f32 %v1299_v55, %v1290_v27  ;;  %v1300_v39 = vmul.f32 %v1228_v47, %v2697_v15  ;;  %v1277_v55 = vld [vmem:[#allocation2 + $0x91] sm:$0xff] }
 0x1e1   : > { %v1507_v16 = vmul.f32 0.7978846, %v1491_v26  ;;  %v1476_v50 = vmul.f32 %v1460_v17, %v1412_v3  ;;  %v1268_v42 = vadd.f32 %v1260_v61, %v1236_v12  ;;  %v1317_v5 = vmul.f32 %v2783_v25, %v2916_v20  ;;  %v1230_v12 = vld [vmem:[#allocation2 + $0x97] sm:$0xff] }
 0x1e2   : > { %v2160_v2 = vpop.eup %2159  ;;  %v1477_v63 = vmul.f32 %v1461_v1, %v1413_v40  ;;  %v1391_v31 = vadd.f32 %v1383_v54, %v1374_v36  ;;  %v1324_v6 = vadd.f32 %v1316_v4, %v1307_v9  ;;  %v1334_v19 = vmul.f32 %v1276_v46, %v2707_v8  ;;  %v1254_v53 = vld [vmem:[#allocation2 + $0x98] sm:$0xff]  ;;  %v3307_v9 = vld [vmem:[#allocation23_spill] sm:$0xff] }
 0x1e3   : > { %v1538_v48 = vadd.f32 1.0, %v2160_v2  ;;  %2161 = vtanh.f32 %v1507_v16  ;;  %v1492_v58 = vadd.f32 %v1476_v50, %v1412_v3  ;;  %v1350_v15 = vmul.f32 %v1228_v47, %v2685_v62  ;;  %v3306_v17 = vld [vmem:[#allocation22_spill] sm:$0xff]  ;;  %v3308_v50 = vld [vmem:[#allocation33_spill] sm:$0xff] }
 0x1e4   : > { %v1493_v28 = vadd.f32 %v1477_v63, %v1413_v40  ;;  %v3041_v27 = vadd.f32 %v2870_v52, %v1391_v31  ;;  %v1341_v32 = vadd.f32 %v1333_v45, %v1324_v6  ;;  %v1237_v0 = vmul.f32 %v1229_v34, %v2733_v30  ;;  %v3305_v45 = vld [vmem:[#allocation25_spill] sm:$0xff] }
 0x1e5   : > { %v1554_v44 = vmul.f32 %v1538_v48, %v2998_v22  ;;  %v1508_v35 = vmul.f32 0.7978846, %v1492_v58  ;;  %v1261_v4 = vmul.f32 %v2592_v10, %v2951_v33  ;;  %v1367_v7 = vmul.f32 %v2788_v21, %v2916_v20  ;;  %v3311_v48 = vld [vmem:[#allocation35_spill] sm:$0xff] }
 0x1e6   : > { %v1509_v38 = vmul.f32 0.7978846, %v1493_v28  ;;  %v1446_v43 = vmul.f32 0.044715, %v3041_v27  ;;  %v1358_v8 = vadd.f32 %v1350_v15, %v1341_v32  ;;  %v1384_v62 = vmul.f32 %v1276_v46, %v2694_v14  ;;  %v1278_v46 = vld [vmem:[#allocation2 + $0x99] sm:$0xff] }
 0x1e7   : > { %2027 = vmatmul.mubr.f32.gmra.mrb[4].mxu1 %v1554_v44  ;;  %2163 = vtanh.f32 %v1508_v35  ;;  %v1269_v47 = vadd.f32 %v1261_v4, %v1237_v0  ;;  %v1285_v22 = vmul.f32 %v1277_v55, %v3305_v45  ;;  %v1308_v37 = vadd.f32 %v1300_v39, %v1291_v59  ;;  %v3312_v44 = vld [vmem:[#allocation26_spill] sm:$0xff] }
 0x1e8   : > { %2165 = vtanh.f32 %v1509_v38  ;;  %v1462_v30 = vmul.f32 %v1446_v43, %v3041_v27  ;;  %v1375_v51 = vadd.f32 %v1367_v7, %v1358_v8  ;;  %v1428_v23 = vmul.f32 0.5, %v1412_v3  ;;  %v1231_v0 = vld [vmem:[#allocation2 + $0x9f] sm:$0xff]  ;;  %v3313_v8 = vld [vmem:[#allocation28_spill] sm:$0xff] }
 0x1e9   : > { %v1429_v56 = vmul.f32 0.5, %v1413_v40  ;;  %v1292_v26 = vadd.f32 %v1284_v11, %v1268_v42  ;;  %v1301_v54 = vmul.f32 %v1229_v34, %v3306_v17  ;;  %v1293_v1 = vadd.f32 %v1285_v22, %v1269_v47  ;;  %v3309_v42 = vld [vmem:[#allocation20_spill] sm:$0xff]  ;;  %v1255_v43 = vld [vmem:[#allocation2 + $0xa0] sm:$0xff] }
 0x1ea   : > { %v1478_v20 = vmul.f32 %v1462_v30, %v3041_v27  ;;  %v1392_v61 = vadd.f32 %v1384_v62, %v1375_v51  ;;  %v1325_v14 = vadd.f32 %v1317_v5, %v1308_v37  ;;  %v1318_v36 = vmul.f32 %v2783_v25, %v2951_v33  ;;  %v3310_v5 = vld [vmem:[#allocation21_spill] sm:$0xff]  ;;  %v3314_v22 = vld [vmem:[#allocation24_spill] sm:$0xff] }
 0x1eb   : > { %v1335_v16 = vmul.f32 %v1277_v55, %v3307_v9  ;;  %v1238_v59 = vmul.f32 %v1230_v12, %v3308_v50  ;;  %v1262_v39 = vmul.f32 %v2592_v10, %v1254_v53  ;;  %v1351_v2 = vmul.f32 %v1229_v34, %v3309_v42 }
 0x1ec   : > { %v1494_v3 = vadd.f32 %v1478_v20, %v3041_v27  ;;  %v3063_v40 = vadd.f32 %v2870_v52, %v1392_v61  ;;  %v1342_v11 = vadd.f32 %v1334_v19, %v1325_v14  ;;  %v1368_v31 = vmul.f32 %v2788_v21, %v2951_v33 }
 0x1ed   : > { %v2162_v63 = vpop.eup %2161  ;;  %v1385_v6 = vmul.f32 %v1277_v55, %v3310_v5  ;;  %v1286_v58 = vmul.f32 %v1278_v46, %v3311_v48  ;;  %v1309_v28 = vadd.f32 %v1301_v54, %v1292_v26  ;;  %v1302_v35 = vmul.f32 %v1230_v12, %v3312_v44 }
 0x1ee   : > { %v1539_v32 = vadd.f32 1.0, %v2162_v63  ;;  %v1510_v15 = vmul.f32 0.7978846, %v1494_v3  ;;  %v1447_v10 = vmul.f32 0.044715, %v3063_v40  ;;  %v1359_v4 = vadd.f32 %v1351_v2, %v1342_v11 }
 0x1ef   : > { %v1270_v19 = vadd.f32 %v1262_v39, %v1238_v59  ;;  %v1319_v34 = vmul.f32 %v2783_v25, %v1254_v53  ;;  %v1326_v38 = vadd.f32 %v1318_v36, %v1309_v28  ;;  %v1336_v7 = vmul.f32 %v1278_v46, %v3313_v8  ;;  %v1279_v59 = vld [vmem:[#allocation2 + $0xa1] sm:$0xff] }
 0x1f0   : > { %v1555_v33 = vmul.f32 %v1539_v32, %v3027_v13  ;;  %2167 = vtanh.f32 %v1510_v15  ;;  %v1463_v55 = vmul.f32 %v1447_v10, %v3063_v40  ;;  %v1376_v47 = vadd.f32 %v1368_v31, %v1359_v4  ;;  %v2181_v13 = vld [vmem:[%s3190_s5 + $0x1] ss:$0 sm:$0xff]  ;;  %v1296_v28 = vld [vmem:[#allocation2 + $0xa7] sm:$0xff] }
 0x1f1   : > { %v2164_v62 = vpop.eup %2163  ;;  %v1343_v45 = vadd.f32 %v1335_v16, %v1326_v38  ;;  %v1352_v30 = vmul.f32 %v1230_v12, %v3314_v22  ;;  %v1239_v51 = vmul.f32 %v1231_v0, %v3289_v49  ;;  %v1294_v54 = vadd.f32 %v1286_v58, %v1270_v19  ;;  %v3315_v49 = vld [vmem:[#allocation27_spill] sm:$0xff] }
 0x1f2   : > { %v2166_v37 = vpop.eup %2165  ;;  %2029 = vmatprep.mubr.f32.mxu1 %v1555_v33  ;;  %v1540_v26 = vadd.f32 1.0, %v2164_v62  ;;  %v1479_v17 = vmul.f32 %v1463_v55, %v3063_v40  ;;  %v1263_v20 = vmul.f32 %v2181_v13, %v1255_v43  ;;  %v1393_v14 = vadd.f32 %v1385_v6, %v1376_v47  ;;  %v3318_v55 = vld [vmem:[#allocation40_spill] sm:$0xff] }
 0x1f3   : > { %v1541_v61 = vadd.f32 1.0, %v2166_v37  ;;  %v1360_v36 = vadd.f32 %v1352_v30, %v1343_v45  ;;  %v1369_v9 = vmul.f32 %v2788_v21, %v1254_v53  ;;  %v1386_v50 = vmul.f32 %v1278_v46, %v3315_v49  ;;  %v3319_v62 = vld [vmem:[#allocation32_spill] sm:$0xff] }
 0x1f4   : > { %v1556_v16 = vmul.f32 %v1540_v26, %v1428_v23  ;;  %v1495_v12 = vadd.f32 %v1479_v17, %v3063_v40  ;;  %v1310_v39 = vadd.f32 %v1302_v35, %v1293_v1  ;;  %v3086_v11 = vadd.f32 %v2870_v52, %v1393_v14  ;;  %v3316_v23 = vld [vmem:[#allocation38_spill] sm:$0xff]  ;;  %v3317_v1 = vld [vmem:[#allocation29_spill] sm:$0xff]  ;;  %v1313_v35 = vld [vmem:[#allocation2 + $0xa8] sm:$0xff] }
 0x1f5   : > { %v1557_v3 = vmul.f32 %v1541_v61, %v1429_v56  ;;  %v1377_v42 = vadd.f32 %v1369_v9, %v1360_v36  ;;  %v1271_v2 = vadd.f32 %v1263_v20, %v1239_v51  ;;  %v1287_v6 = vmul.f32 %v1279_v59, %v3316_v23  ;;  %v1330_v30 = vld [vmem:[#allocation2 + $0xa9] sm:$0xff]  ;;  %v1381_v9 = vld [vmem:[#allocation2 + $0xb1] sm:$0xff] }
 0x1f6   : > { %2030 = vmatmul.mubr.f32.gmra.mrb[6].mxu1 %v1556_v16  ;;  %v1511_v63 = vmul.f32 0.7978846, %v1495_v12  ;;  %v1327_v31 = vadd.f32 %v1319_v34, %v1310_v39  ;;  %v1448_v5 = vmul.f32 0.044715, %v3086_v11  ;;  %v1303_v48 = vmul.f32 %v1231_v0, %v3288_v41  ;;  %v1347_v13 = vld [vmem:[#allocation2 + $0xaf] sm:$0xff] }
 0x1f7   : > { %2032 = vmatprep.mubr.f32.mxu1 %v1557_v3  ;;  %v1394_v53 = vadd.f32 %v1386_v50, %v1377_v42  ;;  %v1430_v46 = vmul.f32 0.5, %v3041_v27  ;;  %v1353_v58 = vmul.f32 %v1231_v0, %v3317_v1  ;;  %v1295_v10 = vadd.f32 %v1287_v6, %v1271_v2  ;;  %v3320_v14 = vld [vmem:[#allocation36_spill] sm:$0xff] }
 0x1f8   : > { %2169 = vtanh.f32 %v1511_v63  ;;  %v1344_v56 = vadd.f32 %v1336_v7, %v1327_v31  ;;  %v1464_v32 = vmul.f32 %v1448_v5, %v3086_v11  ;;  %v1311_v44 = vadd.f32 %v1303_v48, %v1294_v54  ;;  %v3321_v63 = vld [vmem:[#allocation30_spill] sm:$0xff] }
 0x1f9   : > { %v3095_v15 = vadd.f32 %v2870_v52, %v1394_v53  ;;  %v1320_v19 = vmul.f32 %v2783_v25, %v1255_v43  ;;  %v1337_v41 = vmul.f32 %v1279_v59, %v3291_v60  ;;  %v1370_v27 = vmul.f32 %v2788_v21, %v1255_v43 }
 0x1fa   : > { %v2168_v4 = vpop.eup %2167  ;;  %v1361_v34 = vadd.f32 %v1353_v58, %v1344_v56  ;;  %v1480_v0 = vmul.f32 %v1464_v32, %v3086_v11  ;;  %v1304_v8 = vmul.f32 %v1296_v28, %v3318_v55  ;;  %v1387_v47 = vmul.f32 %v1279_v59, %v3319_v62 }
 0x1fb   : > { %v1542_v38 = vadd.f32 1.0, %v2168_v4  ;;  %v1449_v33 = vmul.f32 0.044715, %v3095_v15  ;;  %v1321_v45 = vmul.f32 %v2783_v25, %v1313_v35  ;;  %v1328_v22 = vadd.f32 %v1320_v19, %v1311_v44 }
 0x1fc   : > { %v1378_v7 = vadd.f32 %v1370_v27, %v1361_v34  ;;  %v1496_v60 = vadd.f32 %v1480_v0, %v3086_v11  ;;  %v1312_v43 = vadd.f32 %v1304_v8, %v1295_v10  ;;  %v1354_v54 = vmul.f32 %v1296_v28, %v3293_v57 }
 0x1fd   : > { %v1558_v51 = vmul.f32 %v1542_v38, %v1430_v46  ;;  %v1465_v37 = vmul.f32 %v1449_v33, %v3095_v15  ;;  %v1345_v17 = vadd.f32 %v1337_v41, %v1328_v22  ;;  %v1338_v36 = vmul.f32 %v1330_v30, %v3320_v14 }
 0x1fe   : > { %v1395_v26 = vadd.f32 %v1387_v47, %v1378_v7  ;;  %v1512_v20 = vmul.f32 0.7978846, %v1496_v60  ;;  %v1329_v25 = vadd.f32 %v1321_v45, %v1312_v43  ;;  %v1371_v49 = vmul.f32 %v2788_v21, %v1313_v35 }
 0x1ff   : > { %2033 = vmatmul.mubr.f32.gmra.mrb[8].mxu1 %v1558_v51  ;;  %v1481_v61 = vmul.f32 %v1465_v37, %v3095_v15  ;;  %v1362_v12 = vadd.f32 %v1354_v54, %v1345_v17  ;;  %v1355_v57 = vmul.f32 %v1347_v13, %v3295_v18  ;;  %v1388_v2 = vmul.f32 %v1330_v30, %v3294_v24  ;;  %v3125_v54 = vld [vmem:[%s3193_s8] ss:$0 sm:$0xff] }
 0x200   : > { %v1418_v16 = vadd.f32 %v2870_v52, %v1395_v26  ;;  %2171 = vtanh.f32 %v1512_v20  ;;  %v1346_v59 = vadd.f32 %v1338_v36, %v1329_v25  ;;  %v1389_v31 = vmul.f32 %v1381_v9, %v3321_v63  ;;  %v2182_v36 = vld [vmem:[%s2271_s19 + $0x8] sm:$0xff]  ;;  %v2183_v9 = vld [vmem:[%s2271_s19] sm:$0xff] }
 0x201   : > { %v1497_v50 = vadd.f32 %v1481_v61, %v3095_v15  ;;  %v1379_v42 = vadd.f32 %v1371_v49, %v1362_v12  ;;  %v1431_v5 = vmul.f32 0.5, %v3063_v40  ;;  %v1432_v4 = vmul.f32 0.5, %v3086_v11 }
 0x202   : > { %v2170_v39 = vpop.eup %2169  ;;  %v1450_v3 = vmul.f32 0.044715, %v1418_v16  ;;  %v1363_v6 = vadd.f32 %v1355_v57, %v1346_v59  ;;  %v1433_v33 = vmul.f32 0.5, %v3095_v15  ;;  %v1434_v47 = vmul.f32 0.5, %v1418_v16 }
 0x203   : > { %v1543_v53 = vadd.f32 1.0, %v2170_v39  ;;  %v1513_v23 = vmul.f32 0.7978846, %v1497_v50  ;;  %v1396_v21 = vadd.f32 %v1388_v2, %v1379_v42 }
 0x204   : > { %v1466_v48 = vmul.f32 %v1450_v3, %v1418_v16  ;;  %v1380_v56 = vadd.f32 %v1363_v6, %v3300_v29 }
 0x205   : > { %v1559_v46 = vmul.f32 %v1543_v53, %v1431_v5  ;;  %2173 = vtanh.f32 %v1513_v23  ;;  %v1419_v18 = vadd.f32 %v2870_v52, %v1396_v21 }
 0x206   : > { %v1482_v1 = vmul.f32 %v1466_v48, %v1418_v16  ;;  %v1397_v58 = vadd.f32 %v1389_v31, %v1380_v56 }
 0x207   : > { %2035 = vmatprep.mubr.f32.mxu1 %v1559_v46  ;;  %v1451_v24 = vmul.f32 0.044715, %v1419_v18  ;;  %v1435_v51 = vmul.f32 0.5, %v1419_v18 }
 0x208   : > { %v1498_v28 = vadd.f32 %v1482_v1, %v1418_v16  ;;  %v1420_v32 = vadd.f32 %v2870_v52, %v1397_v58 }
 0x209   : > { %v1467_v40 = vmul.f32 %v1451_v24, %v1419_v18 }
 0x20a   : > { %v1514_v10 = vmul.f32 0.7978846, %v1498_v28  ;;  %v2172_v44 = vpop.eup %2171  ;;  %v1452_v35 = vmul.f32 0.044715, %v1420_v32  ;;  %v1436_v43 = vmul.f32 0.5, %v1420_v32 }
 0x20b   : > { %v1544_v19 = vadd.f32 1.0, %v2172_v44  ;;  %v1483_v41 = vmul.f32 %v1467_v40, %v1419_v18 }
 0x20c   : > { %2175 = vtanh.f32 %v1514_v10  ;;  %v1468_v34 = vmul.f32 %v1452_v35, %v1420_v32  ;;  %v3322_v35 = vld [vmem:[#allocation4_spill] sm:$0xff] }
 0x20d   : > { %v1560_v29 = vmul.f32 %v1544_v19, %v1432_v4  ;;  %v1499_v27 = vadd.f32 %v1483_v41, %v1419_v18  ;;  %v3323_v19 = vld [vmem:[#allocation3_spill] sm:$0xff] }
 0x20e   : > { %v1484_v0 = vmul.f32 %v1468_v34, %v1420_v32 }
 0x20f   : > { %v2174_v38 = vpop.eup %2173  ;;  %2036 = vmatmul.mubr.f32.gmra.mrb[10].mxu1 %v1560_v29  ;;  %v1515_v8 = vmul.f32 0.7978846, %v1499_v27 }
 0x210   : > { %v1545_v55 = vadd.f32 1.0, %v2174_v38  ;;  %v1500_v52 = vadd.f32 %v1484_v0, %v1420_v32  ;;  %v3324_v0 = vld [vmem:[#allocation6_spill] sm:$0xff] }
 0x211   : > { %2177 = vtanh.f32 %v1515_v8 }
 0x212   : > { %v1561_v7 = vmul.f32 %v1545_v55, %v1433_v33  ;;  %v1516_v62 = vmul.f32 0.7978846, %v1500_v52  ;;  %v3325_v55 = vld [vmem:[#allocation5_spill] sm:$0xff] }
 0x214   : > { %2038 = vmatprep.mubr.f32.mxu1 %v1561_v7  ;;  %2179 = vtanh.f32 %v1516_v62 }
 0x216   : > { %v2176_v11 = vpop.eup %2175 }
 0x217   : > { %v1546_v45 = vadd.f32 1.0, %v2176_v11 }
 0x219   : > { %v1562_v22 = vmul.f32 %v1546_v45, %v1434_v47  ;;  %v3326_v47 = vld [vmem:[#allocation8_spill] sm:$0xff] }
 0x21b   : > { %2039 = vmatmul.mubr.f32.gmra.mrb[12].mxu1 %v1562_v22  ;;  %v2178_v30 = vpop.eup %2177  ;;  %v3327_v22 = vld [vmem:[#allocation7_spill] sm:$0xff] }
 0x21c   : > { %v1547_v60 = vadd.f32 1.0, %v2178_v30 }
 0x21e   : > { %v2180_v15 = vpop.eup %2179  ;;  %v1563_v37 = vmul.f32 %v1547_v60, %v1435_v51 }
 0x21f   : > { %v1548_v26 = vadd.f32 1.0, %v2180_v15 }
 0x220   : > { %2041 = vmatprep.mubr.f32.mxu1 %v1563_v37 }
 0x221   : > { %v1564_v17 = vmul.f32 %v1548_v26, %v1436_v43  ;;  %v3328_v43 = vld [vmem:[#allocation10_spill] sm:$0xff] }
 0x223   : > { %2042 = vmatmul.mubr.f32.gmra.mrb[14].mxu1 %v1564_v17  ;;  %v3329_v17 = vld [vmem:[#allocation9_spill] sm:$0xff] }
 0x2a0   : > { %v2022_v13 = vpop.f32.mrb[0].mxu1 }
 0x2a1   : > { %v1660_v20 = vadd.f32 %v2022_v13, %v3125_v54  ;;  %v1654_v61 = vpop.f32.mrb[1].mxu1 }
 0x2a2   : > { %v1655_v14 = vadd.f32 %v3125_v54, %v1654_v61 }
 0x2a3   : > { %v1734_v25 = vadd.f32 %v2182_v36, %v1660_v20 }
 0x2a4   : > { %v1733_v16 = vadd.f32 %v2183_v9, %v1655_v14 }
 0x2a5   : > { %1750 = vst [vmem:[%s3133_s27 + $0x8] sm:$0xff] %v1734_v25 }
 0x2a6   : > { %1749 = vst [vmem:[%s3133_s27] sm:$0xff] %v1733_v16 }
 0x2a8   : > { %v2025_v12 = vpop.f32.mrb[2].mxu1 }
 0x2a9   : > { %v1670_v49 = vadd.f32 %v2025_v12, %v3125_v54  ;;  %v1664_v50 = vpop.f32.mrb[3].mxu1 }
 0x2aa   : > { %v1665_v59 = vadd.f32 %v3125_v54, %v1664_v50 }
 0x2ad   : > { %v2184_v57 = vld [vmem:[%s2271_s19 + $0x18] sm:$0xff]  ;;  %v2185_v3 = vld [vmem:[%s2271_s19 + $0x10] sm:$0xff] }
 0x2ae   : > { %v1736_v39 = vadd.f32 %v2184_v57, %v1670_v49  ;;  %v1735_v42 = vadd.f32 %v2185_v3, %v1665_v59 }
 0x2b0   : > { %1752 = vst [vmem:[%s3133_s27 + $0x18] sm:$0xff] %v1736_v39  ;;  %1751 = vst [vmem:[%s3133_s27 + $0x10] sm:$0xff] %v1735_v42 }
 0x2b7   : > { %v2186_v53 = vld [vmem:[%s2271_s19 + $0x28] sm:$0xff]  ;;  %v2187_v6 = vld [vmem:[%s2271_s19 + $0x20] sm:$0xff] }
 0x2ba   : > { %v2028_v2 = vpop.f32.mrb[4].mxu1 }
 0x2bb   : > { %v1680_v63 = vadd.f32 %v2028_v2, %v3125_v54  ;;  %v1674_v31 = vpop.f32.mrb[5].mxu1 }
 0x2bc   : > { %v1675_v5 = vadd.f32 %v3125_v54, %v1674_v31 }
 0x2bd   : > { %v1738_v23 = vadd.f32 %v2186_v53, %v1680_v63 }
 0x2be   : > { %v1737_v48 = vadd.f32 %v2187_v6, %v1675_v5 }
 0x2bf   : > { %1754 = vst [vmem:[%s3133_s27 + $0x28] sm:$0xff] %v1738_v23 }
 0x2c0   : > { %1753 = vst [vmem:[%s3133_s27 + $0x20] sm:$0xff] %v1737_v48 }
 0x2c7   : > { %v2188_v18 = vld [vmem:[%s2271_s19 + $0x38] sm:$0xff]  ;;  %v2189_v28 = vld [vmem:[%s2271_s19 + $0x30] sm:$0xff] }
 0x2c9   : > { %v2031_v21 = vpop.f32.mrb[6].mxu1 }
 0x2ca   : > { %v1690_v46 = vadd.f32 %v2031_v21, %v3125_v54  ;;  %v1684_v56 = vpop.f32.mrb[7].mxu1 }
 0x2cb   : > { %v1685_v1 = vadd.f32 %v3125_v54, %v1684_v56 }
 0x2cc   : > { %v1740_v58 = vadd.f32 %v2188_v18, %v1690_v46 }
 0x2cd   : > { %v1739_v24 = vadd.f32 %v2189_v28, %v1685_v1 }
 0x2ce   : > { %1756 = vst [vmem:[%s3133_s27 + $0x38] sm:$0xff] %v1740_v58 }
 0x2cf   : > { %1755 = vst [vmem:[%s3133_s27 + $0x30] sm:$0xff] %v1739_v24 }
 0x2d2   : > { %v2034_v32 = vpop.f32.mrb[8].mxu1 }
 0x2d3   : > { %v1700_v10 = vadd.f32 %v2034_v32, %v3125_v54  ;;  %v1694_v40 = vpop.f32.mrb[9].mxu1 }
 0x2d4   : > { %v1695_v44 = vadd.f32 %v3125_v54, %v1694_v40 }
 0x2d5   : > { %v1742_v4 = vadd.f32 %v1700_v10, %v3322_v35 }
 0x2d6   : > { %v1741_v41 = vadd.f32 %v1695_v44, %v3323_v19 }
 0x2d7   : > { %1758 = vst [vmem:[%s3133_s27 + $0x48] sm:$0xff] %v1742_v4 }
 0x2d8   : > { %1757 = vst [vmem:[%s3133_s27 + $0x40] sm:$0xff] %v1741_v41 }
 0x2e2   : > { %v2037_v34 = vpop.f32.mrb[10].mxu1 }
 0x2e3   : > { %v1710_v29 = vadd.f32 %v2037_v34, %v3125_v54  ;;  %v1704_v27 = vpop.f32.mrb[11].mxu1 }
 0x2e4   : > { %v1705_v38 = vadd.f32 %v3125_v54, %v1704_v27 }
 0x2e5   : > { %v1744_v33 = vadd.f32 %v1710_v29, %v3324_v0 }
 0x2e6   : > { %v1743_v8 = vadd.f32 %v1705_v38, %v3325_v55 }
 0x2e7   : > { %1760 = vst [vmem:[%s3133_s27 + $0x58] sm:$0xff] %v1744_v33 }
 0x2e8   : > { %1759 = vst [vmem:[%s3133_s27 + $0x50] sm:$0xff] %v1743_v8 }
 0x2ee   : > { %v2040_v52 = vpop.f32.mrb[12].mxu1 }
 0x2ef   : > { %v1720_v7 = vadd.f32 %v2040_v52, %v3125_v54  ;;  %v1714_v62 = vpop.f32.mrb[13].mxu1 }
 0x2f0   : > { %v1715_v11 = vadd.f32 %v3125_v54, %v1714_v62 }
 0x2f1   : > { %v1746_v45 = vadd.f32 %v1720_v7, %v3326_v47 }
 0x2f2   : > { %v1745_v30 = vadd.f32 %v1715_v11, %v3327_v22 }
 0x2f3   : > { %1762 = vst [vmem:[%s3133_s27 + $0x68] sm:$0xff] %v1746_v45 }
 0x2f4   : > { %1761 = vst [vmem:[%s3133_s27 + $0x60] sm:$0xff] %v1745_v30 }
 0x2f6   : > { %v2043_v51 = vpop.f32.mrb[14].mxu1 }
 0x2f7   : > { %v1730_v60 = vadd.f32 %v2043_v51, %v3125_v54  ;;  %v1724_v15 = vpop.f32.mrb[15].mxu1 }
 0x2f8   : > { %v1725_v37 = vadd.f32 %v3125_v54, %v1724_v15 }
 0x2f9   : > { %v1748_v26 = vadd.f32 %v1730_v60, %v3328_v43 }
 0x2fa   : > { %v1747_v13 = vadd.f32 %v1725_v37, %v3329_v17 }
 0x2fb   : > { %1764 = vst [vmem:[%s3133_s27 + $0x78] sm:$0xff] %v1748_v26 }
 0x2fc   : > { %1763 = vst [vmem:[%s3133_s27 + $0x70] sm:$0xff] %v1747_v13 }
 0x2fd PF: > { %s19_s30 = sadd.s32 1, %s2196_s30  }
 0x2fe   : > { %p16_p4 = scmp.ge.s32.totalorder %s19_s30, 4  }
 0x300   :  { %18 = sbr.rel (!%p16_p4) target bundleno = 1 (0x1), region = 87 }

// kernel: block_forward.2
= control target key start
LH: loop header
LB: loop body
LE: loop exit
PB: predicated region body
PF: predicated region fallthrough
CT: control target
= control target key end

     0   :  { %s4817_s27 = smov 0   ;;  %s6288_s0 = inlined_call_operand.vmem [shape: f32[2,64,128], index: 0, kind: input, shape index: {}, may-alias: {0,7}]   ;;  %s6289_s1 = inlined_call_operand.vmem [shape: f32[2,64,128], index: 1, kind: input, shape index: {}, may-alias: {1,8}]   ;;  %s6290_s2 = inlined_call_operand.vmem [shape: f32[1,128], index: 2, kind: input, shape index: {}]   ;;  %s6291_s3 = inlined_call_operand.vmem [shape: f32[1,128], index: 3, kind: input, shape index: {}]   ;;  %s6292_s4 = inlined_call_operand.vmem [shape: f32[128,384], index: 4, kind: input, shape index: {}]   ;;  %s6293_s5 = inlined_call_operand.vmem [shape: f32[128,128], index: 5, kind: input, shape index: {}]   ;;  %s6294_s6 = inlined_call_operand.vmem [shape: f32[1,128], index: 6, kind: input, shape index: {}]   ;;  %s6295_s7 = inlined_call_operand.vmem [shape: f32[2,64,128], index: 7, kind: output, shape index: {0}, may-alias: {0,7}]   ;;  %s6296_s8 = inlined_call_operand.vmem [shape: f32[2,64,128], index: 8, kind: output, shape index: {1}, may-alias: {1,8}]  }
   0x1 LB: > { %s3414_s28 = sadd.s32 4294967295, %s4769_s27   ;;  %p3418_p0 = scmp.ge.s32.totalorder %s4769_s27, 1  ;;  %s4769_s27 = sphi %s4817_s27, %s19_s27  }
   0x2   : > { %p275_p1 = scmp.lt.s32.totalorder %s4769_s27, 3 }
   0x4   : > { %p276_p2 = pnand %p3418_p0, %p275_p1 }
   0x6   : > { %279 = sbr.rel (%p276_p2) target bundleno = 1566 (0x61e), region = 48 }
   0xd   : > { %p319_p3 = scmp.lt.s32.totalorder %s3414_s28, 1  ;;  %v610_v0 = vld [vmem:[%s6292_s4 + $0x8] sm:$0xff]  ;;  %v613_v1 = vld [vmem:[%s6292_s4 + $0x20] sm:$0xff]  ;;  %v612_v4 = vld [vmem:[%s6292_s4 + $0x18] sm:$0xff]  ;;  %vm1115_vm10 = vcmask 523264  }
   0xe   : > { %v609_v2 = vld [vmem:[%s6292_s4] sm:$0xff]  ;;  %v4192_v3 = vpack.c.bf16 %v613_v1, %v610_v0  ;;  %v611_v5 = vld [vmem:[%s6292_s4 + $0x10] sm:$0xff]  ;;  %v614_v6 = vld [vmem:[%s6292_s4 + $0x28] sm:$0xff] }
   0xf   : > { %s6424_s28 = smov (!%p319_p3, %s3414_s28), 1  ;;  %v4194_v7 = vpack.c.bf16 %v612_v4, %v609_v2  ;;  %v4224_v8 = vpack.c.bf16 %v614_v6, %v611_v5  ;;  %v616_v9 = vld [vmem:[%s6292_s4 + $0x38] sm:$0xff]  ;;  %v619_v10 = vld [vmem:[%s6292_s4 + $0x50] sm:$0xff]  ;;  %v618_v22 = vld [vmem:[%s6292_s4 + $0x48] sm:$0xff] }
  0x10   : > { %4193 = vmatprep.subr.bf16.mxu0 %v4192_v3  ;;  %v4196_v11 = vpack.c.bf16 %v619_v10, %v616_v9  ;;  %s4849_s23 = sshll.u32 %s6424_s28, 6  ;;  %v615_v21 = vld [vmem:[%s6292_s4 + $0x30] sm:$0xff]  ;;  %v617_v23 = vld [vmem:[%s6292_s4 + $0x40] sm:$0xff]  ;;  %v620_v26 = vld [vmem:[%s6292_s4 + $0x58] sm:$0xff] }
  0x11   : > { %4195 = vmatpush1.bf16.msra.mxu0 %v4194_v7  ;;  %4225 = vmatprep.subr.bf16.mxu1 %v4224_v8  ;;  %s4855_s26 = scalar_lea.vmem %s6288_s0, %s4849_s23  ;;  %v4198_v25 = vpack.c.bf16 %v618_v22, %v615_v21  ;;  %v4228_v28 = vpack.c.bf16 %v620_v26, %v617_v23  ;;  %v622_v29 = vld [vmem:[%s6292_s4 + $0x68] sm:$0xff]  ;;  %v625_v30 = vld [vmem:[%s6292_s4 + $0x80] sm:$0xff]  ;;  %v624_v34 = vld [vmem:[%s6292_s4 + $0x78] sm:$0xff]  ;;  %s4953_s21 = scalar_lea.vmem %s6289_s1, %s4849_s23 }
  0x12   : > { %4227 = vmatpush3.bf16.msra.mxu1 %v4224_v8  ;;  %4197 = vmatprep.subr.bf16.mxu0 %v4196_v11  ;;  %v4858_v12 = vld [vmem:[%s4855_s26 + $0x8] sm:$0xff]  ;;  %v4861_v13 = vld [vmem:[%s4855_s26] sm:$0xff]  ;;  %v4870_v16 = vld [vmem:[%s4855_s26 + $0x10] sm:$0xff]  ;;  %v4200_v31 = vpack.c.bf16 %v625_v30, %v622_v29  ;;  %s6263_s16 = scalar_lea.vmem %s6295_s7, %s4849_s23  ;;  %s338_s18 = scalar_lea.vmem %s6296_s8, %s4849_s23 }
  0x13   : > { %359 = vadd.xlane.f32.xlu1 %v4858_v12  ;;  %357 = vadd.xlane.f32.xlu0 %v4861_v13  ;;  %v382_v14 = vmul.f32 %v4858_v12, %v4858_v12  ;;  %v381_v15 = vmul.f32 %v4861_v13, %v4861_v13  ;;  %6339 = vst [vmem:[#allocation2_spill] sm:$0xff] %v4870_v16  ;;  %v4875_v18 = vld [vmem:[%s4855_s26 + $0x18] sm:$0xff]  ;;  %v4881_v20 = vld [vmem:[%s4855_s26 + $0x20] sm:$0xff]  ;;  %v4899_v27 = vld [vmem:[%s4855_s26 + $0x28] sm:$0xff] }
  0x14   : > { %v383_v17 = vmul.f32 %v4870_v16, %v4870_v16  ;;  %6340 = vst [vmem:[#allocation3_spill] sm:$0xff] %v4875_v18  ;;  %v384_v19 = vmul.f32 %v4875_v18, %v4875_v18  ;;  %6341 = vst [vmem:[#allocation4_spill] sm:$0xff] %v4881_v20  ;;  %v385_v24 = vmul.f32 %v4881_v20, %v4881_v20  ;;  %4229 = vmatprep.subr.bf16.mxu1 %v4228_v28  ;;  %v621_v33 = vld [vmem:[%s6292_s4 + $0x60] sm:$0xff]  ;;  %v623_v35 = vld [vmem:[%s6292_s4 + $0x70] sm:$0xff] }
  0x15   : > { %6342 = vst [vmem:[#allocation5_spill] sm:$0xff] %v4899_v27  ;;  %4199 = vmatpush1.bf16.msra.mxu0 %v4198_v25  ;;  %v386_v32 = vmul.f32 %v4899_v27, %v4899_v27  ;;  %v4920_v36 = vld [vmem:[%s4855_s26 + $0x30] sm:$0xff]  ;;  %v4202_v37 = vpack.c.bf16 %v624_v34, %v621_v33  ;;  %v626_v38 = vld [vmem:[%s6292_s4 + $0x88] sm:$0xff]  ;;  %v628_v40 = vld [vmem:[%s6292_s4 + $0x98] sm:$0xff] }
  0x16   : > { %6343 = vst [vmem:[#allocation6_spill] sm:$0xff] %v4920_v36  ;;  %4231 = vmatpush3.bf16.msra.mxu1 %v4228_v28  ;;  %4201 = vmatprep.subr.bf16.mxu0 %v4200_v31  ;;  %v4232_v39 = vpack.c.bf16 %v626_v38, %v623_v35  ;;  %v631_v41 = vld [vmem:[%s6292_s4 + $0xb0] sm:$0xff]  ;;  %v387_v42 = vmul.f32 %v4920_v36, %v4920_v36  ;;  %v630_v45 = vld [vmem:[%s6292_s4 + $0xa8] sm:$0xff]  ;;  %v629_v46 = vld [vmem:[%s6292_s4 + $0xa0] sm:$0xff] }
  0x17   : > { %391 = vadd.xlane.f32.xlu1 %v382_v14  ;;  %389 = vadd.xlane.f32.xlu0 %v381_v15  ;;  %v4204_v43 = vpack.c.bf16 %v631_v41, %v628_v40  ;;  %v627_v44 = vld [vmem:[%s6292_s4 + $0x90] sm:$0xff]  ;;  %v4944_v47 = vld [vmem:[%s4855_s26 + $0x38] sm:$0xff]  ;;  %v634_v51 = vld [vmem:[%s6292_s4 + $0xc8] sm:$0xff]  ;;  %v4771_v40 = vmov 0.0  }
  0x18   : > { %6344 = vst [vmem:[#allocation7_spill] sm:$0xff] %v4944_v47  ;;  %4233 = vmatprep.subr.bf16.mxu1 %v4232_v39  ;;  %v4206_v48 = vpack.c.bf16 %v630_v45, %v627_v44  ;;  %v632_v49 = vld [vmem:[%s6292_s4 + $0xb8] sm:$0xff]  ;;  %v637_v52 = vld [vmem:[%s6292_s4 + $0xe0] sm:$0xff]  ;;  %v388_v53 = vmul.f32 %v4944_v47, %v4944_v47  ;;  %v635_v57 = vld [vmem:[%s6292_s4 + $0xd0] sm:$0xff]  ;;  %721 = vmatprep.mubr.f32.mxu0 %v4771_v40 }
  0x19   : > { %4203 = vmatpush1.bf16.msra.mxu0 %v4202_v37  ;;  %v4236_v50 = vpack.c.bf16 %v632_v49, %v629_v46  ;;  %v4208_v54 = vpack.c.bf16 %v637_v52, %v634_v51  ;;  %v633_v55 = vld [vmem:[%s6292_s4 + $0xc0] sm:$0xff]  ;;  %v636_v56 = vld [vmem:[%s6292_s4 + $0xd8] sm:$0xff]  ;;  %v638_v60 = vld [vmem:[%s6292_s4 + $0xe8] sm:$0xff] }
  0x1a   : > { %4235 = vmatpush3.bf16.msra.mxu1 %v4232_v39  ;;  %4205 = vmatprep.subr.bf16.mxu0 %v4204_v43  ;;  %v4974_v58 = vld [vmem:[%s4953_s21] sm:$0xff]  ;;  %v4210_v59 = vpack.c.bf16 %v636_v56, %v633_v55  ;;  %v4240_v61 = vpack.c.bf16 %v638_v60, %v635_v57  ;;  %v640_v62 = vld [vmem:[%s6292_s4 + $0xf8] sm:$0xff]  ;;  %v643_v63 = vld [vmem:[%s6292_s4 + $0x110] sm:$0xff] }
  0x1b   : > { %361 = vadd.xlane.f32.xlu0 %v4870_v16  ;;  %393 = vadd.xlane.f32.xlu1 %v383_v17  ;;  %v513_v0 = vmul.f32 %v4974_v58, %v4974_v58  ;;  %v4212_v1 = vpack.c.bf16 %v643_v63, %v640_v62  ;;  %v639_v2 = vld [vmem:[%s6292_s4 + $0xf0] sm:$0xff]  ;;  %v642_v3 = vld [vmem:[%s6292_s4 + $0x108] sm:$0xff]  ;;  %v641_v4 = vld [vmem:[%s6292_s4 + $0x100] sm:$0xff] }
  0x1c   : > { %4237 = vmatprep.subr.bf16.mxu1 %v4236_v50  ;;  %v4998_v5 = vld [vmem:[%s4953_s21 + $0x8] sm:$0xff]  ;;  %v4214_v6 = vpack.c.bf16 %v642_v3, %v639_v2  ;;  %v644_v7 = vld [vmem:[%s6292_s4 + $0x118] sm:$0xff]  ;;  %v649_v10 = vld [vmem:[%s6292_s4 + $0x140] sm:$0xff] }
  0x1d   : > { %4207 = vmatpush1.bf16.msra.mxu0 %v4206_v48  ;;  %v4244_v8 = vpack.c.bf16 %v644_v7, %v641_v4  ;;  %v646_v9 = vld [vmem:[%s6292_s4 + $0x128] sm:$0xff]  ;;  %v514_v11 = vmul.f32 %v4998_v5, %v4998_v5  ;;  %v645_v15 = vld [vmem:[%s6292_s4 + $0x120] sm:$0xff]  ;;  %v648_v17 = vld [vmem:[%s6292_s4 + $0x138] sm:$0xff] }
  0x1e   : > { %4239 = vmatpush3.bf16.msra.mxu1 %v4236_v50  ;;  %4209 = vmatprep.subr.bf16.mxu0 %v4208_v54  ;;  %v4216_v14 = vpack.c.bf16 %v649_v10, %v646_v9  ;;  %v5022_v21 = vld [vmem:[%s4953_s21 + $0x10] sm:$0xff]  ;;  %v4218_v22 = vpack.c.bf16 %v648_v17, %v645_v15  ;;  %v650_v23 = vld [vmem:[%s6292_s4 + $0x148] sm:$0xff]  ;;  %v652_v25 = vld [vmem:[%s6292_s4 + $0x158] sm:$0xff] }
  0x1f   : > { %363 = vadd.xlane.f32.xlu0 %v4875_v18  ;;  %395 = vadd.xlane.f32.xlu1 %v384_v19  ;;  %v647_v19 = vld [vmem:[%s6292_s4 + $0x130] sm:$0xff]  ;;  %v515_v28 = vmul.f32 %v5022_v21, %v5022_v21  ;;  %v654_v31 = vld [vmem:[%s6292_s4 + $0x168] sm:$0xff]  ;;  %v5046_v33 = vld [vmem:[%s4953_s21 + $0x18] sm:$0xff] }
  0x20   : > { %4241 = vmatprep.subr.bf16.mxu1 %v4240_v61  ;;  %v655_v26 = vld [vmem:[%s6292_s4 + $0x170] sm:$0xff]  ;;  %v656_v35 = vld [vmem:[%s6292_s4 + $0x178] sm:$0xff]  ;;  %v516_v38 = vmul.f32 %v5046_v33, %v5046_v33  ;;  %v5055_v39 = vld [vmem:[%s4953_s21 + $0x20] sm:$0xff] }
  0x21   : > { %4211 = vmatpush1.bf16.msra.mxu0 %v4210_v59  ;;  %v4220_v29 = vpack.c.bf16 %v655_v26, %v652_v25  ;;  %v651_v30 = vld [vmem:[%s6292_s4 + $0x150] sm:$0xff]  ;;  %v517_v41 = vmul.f32 %v5055_v39, %v5055_v39  ;;  %v5074_v46 = vld [vmem:[%s4953_s21 + $0x38] sm:$0xff] }
  0x22   : > { %4243 = vmatpush3.bf16.msra.mxu1 %v4240_v61  ;;  %4213 = vmatprep.subr.bf16.mxu0 %v4212_v1  ;;  %v4222_v34 = vpack.c.bf16 %v654_v31, %v651_v30  ;;  %v5068_v44 = vld [vmem:[%s4953_s21 + $0x30] sm:$0xff]  ;;  %v520_v48 = vmul.f32 %v5074_v46, %v5074_v46 }
  0x23   : > { %365 = vadd.xlane.f32.xlu0 %v4881_v20  ;;  %397 = vadd.xlane.f32.xlu1 %v385_v24  ;;  %v4248_v24 = vpack.c.bf16 %v650_v23, %v647_v19  ;;  %v519_v45 = vmul.f32 %v5068_v44, %v5068_v44 }
  0x24   : > { %4245 = vmatprep.subr.bf16.mxu1 %v4244_v8 }
  0x25   : > { %4215 = vmatpush1.bf16.msra.mxu0 %v4214_v6 }
  0x26   : > { %4247 = vmatpush3.bf16.msra.mxu1 %v4244_v8  ;;  %4217 = vmatprep.subr.bf16.mxu0 %v4216_v14 }
  0x27   : > { %367 = vadd.xlane.f32.xlu0 %v4899_v27  ;;  %399 = vadd.xlane.f32.xlu1 %v386_v32  ;;  %v653_v32 = vld [vmem:[%s6292_s4 + $0x160] sm:$0xff] }
  0x28   : > { %4249 = vmatprep.subr.bf16.mxu1 %v4248_v24  ;;  %v4252_v37 = vpack.c.bf16 %v656_v35, %v653_v32 }
  0x29   : > { %4219 = vmatpush1.bf16.msra.mxu0 %v4218_v22 }
  0x2a   : > { %4251 = vmatpush3.bf16.msra.mxu1 %v4248_v24  ;;  %4221 = vmatprep.subr.bf16.mxu0 %v4220_v29 }
  0x2b   : > { %369 = vadd.xlane.f32.xlu0 %v4920_v36  ;;  %401 = vadd.xlane.f32.xlu1 %v387_v42  ;;  %v5062_v42 = vld [vmem:[%s4953_s21 + $0x28] sm:$0xff] }
  0x2c   : > { %4253 = vmatprep.subr.bf16.mxu1 %v4252_v37  ;;  %v518_v43 = vmul.f32 %v5062_v42, %v5062_v42 }
  0x2d   : > { %4223 = vmatpush1.bf16.msra.mxu0 %v4222_v34 }
  0x2e   : > { %4255 = vmatpush3.bf16.msra.mxu1 %v4252_v37  ;;  %v5091_v37 = vld [vmem:[%s6290_s2] ss:$0 sm:$0xff] }
  0x2f   : > { %371 = vadd.xlane.f32.xlu0 %v4944_v47  ;;  %403 = vadd.xlane.f32.xlu1 %v388_v53 }
  0x33   : > { %489 = vadd.xlane.f32.xlu0 %v4974_v58  ;;  %521 = vadd.xlane.f32.xlu1 %v513_v0 }
  0x37   : > { %491 = vadd.xlane.f32.xlu0 %v4998_v5  ;;  %523 = vadd.xlane.f32.xlu1 %v514_v11 }
  0x3b   : > { %493 = vadd.xlane.f32.xlu0 %v5022_v21  ;;  %525 = vadd.xlane.f32.xlu1 %v515_v28 }
  0x3f   : > { %495 = vadd.xlane.f32.xlu0 %v5046_v33  ;;  %527 = vadd.xlane.f32.xlu1 %v516_v38 }
  0x43   : > { %497 = vadd.xlane.f32.xlu0 %v5055_v39  ;;  %529 = vadd.xlane.f32.xlu1 %v517_v41 }
  0x47   : > { %499 = vadd.xlane.f32.xlu0 %v5062_v42  ;;  %531 = vadd.xlane.f32.xlu1 %v518_v43 }
  0x4b   : > { %501 = vadd.xlane.f32.xlu0 %v5068_v44  ;;  %533 = vadd.xlane.f32.xlu1 %v519_v45 }
  0x4f   : > { %503 = vadd.xlane.f32.xlu0 %v5074_v46  ;;  %535 = vadd.xlane.f32.xlu1 %v520_v48 }
  0xa0   : > { %v360_v49 = vpop.xlane.xlu1 %359  ;;  %v358_v50 = vpop.xlane.xlu0 %357 }
  0xa1   : > { %v374_v51 = vmul.f32 0.03125, %v360_v49  ;;  %v373_v52 = vmul.f32 0.03125, %v358_v50  ;;  %v5098_v49 = vld [vmem:[%s6291_s3] ss:$0 sm:$0xff] }
  0xa3   : > { %v414_v53 = vmul.f32 %v374_v51, %v374_v51  ;;  %v413_v56 = vmul.f32 %v373_v52, %v373_v52  ;;  %v430_v26 = vsub.f32 %v4858_v12, %v374_v51  ;;  %v429_v28 = vsub.f32 %v4861_v13, %v373_v52 }
  0xa4   : > { %v392_v54 = vpop.xlane.xlu1 %391  ;;  %v390_v55 = vpop.xlane.xlu0 %389 }
  0xa5   : > { %v406_v57 = vmul.f32 0.03125, %v392_v54  ;;  %v405_v59 = vmul.f32 0.03125, %v390_v55 }
  0xa7   : > { %v422_v60 = vsub.f32 %v406_v57, %v414_v53  ;;  %v421_v61 = vsub.f32 %v405_v59, %v413_v56 }
  0xa8   : > { %v362_v62 = vpop.xlane.xlu0 %361  ;;  %v394_v63 = vpop.xlane.xlu1 %393 }
  0xa9   : > { %v438_v0 = vadd.f32 1e-05, %v422_v60  ;;  %v437_v1 = vadd.f32 1e-05, %v421_v61  ;;  %v375_v2 = vmul.f32 0.03125, %v362_v62  ;;  %v407_v3 = vmul.f32 0.03125, %v394_v63 }
  0xab   : > { %4473 = vrsqrt.f32 %v438_v0  ;;  %v415_v4 = vmul.f32 %v375_v2, %v375_v2  ;;  %v431_v54 = vsub.f32 %v4870_v16, %v375_v2 }
  0xac   : > { %4475 = vrsqrt.f32 %v437_v1  ;;  %v364_v6 = vpop.xlane.xlu0 %363  ;;  %v396_v7 = vpop.xlane.xlu1 %395 }
  0xad   : > { %v423_v8 = vsub.f32 %v407_v3, %v415_v4  ;;  %v376_v9 = vmul.f32 0.03125, %v364_v6  ;;  %v408_v10 = vmul.f32 0.03125, %v396_v7 }
  0xaf   : > { %v439_v11 = vadd.f32 1e-05, %v423_v8  ;;  %v416_v14 = vmul.f32 %v376_v9, %v376_v9  ;;  %v432_v2 = vsub.f32 %v4875_v18, %v376_v9 }
  0xb0   : > { %v366_v15 = vpop.xlane.xlu0 %365  ;;  %v398_v17 = vpop.xlane.xlu1 %397 }
  0xb1   : > { %4477 = vrsqrt.f32 %v439_v11  ;;  %v424_v19 = vsub.f32 %v408_v10, %v416_v14  ;;  %v5080_v22 = vmul.f32 0.03125, %v366_v15  ;;  %v409_v23 = vmul.f32 0.03125, %v398_v17 }
  0xb3   : > { %v440_v24 = vadd.f32 1e-05, %v424_v19  ;;  %v417_v25 = vmul.f32 %v5080_v22, %v5080_v22 }
  0xb4   : > { %v368_v29 = vpop.xlane.xlu0 %367  ;;  %v400_v30 = vpop.xlane.xlu1 %399 }
  0xb5   : > { %v4474_v31 = vpop.eup %4473  ;;  %4479 = vrsqrt.f32 %v440_v24  ;;  %v425_v32 = vsub.f32 %v409_v23, %v417_v25  ;;  %v5086_v34 = vmul.f32 0.03125, %v368_v29  ;;  %v410_v35 = vmul.f32 0.03125, %v400_v30 }
  0xb6   : > { %v4476_v38 = vpop.eup %4475  ;;  %v454_v41 = vmul.f32 %v4474_v31, %v430_v26  ;;  %v433_v24 = vsub.f32 %v4881_v20, %v5080_v22 }
  0xb7   : > { %v441_v43 = vadd.f32 1e-05, %v425_v32  ;;  %v418_v12 = vmul.f32 %v5086_v34, %v5086_v34  ;;  %v453_v13 = vmul.f32 %v4476_v38, %v429_v28 }
  0xb8   : > { %v370_v45 = vpop.xlane.xlu0 %369  ;;  %v402_v48 = vpop.xlane.xlu1 %401  ;;  %v468_v50 = vmul.f32 %v5091_v37, %v454_v41 }
  0xb9   : > { %4481 = vrsqrt.f32 %v441_v43  ;;  %v426_v51 = vsub.f32 %v410_v35, %v418_v12  ;;  %v5101_v52 = vmul.f32 0.03125, %v370_v45  ;;  %v411_v53 = vmul.f32 0.03125, %v402_v48 }
  0xba   : > { %v467_v55 = vmul.f32 %v5091_v37, %v453_v13  ;;  %v482_v60 = vadd.f32 %v5098_v49, %v468_v50  ;;  %v434_v43 = vsub.f32 %v4899_v27, %v5086_v34 }
  0xbb   : > { %v4478_v56 = vpop.eup %4477  ;;  %v442_v57 = vadd.f32 1e-05, %v426_v51  ;;  %v419_v59 = vmul.f32 %v5101_v52, %v5101_v52 }
  0xbc   : > { %v481_v61 = vadd.f32 %v5098_v49, %v467_v55  ;;  %v372_v62 = vpop.xlane.xlu0 %371  ;;  %v404_v63 = vpop.xlane.xlu1 %403  ;;  %v455_v0 = vmul.f32 %v4478_v56, %v431_v54 }
  0xbd   : > { %4483 = vrsqrt.f32 %v442_v57  ;;  %v427_v1 = vsub.f32 %v411_v53, %v419_v59  ;;  %v5109_v3 = vmul.f32 0.03125, %v372_v62  ;;  %v412_v4 = vmul.f32 0.03125, %v404_v63 }
  0xbe   : > { %722 = vmatmul.mubr.f32.vlgmr.msra.gmra.mrb[0].mxu0 %v481_v61  ;;  %3792 = vmatprep.mubr.f32.mxu1 %v481_v61  ;;  %v469_v6 = vmul.f32 %v5091_v37, %v455_v0  ;;  %v435_v57 = vsub.f32 %v4920_v36, %v5101_v52 }
  0xbf   : > { %v4480_v7 = vpop.eup %4479  ;;  %v443_v8 = vadd.f32 1e-05, %v427_v1  ;;  %3793 = vmatmul.mubr.f32.vlgmr.msra.gmra.mrb[0].mxu1 %v482_v60  ;;  %v420_v10 = vmul.f32 %v5109_v3, %v5109_v3  ;;  %727 = vmatprep.mubr.f32.mxu0 %v4771_v40 }
  0xc0   : > { %v483_v11 = vadd.f32 %v5098_v49, %v469_v6  ;;  %v456_v14 = vmul.f32 %v4480_v7, %v432_v2  ;;  %v490_v15 = vpop.xlane.xlu0 %489  ;;  %v522_v17 = vpop.xlane.xlu1 %521  ;;  %v436_v7 = vsub.f32 %v4944_v47, %v5109_v3 }
  0xc1   : > { %4485 = vrsqrt.f32 %v443_v8  ;;  %v428_v19 = vsub.f32 %v412_v4, %v420_v10  ;;  %v5117_v9 = vmul.f32 0.03125, %v490_v15  ;;  %v537_v23 = vmul.f32 0.03125, %v522_v17 }
  0xc2   : > { %728 = vmatmul.mubr.f32.gmra.mrb[2].mxu0 %v482_v60  ;;  %3795 = vmatprep.mubr.f32.mxu1 %v483_v11  ;;  %v470_v25 = vmul.f32 %v5091_v37, %v456_v14 }
  0xc3   : > { %v4482_v26 = vpop.eup %4481  ;;  %v444_v28 = vadd.f32 1e-05, %v428_v19  ;;  %733 = vmatprep.mubr.f32.mxu0 %v4771_v40  ;;  %v545_v29 = vmul.f32 %v5117_v9, %v5117_v9  ;;  %v561_v15 = vsub.f32 %v4974_v58, %v5117_v9 }
  0xc4   : > { %v484_v30 = vadd.f32 %v5098_v49, %v470_v25  ;;  %v457_v31 = vmul.f32 %v4482_v26, %v433_v24  ;;  %v492_v32 = vpop.xlane.xlu0 %491  ;;  %v524_v35 = vpop.xlane.xlu1 %523 }
  0xc5   : > { %4487 = vrsqrt.f32 %v444_v28  ;;  %v553_v38 = vsub.f32 %v537_v23, %v545_v29  ;;  %v5126_v41 = vmul.f32 0.03125, %v492_v32  ;;  %v538_v22 = vmul.f32 0.03125, %v524_v35 }
  0xc6   : > { %734 = vmatmul.mubr.f32.gmra.mrb[4].mxu0 %v483_v11  ;;  %3796 = vmatmul.mubr.f32.gmra.mrb[2].mxu1 %v484_v30  ;;  %v471_v12 = vmul.f32 %v5091_v37, %v457_v31 }
  0xc7   : > { %v4484_v13 = vpop.eup %4483  ;;  %739 = vmatprep.mubr.f32.mxu0 %v4771_v40  ;;  %v569_v45 = vadd.f32 1e-05, %v553_v38  ;;  %v546_v48 = vmul.f32 %v5126_v41, %v5126_v41  ;;  %v562_v9 = vsub.f32 %v4998_v5, %v5126_v41 }
  0xc8   : > { %v485_v50 = vadd.f32 %v5098_v49, %v471_v12  ;;  %v458_v51 = vmul.f32 %v4484_v13, %v434_v43  ;;  %v494_v53 = vpop.xlane.xlu0 %493  ;;  %v526_v54 = vpop.xlane.xlu1 %525 }
  0xc9   : > { %4489 = vrsqrt.f32 %v569_v45  ;;  %v554_v55 = vsub.f32 %v538_v22, %v546_v48  ;;  %v5135_v56 = vmul.f32 0.03125, %v494_v53  ;;  %v539_v34 = vmul.f32 0.03125, %v526_v54 }
  0xca   : > { %740 = vmatmul.mubr.f32.gmra.mrb[6].mxu0 %v484_v30  ;;  %3798 = vmatprep.mubr.f32.mxu1 %v485_v50  ;;  %v472_v59 = vmul.f32 %v5091_v37, %v458_v51 }
  0xcb   : > { %v4486_v60 = vpop.eup %4485  ;;  %745 = vmatprep.mubr.f32.mxu0 %v4771_v40  ;;  %v570_v61 = vadd.f32 1e-05, %v554_v55  ;;  %v547_v62 = vmul.f32 %v5135_v56, %v5135_v56  ;;  %v563_v41 = vsub.f32 %v5022_v21, %v5135_v56 }
  0xcc   : > { %v486_v63 = vadd.f32 %v5098_v49, %v472_v59  ;;  %v459_v0 = vmul.f32 %v4486_v60, %v435_v57  ;;  %v496_v1 = vpop.xlane.xlu0 %495  ;;  %v528_v4 = vpop.xlane.xlu1 %527 }
  0xcd   : > { %4491 = vrsqrt.f32 %v570_v61  ;;  %v555_v2 = vsub.f32 %v539_v34, %v547_v62  ;;  %v5144_v6 = vmul.f32 0.03125, %v496_v1  ;;  %v540_v52 = vmul.f32 0.03125, %v528_v4 }
  0xce   : > { %746 = vmatmul.mubr.f32.gmra.mrb[8].mxu0 %v485_v50  ;;  %3799 = vmatmul.mubr.f32.gmra.mrb[4].mxu1 %v486_v63  ;;  %v473_v8 = vmul.f32 %v5091_v37, %v459_v0 }
  0xcf   : > { %v4488_v10 = vpop.eup %4487  ;;  %751 = vmatprep.mubr.f32.mxu0 %v4771_v40  ;;  %v571_v11 = vadd.f32 1e-05, %v555_v2  ;;  %v548_v14 = vmul.f32 %v5144_v6, %v5144_v6  ;;  %v564_v21 = vsub.f32 %v5046_v33, %v5144_v6 }
  0xd0   : > { %v487_v17 = vadd.f32 %v5098_v49, %v473_v8  ;;  %v460_v19 = vmul.f32 %v4488_v10, %v436_v7  ;;  %v498_v23 = vpop.xlane.xlu0 %497  ;;  %v530_v24 = vpop.xlane.xlu1 %529 }
  0xd1   : > { %4493 = vrsqrt.f32 %v571_v11  ;;  %v556_v3 = vsub.f32 %v540_v52, %v548_v14  ;;  %v5155_v25 = vmul.f32 0.03125, %v498_v23  ;;  %v541_v26 = vmul.f32 0.03125, %v530_v24 }
  0xd2   : > { %752 = vmatmul.mubr.f32.gmra.mrb[10].mxu0 %v486_v63  ;;  %v474_v28 = vmul.f32 %v5091_v37, %v460_v19  ;;  %3801 = vmatprep.mubr.f32.mxu1 %v487_v17 }
  0xd3   : > { %v4490_v29 = vpop.eup %4489  ;;  %757 = vmatprep.mubr.f32.mxu0 %v4771_v40  ;;  %v572_v30 = vadd.f32 1e-05, %v556_v3  ;;  %v549_v58 = vmul.f32 %v5155_v25, %v5155_v25  ;;  %v565_v33 = vsub.f32 %v5055_v39, %v5155_v25 }
  0xd4   : > { %v488_v31 = vadd.f32 %v5098_v49, %v474_v28  ;;  %v500_v32 = vpop.xlane.xlu0 %499  ;;  %v532_v35 = vpop.xlane.xlu1 %531  ;;  %v585_v38 = vmul.f32 %v4490_v29, %v561_v15 }
  0xd5   : > { %4495 = vrsqrt.f32 %v572_v30  ;;  %v557_v22 = vsub.f32 %v541_v26, %v549_v58  ;;  %v5164_v43 = vmul.f32 0.03125, %v500_v32  ;;  %v542_v12 = vmul.f32 0.03125, %v532_v35 }
  0xd6   : > { %758 = vmatmul.mubr.f32.gmra.mrb[12].mxu0 %v487_v17  ;;  %3802 = vmatmul.mubr.f32.gmra.mrb[6].mxu1 %v488_v31  ;;  %v593_v13 = vmul.f32 %v5091_v37, %v585_v38 }
  0xd7   : > { %v4492_v45 = vpop.eup %4491  ;;  %763 = vmatprep.mubr.f32.mxu0 %v4771_v40  ;;  %v573_v48 = vadd.f32 1e-05, %v557_v22  ;;  %v550_v5 = vmul.f32 %v5164_v43, %v5164_v43  ;;  %v566_v24 = vsub.f32 %v5062_v42, %v5164_v43 }
  0xd8   : > { %v502_v50 = vpop.xlane.xlu0 %501  ;;  %v534_v51 = vpop.xlane.xlu1 %533  ;;  %v601_v53 = vadd.f32 %v5098_v49, %v593_v13  ;;  %v586_v54 = vmul.f32 %v4492_v45, %v562_v9 }
  0xd9   : > { %4497 = vrsqrt.f32 %v573_v48  ;;  %v558_v55 = vsub.f32 %v542_v12, %v550_v5  ;;  %v511_v34 = vmul.f32 0.03125, %v502_v50  ;;  %v543_v57 = vmul.f32 0.03125, %v534_v51 }
  0xda   : > { %764 = vmatmul.mubr.f32.gmra.mrb[14].mxu0 %v488_v31  ;;  %v594_v59 = vmul.f32 %v5091_v37, %v586_v54  ;;  %3804 = vmatprep.mubr.f32.mxu1 %v601_v53  ;;  %v947_v12 = vlaneseq }
  0xdb   : > { %v4494_v60 = vpop.eup %4493  ;;  %v574_v61 = vadd.f32 1e-05, %v558_v55  ;;  %v551_v62 = vmul.f32 %v511_v34, %v511_v34  ;;  %769 = vmatprep.mubr.f32.mxu0 %v4771_v40  ;;  %v567_v28 = vsub.f32 %v5068_v44, %v511_v34 }
  0xdc   : > { %v504_v56 = vpop.xlane.xlu0 %503  ;;  %v536_v63 = vpop.xlane.xlu1 %535  ;;  %v602_v0 = vadd.f32 %v5098_v49, %v594_v59  ;;  %v587_v1 = vmul.f32 %v4494_v60, %v563_v41  ;;  %v948_v13 = vand.u32 127, %v947_v12 }
  0xdd   : > { %4499 = vrsqrt.f32 %v574_v61  ;;  %v559_v4 = vsub.f32 %v543_v57, %v551_v62  ;;  %v512_v2 = vmul.f32 0.03125, %v504_v56  ;;  %v544_v52 = vmul.f32 0.03125, %v536_v63 }
  0xde   : > { %770 = vmatmul.mubr.f32.gmra.mrb[16].mxu0 %v601_v53  ;;  %v595_v7 = vmul.f32 %v5091_v37, %v587_v1  ;;  %3805 = vmatmul.mubr.f32.gmra.mrb[8].mxu1 %v602_v0  ;;  %vm1292_vm0 = vcmp.ge.s32.totalorder %v948_v13, 8  ;;  %vm1293_vm1 = vcmp.lt.s32.totalorder %v948_v13, 16  ;;  %vm2020_vm2 = vcmp.ge.s32.totalorder %v948_v13, 16 }
  0xdf   : > { %v4496_v8 = vpop.eup %4495  ;;  %v575_v10 = vadd.f32 1e-05, %v559_v4  ;;  %v552_v11 = vmul.f32 %v512_v2, %v512_v2  ;;  %774 = vmatprep.mubr.f32.mxu0 %v4771_v40  ;;  %v568_v9 = vsub.f32 %v5074_v46, %v512_v2  ;;  %vm2021_vm3 = vcmp.lt.s32.totalorder %v948_v13, 24  ;;  %vm1294_vm6 = vmand %vm1292_vm0, %vm1293_vm1 }
  0xe0   : > { %v603_v6 = vadd.f32 %v5098_v49, %v595_v7  ;;  %v588_v14 = vmul.f32 %v4496_v8, %v564_v21  ;;  %vm2571_vm4 = vcmp.ge.s32.totalorder %v948_v13, 24  ;;  %vm2572_vm5 = vcmp.lt.s32.totalorder %v948_v13, 32  ;;  %vm2022_vm7 = vmand %vm2020_vm2, %vm2021_vm3 }
  0xe1   : > { %4501 = vrsqrt.f32 %v575_v10  ;;  %v560_v15 = vsub.f32 %v544_v52, %v552_v11  ;;  %vm950_vm8 = vcmp.lt.s32.totalorder %v948_v13, 8  ;;  %vm2573_vm9 = vmand %vm2571_vm4, %vm2572_vm5  ;;  %v5209_v45 = vsel %vm1294_vm6, 1.0, %v4771_v40 }
  0xe2   : > { %775 = vmatmul.mubr.f32.gmra.mrb[18].mxu0 %v602_v0  ;;  %v596_v17 = vmul.f32 %v5091_v37, %v588_v14  ;;  %3807 = vmatprep.mubr.f32.mxu1 %v603_v6  ;;  %v5212_v48 = vsel %vm2022_vm7, 1.0, %v4771_v40  ;;  %v5215_v5 = vsel %vm2573_vm9, 1.0, %v4771_v40 }
  0xe3   : > { %v4498_v19 = vpop.eup %4497  ;;  %v576_v23 = vadd.f32 1e-05, %v560_v15  ;;  %779 = vmatprep.mubr.f32.mxu0 %v4771_v40 }
  0xe4   : > { %v604_v3 = vadd.f32 %v5098_v49, %v596_v17  ;;  %v589_v26 = vmul.f32 %v4498_v19, %v565_v33 }
  0xe5   : > { %4503 = vrsqrt.f32 %v576_v23 }
  0xe6   : > { %780 = vmatmul.mubr.f32.gmra.mrb[20].mxu0 %v603_v6  ;;  %v597_v39 = vmul.f32 %v5091_v37, %v589_v26  ;;  %3808 = vmatmul.mubr.f32.gmra.mrb[10].mxu1 %v604_v3 }
  0xe7   : > { %v4500_v25 = vpop.eup %4499  ;;  %784 = vmatprep.mubr.f32.mxu0 %v4771_v40 }
  0xe8   : > { %v605_v29 = vadd.f32 %v5098_v49, %v597_v39  ;;  %v590_v30 = vmul.f32 %v4500_v25, %v566_v24 }
  0xea   : > { %785 = vmatmul.mubr.f32.gmra.mrb[22].mxu0 %v604_v3  ;;  %v598_v58 = vmul.f32 %v5091_v37, %v590_v30  ;;  %3810 = vmatprep.mubr.f32.mxu1 %v605_v29 }
  0xeb   : > { %v4502_v42 = vpop.eup %4501  ;;  %789 = vmatprep.mubr.f32.mxu0 %v4771_v40 }
  0xec   : > { %v606_v31 = vadd.f32 %v5098_v49, %v598_v58  ;;  %v591_v32 = vmul.f32 %v4502_v42, %v567_v28 }
  0xee   : > { %790 = vmatmul.mubr.f32.gmra.mrb[24].mxu0 %v605_v29  ;;  %v599_v35 = vmul.f32 %v5091_v37, %v591_v32  ;;  %3811 = vmatmul.mubr.f32.gmra.mrb[12].mxu1 %v606_v31 }
  0xef   : > { %v4504_v44 = vpop.eup %4503  ;;  %794 = vmatprep.mubr.f32.mxu0 %v4771_v40 }
  0xf0   : > { %v607_v38 = vadd.f32 %v5098_v49, %v599_v35  ;;  %v592_v22 = vmul.f32 %v4504_v44, %v568_v9 }
  0xf2   : > { %795 = vmatmul.mubr.f32.gmra.mrb[26].mxu0 %v606_v31  ;;  %v600_v43 = vmul.f32 %v5091_v37, %v592_v22  ;;  %3813 = vmatprep.mubr.f32.mxu1 %v607_v38 }
  0xf3   : > { %799 = vmatprep.mubr.f32.mxu0 %v4771_v40 }
  0xf4   : > { %v608_v46 = vadd.f32 %v5098_v49, %v600_v43  ;;  %v5206_v49 = vsel %vm950_vm8, 1.0, %v4771_v40 }
  0xf6   : > { %800 = vmatmul.mubr.f32.gmra.mrb[28].mxu0 %v607_v38  ;;  %3814 = vmatmul.mubr.f32.gmra.mrb[14].mxu1 %v608_v46 }
  0xf7   : > { %804 = vmatprep.mubr.f32.mxu0 %v4771_v40 }
  0xfa   : > { %805 = vmatmul.mubr.f32.gmra.mrb[30].mxu0 %v608_v46 }
 0x191   : > { %v5203_v37 = vpop.f32.mrb[0].mxu0 }
 0x192   : > { %v725_v41 = vpop.f32.mrb[1].mxu0  ;;  %v3794_v50 = vpop.f32.mrb[0].mxu1  ;;  %3832 = vmatprep.mubr.f32.mxu1 %v5203_v37  ;;  %3872 = vmatprep.mubr.f32.mxu0 %v5203_v37 }
 0x193   : > { %v876_v51 = vpop.f32.mrb[1].mxu1  ;;  %v963_v53 = vmul.f32 %v3794_v50, %v5206_v49  ;;  %v1306_v54 = vmul.f32 %v3794_v50, %v5209_v45  ;;  %v2034_v55 = vmul.f32 %v3794_v50, %v5212_v48  ;;  %v2585_v34 = vmul.f32 %v3794_v50, %v5215_v5 }
 0x194   : > { %v962_v57 = vmul.f32 %v5206_v49, %v876_v51  ;;  %v1305_v40 = vmul.f32 %v5209_v45, %v876_v51  ;;  %v2033_v59 = vmul.f32 %v5212_v48, %v876_v51  ;;  %v2584_v60 = vmul.f32 %v5215_v5, %v876_v51 }
 0x195   : > { %v5227_v61 = vpop.f32.mrb[2].mxu0  ;;  %v954_v62 = vmul.f32 %v5206_v49, %v725_v41  ;;  %v1297_v21 = vmul.f32 %v5209_v45, %v725_v41  ;;  %v2025_v56 = vmul.f32 %v5212_v48, %v725_v41  ;;  %v2576_v63 = vmul.f32 %v5215_v5, %v725_v41 }
 0x196   : > { %v731_v0 = vpop.f32.mrb[3].mxu0  ;;  %v5237_v7 = vpack.c.bf16 %v1306_v54, %v1305_v40  ;;  %v5239_v8 = vpack.c.bf16 %v963_v53, %v962_v57  ;;  %v5241_v10 = vpack.c.bf16 %v2034_v55, %v2033_v59  ;;  %v5243_v11 = vpack.c.bf16 %v2585_v34, %v2584_v60 }
 0x197   : > { %v955_v1 = vmul.f32 %v5206_v49, %v731_v0  ;;  %v1298_v4 = vmul.f32 %v5209_v45, %v731_v0  ;;  %v2026_v2 = vmul.f32 %v5212_v48, %v731_v0  ;;  %v2577_v52 = vmul.f32 %v5215_v5, %v731_v0 }
 0x198   : > { %6345 = vst [vmem:[#allocation8_spill] sm:$0xff] %v5239_v8  ;;  %6346 = vst [vmem:[#allocation9_spill] sm:$0xff] %v5241_v10 }
 0x199   : > { %6347 = vst [vmem:[#allocation10_spill] sm:$0xff] %v5243_v11  ;;  %v5245_v33 = vpop.f32.mrb[4].mxu0  ;;  %v3797_v6 = vpop.f32.mrb[2].mxu1  ;;  %v4256_v14 = vpack.c.bf16 %v955_v1, %v954_v62  ;;  %v4272_v15 = vpack.c.bf16 %v1298_v4, %v1297_v21  ;;  %v5247_v17 = vpack.c.bf16 %v2026_v2, %v2025_v56  ;;  %v5249_v19 = vpack.c.bf16 %v2577_v52, %v2576_v63 }
 0x19a   : > { %v737_v23 = vpop.f32.mrb[5].mxu0  ;;  %v965_v24 = vmul.f32 %v3797_v6, %v5206_v49  ;;  %v1308_v3 = vmul.f32 %v3797_v6, %v5209_v45  ;;  %v2036_v26 = vmul.f32 %v3797_v6, %v5212_v48  ;;  %v2587_v39 = vmul.f32 %v3797_v6, %v5215_v5  ;;  %v886_v25 = vpop.f32.mrb[3].mxu1 }
 0x19b   : > { %v956_v28 = vmul.f32 %v5206_v49, %v737_v23  ;;  %4257 = vmatprep.subr.bf16.mxu1 %v4256_v14  ;;  %4273 = vmatprep.subr.bf16.mxu0 %v4272_v15  ;;  %v964_v29 = vmul.f32 %v5206_v49, %v886_v25  ;;  %v1307_v30 = vmul.f32 %v5209_v45, %v886_v25 }
 0x19c   : > { %v2035_v58 = vmul.f32 %v5212_v48, %v886_v25  ;;  %v2586_v42 = vmul.f32 %v5215_v5, %v886_v25  ;;  %v1299_v9 = vmul.f32 %v5209_v45, %v737_v23  ;;  %v2027_v31 = vmul.f32 %v5212_v48, %v737_v23  ;;  %4259 = vmatpush3.bf16.xpose.msra.mxu1 %v4256_v14 }
 0x19d   : > { %v2578_v32 = vmul.f32 %v5215_v5, %v737_v23  ;;  %4275 = vmatpush3.bf16.xpose.msra.mxu0 %v4272_v15  ;;  %v5263_v35 = vpop.f32.mrb[6].mxu0  ;;  %v5265_v38 = vpack.c.bf16 %v1308_v3, %v1307_v30  ;;  %v5267_v22 = vpack.c.bf16 %v965_v24, %v964_v29 }
 0x19e   : > { %v743_v44 = vpop.f32.mrb[7].mxu0  ;;  %v5269_v43 = vpack.c.bf16 %v2036_v26, %v2035_v58  ;;  %v5271_v46 = vpack.c.bf16 %v2587_v39, %v2586_v42 }
 0x19f   : > { %6348 = vst [vmem:[#allocation11_spill] sm:$0xff] %v5267_v22  ;;  %v957_v12 = vmul.f32 %v5206_v49, %v743_v44  ;;  %v1300_v13 = vmul.f32 %v5209_v45, %v743_v44  ;;  %v2028_v41 = vmul.f32 %v5212_v48, %v743_v44  ;;  %v2579_v50 = vmul.f32 %v5215_v5, %v743_v44 }
 0x1a0   : > { %6349 = vst [vmem:[#allocation12_spill] sm:$0xff] %v5269_v43  ;;  %6350 = vst [vmem:[#allocation13_spill] sm:$0xff] %v5271_v46 }
 0x1a1   : > { %v5277_v51 = vpop.f32.mrb[8].mxu0  ;;  %v4260_v53 = vpack.c.bf16 %v957_v12, %v956_v28  ;;  %v4276_v54 = vpack.c.bf16 %v1300_v13, %v1299_v9  ;;  %v3800_v55 = vpop.f32.mrb[4].mxu1  ;;  %v5279_v34 = vpack.c.bf16 %v2028_v41, %v2027_v31  ;;  %v5281_v57 = vpack.c.bf16 %v2579_v50, %v2578_v32 }
 0x1a2   : > { %v749_v40 = vpop.f32.mrb[9].mxu0  ;;  %v967_v59 = vmul.f32 %v3800_v55, %v5206_v49  ;;  %v1310_v60 = vmul.f32 %v3800_v55, %v5209_v45  ;;  %v2038_v62 = vmul.f32 %v3800_v55, %v5212_v48  ;;  %v2589_v21 = vmul.f32 %v3800_v55, %v5215_v5  ;;  %v896_v56 = vpop.f32.mrb[5].mxu1 }
 0x1a3   : > { %v958_v63 = vmul.f32 %v5206_v49, %v749_v40  ;;  %4261 = vmatprep.subr.bf16.mxu1 %v4260_v53  ;;  %4277 = vmatprep.subr.bf16.mxu0 %v4276_v54  ;;  %v966_v0 = vmul.f32 %v5206_v49, %v896_v56  ;;  %v1309_v1 = vmul.f32 %v5209_v45, %v896_v56 }
 0x1a4   : > { %v2037_v4 = vmul.f32 %v5212_v48, %v896_v56  ;;  %v2588_v2 = vmul.f32 %v5215_v5, %v896_v56  ;;  %v1301_v52 = vmul.f32 %v5209_v45, %v749_v40  ;;  %v2029_v6 = vmul.f32 %v5212_v48, %v749_v40  ;;  %4263 = vmatpush3.bf16.xpose.msra.mxu1 %v4260_v53 }
 0x1a5   : > { %v2580_v14 = vmul.f32 %v5215_v5, %v749_v40  ;;  %4279 = vmatpush3.bf16.xpose.msra.mxu0 %v4276_v54  ;;  %v5295_v15 = vpop.f32.mrb[10].mxu0  ;;  %v5297_v24 = vpack.c.bf16 %v1310_v60, %v1309_v1  ;;  %v5299_v3 = vpack.c.bf16 %v967_v59, %v966_v0 }
 0x1a6   : > { %v755_v23 = vpop.f32.mrb[11].mxu0  ;;  %v5301_v26 = vpack.c.bf16 %v2038_v62, %v2037_v4  ;;  %v5303_v39 = vpack.c.bf16 %v2589_v21, %v2588_v2 }
 0x1a7   : > { %6351 = vst [vmem:[#allocation14_spill] sm:$0xff] %v5299_v3  ;;  %v959_v25 = vmul.f32 %v5206_v49, %v755_v23  ;;  %v1302_v28 = vmul.f32 %v5209_v45, %v755_v23  ;;  %v2030_v29 = vmul.f32 %v5212_v48, %v755_v23  ;;  %v2581_v30 = vmul.f32 %v5215_v5, %v755_v23 }
 0x1a8   : > { %6352 = vst [vmem:[#allocation15_spill] sm:$0xff] %v5301_v26  ;;  %6353 = vst [vmem:[#allocation16_spill] sm:$0xff] %v5303_v39 }
 0x1a9   : > { %v5309_v58 = vpop.f32.mrb[12].mxu0  ;;  %v4264_v42 = vpack.c.bf16 %v959_v25, %v958_v63  ;;  %v4280_v9 = vpack.c.bf16 %v1302_v28, %v1301_v52  ;;  %v3803_v31 = vpop.f32.mrb[6].mxu1  ;;  %v5311_v32 = vpack.c.bf16 %v2030_v29, %v2029_v6  ;;  %v5313_v44 = vpack.c.bf16 %v2581_v30, %v2580_v14 }
 0x1aa   : > { %v761_v12 = vpop.f32.mrb[13].mxu0  ;;  %v969_v13 = vmul.f32 %v3803_v31, %v5206_v49  ;;  %v1312_v41 = vmul.f32 %v3803_v31, %v5209_v45  ;;  %v2040_v50 = vmul.f32 %v3803_v31, %v5212_v48  ;;  %v2591_v53 = vmul.f32 %v3803_v31, %v5215_v5  ;;  %v906_v54 = vpop.f32.mrb[7].mxu1 }
 0x1ab   : > { %4265 = vmatprep.subr.bf16.mxu1 %v4264_v42  ;;  %4281 = vmatprep.subr.bf16.mxu0 %v4280_v9  ;;  %v960_v55 = vmul.f32 %v5206_v49, %v761_v12  ;;  %v968_v40 = vmul.f32 %v5206_v49, %v906_v54  ;;  %v1311_v59 = vmul.f32 %v5209_v45, %v906_v54 }
 0x1ac   : > { %v2039_v60 = vmul.f32 %v5212_v48, %v906_v54  ;;  %v1303_v62 = vmul.f32 %v5209_v45, %v761_v12  ;;  %v2031_v21 = vmul.f32 %v5212_v48, %v761_v12  ;;  %4267 = vmatpush3.bf16.xpose.msra.mxu1 %v4264_v42  ;;  %v2590_v63 = vmul.f32 %v5215_v5, %v906_v54 }
 0x1ad   : > { %4283 = vmatpush3.bf16.xpose.msra.mxu0 %v4280_v9  ;;  %v5325_v56 = vpop.f32.mrb[14].mxu0  ;;  %v2582_v0 = vmul.f32 %v5215_v5, %v761_v12  ;;  %v5329_v4 = vpack.c.bf16 %v1312_v41, %v1311_v59  ;;  %v5331_v2 = vpack.c.bf16 %v969_v13, %v968_v40 }
 0x1ae   : > { %v767_v1 = vpop.f32.mrb[15].mxu0  ;;  %v5333_v52 = vpack.c.bf16 %v2040_v50, %v2039_v60  ;;  %v5339_v28 = vpack.c.bf16 %v2591_v53, %v2590_v63 }
 0x1af   : > { %6354 = vst [vmem:[#allocation17_spill] sm:$0xff] %v5331_v2  ;;  %v961_v6 = vmul.f32 %v5206_v49, %v767_v1  ;;  %v1304_v14 = vmul.f32 %v5209_v45, %v767_v1  ;;  %v2032_v23 = vmul.f32 %v5212_v48, %v767_v1  ;;  %v2583_v25 = vmul.f32 %v5215_v5, %v767_v1 }
 0x1b0   : > { %6355 = vst [vmem:[#allocation18_spill] sm:$0xff] %v5333_v52  ;;  %6356 = vst [vmem:[#allocation19_spill] sm:$0xff] %v5339_v28 }
 0x1b1   : > { %v4268_v29 = vpack.c.bf16 %v961_v6, %v960_v55  ;;  %v4284_v30 = vpack.c.bf16 %v1304_v14, %v1303_v62  ;;  %v5341_v42 = vpop.f32.mrb[16].mxu0  ;;  %v5343_v9 = vpack.c.bf16 %v2032_v23, %v2031_v21  ;;  %v3806_v31 = vpop.f32.mrb[8].mxu1  ;;  %v5345_v12 = vpack.c.bf16 %v2583_v25, %v2582_v0 }
 0x1b2   : > { %v773_v13 = vpop.f32.mrb[17].mxu0  ;;  %v916_v41 = vpop.f32.mrb[9].mxu1 }
 0x1b3   : > { %4269 = vmatprep.subr.bf16.mxu1 %v4268_v29  ;;  %4285 = vmatprep.subr.bf16.mxu0 %v4284_v30 }
 0x1b4   : > { %4271 = vmatpush3.bf16.xpose.msra.mxu1 %v4268_v29 }
 0x1b5   : > { %4287 = vmatpush3.bf16.xpose.msra.mxu0 %v4284_v30  ;;  %v5347_v49 = vpop.f32.mrb[18].mxu0  ;;  %4289 = vmatprep.subr.bf16.mxu1 %v5237_v7 }
 0x1b6   : > { %4321 = vmatprep.subr.bf16.mxu0 %v5247_v17  ;;  %v778_v45 = vpop.f32.mrb[19].mxu0 }
 0x1b9   : > { %v5351_v48 = vpop.f32.mrb[20].mxu0  ;;  %v3809_v5 = vpop.f32.mrb[10].mxu1 }
 0x1ba   : > { %v783_v50 = vpop.f32.mrb[21].mxu0  ;;  %v924_v53 = vpop.f32.mrb[11].mxu1 }
 0x1bb   : > { %3833 = vmatmul.mubr.f32.vlgmr.msra.gmra.mrb[16].mxu1 %v5227_v61 }
 0x1bc   : > { %3873 = vmatmul.mubr.f32.vlgmr.msra.gmra.mrb[32].mxu0 %v5227_v61  ;;  %3835 = vmatprep.mubr.f32.mxu1 %v5245_v33 }
 0x1bd   : > { %3875 = vmatprep.mubr.f32.mxu0 %v5245_v33  ;;  %v5357_v54 = vpop.f32.mrb[22].mxu0  ;;  %4291 = vmatpush3.bf16.msra.mxu1 %v5237_v7 }
 0x1be   : > { %4323 = vmatpush3.bf16.xpose.msra.mxu0 %v5247_v17  ;;  %v788_v55 = vpop.f32.mrb[23].mxu0  ;;  %4293 = vmatprep.subr.bf16.mxu1 %v5265_v38 }
 0x1bf   : > { %4325 = vmatprep.subr.bf16.mxu0 %v5279_v34  ;;  %3836 = vmatmul.mubr.f32.gmra.mrb[18].mxu1 %v5263_v35 }
 0x1c0   : > { %3876 = vmatmul.mubr.f32.gmra.mrb[34].mxu0 %v5263_v35  ;;  %3838 = vmatprep.mubr.f32.mxu1 %v5277_v51 }
 0x1c1   : > { %3878 = vmatprep.mubr.f32.mxu0 %v5277_v51  ;;  %v5367_v40 = vpop.f32.mrb[24].mxu0  ;;  %v3812_v59 = vpop.f32.mrb[12].mxu1  ;;  %4295 = vmatpush3.bf16.msra.mxu1 %v5265_v38 }
 0x1c2   : > { %v793_v7 = vpop.f32.mrb[25].mxu0  ;;  %v932_v17 = vpop.f32.mrb[13].mxu1  ;;  %4297 = vmatprep.subr.bf16.mxu1 %v5297_v24 }
 0x1c3   : > { %3839 = vmatmul.mubr.f32.gmra.mrb[20].mxu1 %v5295_v15 }
 0x1c4   : > { %3879 = vmatmul.mubr.f32.gmra.mrb[36].mxu0 %v5295_v15  ;;  %3841 = vmatprep.mubr.f32.mxu1 %v5309_v58 }
 0x1c5   : > { %3881 = vmatprep.mubr.f32.mxu0 %v5309_v58  ;;  %v5375_v60 = vpop.f32.mrb[26].mxu0  ;;  %4299 = vmatpush3.bf16.msra.mxu1 %v5297_v24 }
 0x1c6   : > { %4327 = vmatpush3.bf16.xpose.msra.mxu0 %v5279_v34  ;;  %v798_v62 = vpop.f32.mrb[27].mxu0  ;;  %4301 = vmatprep.subr.bf16.mxu1 %v5329_v4 }
 0x1c7   : > { %4329 = vmatprep.subr.bf16.mxu0 %v5311_v32  ;;  %3842 = vmatmul.mubr.f32.gmra.mrb[22].mxu1 %v5325_v56 }
 0x1c8   : > { %3882 = vmatmul.mubr.f32.gmra.mrb[38].mxu0 %v5325_v56  ;;  %3844 = vmatprep.mubr.f32.mxu1 %v5341_v42 }
 0x1c9   : > { %3884 = vmatprep.mubr.f32.mxu0 %v5341_v42  ;;  %v5384_v38 = vpop.f32.mrb[28].mxu0  ;;  %v3815_v21 = vpop.f32.mrb[14].mxu1  ;;  %4303 = vmatpush3.bf16.msra.mxu1 %v5329_v4 }
 0x1ca   : > { %v803_v24 = vpop.f32.mrb[29].mxu0  ;;  %v940_v34 = vpop.f32.mrb[15].mxu1  ;;  %4305 = vmatprep.subr.bf16.mxu1 %v5239_v8 }
 0x1cb   : > { %3845 = vmatmul.mubr.f32.gmra.mrb[24].mxu1 %v5347_v49 }
 0x1cc   : > { %3885 = vmatmul.mubr.f32.gmra.mrb[40].mxu0 %v5347_v49  ;;  %3847 = vmatprep.mubr.f32.mxu1 %v5351_v48 }
 0x1cd   : > { %3887 = vmatprep.mubr.f32.mxu0 %v5351_v48  ;;  %v806_v63 = vpop.f32.mrb[30].mxu0 }
 0x1ce   : > { %4331 = vmatpush3.bf16.xpose.msra.mxu0 %v5311_v32  ;;  %v808_v0 = vpop.f32.mrb[31].mxu0 }
 0x1cf   : > { %4333 = vmatprep.subr.bf16.mxu0 %v5343_v9  ;;  %3848 = vmatmul.mubr.f32.gmra.mrb[26].mxu1 %v5357_v54 }
 0x1d0   : > { %3888 = vmatmul.mubr.f32.gmra.mrb[42].mxu0 %v5357_v54  ;;  %3850 = vmatprep.mubr.f32.mxu1 %v5367_v40 }
 0x1d1   : > { %3890 = vmatprep.mubr.f32.mxu0 %v5367_v40 }
 0x1d3   : > { %3851 = vmatmul.mubr.f32.gmra.mrb[28].mxu1 %v5375_v60 }
 0x1d4   : > { %3891 = vmatmul.mubr.f32.gmra.mrb[44].mxu0 %v5375_v60  ;;  %3853 = vmatprep.mubr.f32.mxu1 %v5384_v38 }
 0x1d5   : > { %3893 = vmatprep.mubr.f32.mxu0 %v5384_v38 }
 0x1d6   : > { %4335 = vmatpush3.bf16.xpose.msra.mxu0 %v5343_v9 }
 0x1d7   : > { %4353 = vmatprep.subr.bf16.mxu0 %v5249_v19  ;;  %3854 = vmatmul.mubr.f32.gmra.mrb[30].mxu1 %v806_v63 }
 0x1d8   : > { %3894 = vmatmul.mubr.f32.gmra.mrb[46].mxu0 %v806_v63 }
 0x1d9   : > { %3992 = vmatprep.mubr.f32.mxu0 %v5203_v37 }
 0x1dd   : > { %3993 = vmatmul.mubr.f32.vlgmr.msra.gmra.mrb[48].mxu0 %v5227_v61 }
 0x1de   : > { %3995 = vmatprep.mubr.f32.mxu0 %v5245_v33  ;;  %4355 = vmatpush3.bf16.xpose.msra.mxu0 %v5249_v19 }
 0x1df   : > { %4357 = vmatprep.subr.bf16.mxu0 %v5281_v57 }
 0x1e1   : > { %3996 = vmatmul.mubr.f32.gmra.mrb[50].mxu0 %v5263_v35 }
 0x1e2   : > { %3998 = vmatprep.mubr.f32.mxu0 %v5277_v51 }
 0x1e5   : > { %3999 = vmatmul.mubr.f32.gmra.mrb[52].mxu0 %v5295_v15 }
 0x1e6   : > { %4001 = vmatprep.mubr.f32.mxu0 %v5309_v58  ;;  %4359 = vmatpush3.bf16.xpose.msra.mxu0 %v5281_v57 }
 0x1e7   : > { %4361 = vmatprep.subr.bf16.mxu0 %v5313_v44 }
 0x1e9   : > { %4002 = vmatmul.mubr.f32.gmra.mrb[54].mxu0 %v5325_v56 }
 0x1ea   : > { %4004 = vmatprep.mubr.f32.mxu0 %v5341_v42 }
 0x1ed   : > { %4005 = vmatmul.mubr.f32.gmra.mrb[56].mxu0 %v5347_v49 }
 0x1ee   : > { %4363 = vmatpush3.bf16.xpose.msra.mxu0 %v5313_v44  ;;  %4007 = vmatprep.mubr.f32.mxu0 %v5351_v48 }
 0x1ef   : > { %4365 = vmatprep.subr.bf16.mxu0 %v5345_v12 }
 0x1f1   : > { %4008 = vmatmul.mubr.f32.gmra.mrb[58].mxu0 %v5357_v54 }
 0x1f2   : > { %4010 = vmatprep.mubr.f32.mxu0 %v5367_v40 }
 0x1f5   : > { %4011 = vmatmul.mubr.f32.gmra.mrb[60].mxu0 %v5375_v60 }
 0x1f6   : > { %4367 = vmatpush3.bf16.xpose.msra.mxu0 %v5345_v12  ;;  %4013 = vmatprep.mubr.f32.mxu0 %v5384_v38 }
 0x1f9   : > { %4014 = vmatmul.mubr.f32.gmra.mrb[62].mxu0 %v806_v63 }
 0x1fa   : > { %4072 = vmatprep.mubr.f32.mxu0 %v5203_v37 }
 0x1fd   : > { %4073 = vmatmul.mubr.f32.vlgmr.msra.gmra.mrb[64].mxu0 %v5227_v61 }
 0x1fe   : > { %4075 = vmatprep.mubr.f32.mxu0 %v5245_v33 }
 0x201   : > { %4076 = vmatmul.mubr.f32.gmra.mrb[66].mxu0 %v5263_v35 }
 0x202   : > { %4078 = vmatprep.mubr.f32.mxu0 %v5277_v51 }
 0x205   : > { %4079 = vmatmul.mubr.f32.gmra.mrb[68].mxu0 %v5295_v15 }
 0x206   : > { %4081 = vmatprep.mubr.f32.mxu0 %v5309_v58 }
 0x209   : > { %4082 = vmatmul.mubr.f32.gmra.mrb[70].mxu0 %v5325_v56 }
 0x20a   : > { %4084 = vmatprep.mubr.f32.mxu0 %v5341_v42 }
 0x20d   : > { %4085 = vmatmul.mubr.f32.gmra.mrb[72].mxu0 %v5347_v49 }
 0x20e   : > { %4087 = vmatprep.mubr.f32.mxu0 %v5351_v48 }
 0x211   : > { %4088 = vmatmul.mubr.f32.gmra.mrb[74].mxu0 %v5357_v54 }
 0x212   : > { %4090 = vmatprep.mubr.f32.mxu0 %v5367_v40 }
 0x215   : > { %4091 = vmatmul.mubr.f32.gmra.mrb[76].mxu0 %v5375_v60 }
 0x216   : > { %4093 = vmatprep.mubr.f32.mxu0 %v5384_v38 }
 0x219   : > { %4094 = vmatmul.mubr.f32.gmra.mrb[78].mxu0 %v806_v63 }
 0x28e   : > { %v5442_v37 = vpop.f32.mrb[16].mxu1 }
 0x28f   : > { %v5444_v61 = vpop.f32.mrb[32].mxu0  ;;  %v5446_v33 = vpop.f32.mrb[17].mxu1  ;;  %v1119_v44 = vsel %vm1115_vm10, %v5442_v37, -inf }
 0x290   : > { %v5448_v19 = vpop.f32.mrb[33].mxu0  ;;  %v1461_v35 = vsel %vm1115_vm10, %v5444_v61, -inf  ;;  %v1116_v56 = vsel %vm1115_vm10, %v5446_v33, -inf }
 0x291   : > { %1462 = vmax.xlane.f32.xlu1 %v1461_v35  ;;  %v1458_v51 = vsel %vm1115_vm10, %v5448_v19, -inf }
 0x292   : > { %1459 = vmax.xlane.f32.xlu0 %v1458_v51  ;;  %v5454_v57 = vpop.f32.mrb[18].mxu1 }
 0x293   : > { %v5456_v15 = vpop.f32.mrb[34].mxu0  ;;  %v5458_v58 = vpop.f32.mrb[19].mxu1  ;;  %v1125_v31 = vsel %vm1115_vm10, %v5454_v57, -inf }
 0x294   : > { %v5460_v32 = vpop.f32.mrb[35].mxu0  ;;  %v1467_v23 = vsel %vm1115_vm10, %v5456_v15, -inf  ;;  %v1122_v12 = vsel %vm1115_vm10, %v5458_v58, -inf }
 0x295   : > { %1120 = vmax.xlane.f32.xlu1 %v1119_v44  ;;  %v1464_v25 = vsel %vm1115_vm10, %v5460_v32, -inf }
 0x296   : > { %1117 = vmax.xlane.f32.xlu0 %v1116_v56  ;;  %v5466_v1 = vpop.f32.mrb[20].mxu1 }
 0x297   : > { %v5468_v4 = vpop.f32.mrb[36].mxu0  ;;  %v5470_v6 = vpop.f32.mrb[21].mxu1  ;;  %v1131_v54 = vsel %vm1115_vm10, %v5466_v1, -inf }
 0x298   : > { %v5472_v14 = vpop.f32.mrb[37].mxu0  ;;  %v1473_v49 = vsel %vm1115_vm10, %v5468_v4, -inf  ;;  %v1128_v59 = vsel %vm1115_vm10, %v5470_v6, -inf }
 0x299   : > { %1468 = vmax.xlane.f32.xlu1 %v1467_v23  ;;  %v1470_v5 = vsel %vm1115_vm10, %v5472_v14, -inf }
 0x29a   : > { %1465 = vmax.xlane.f32.xlu0 %v1464_v25  ;;  %v5478_v29 = vpop.f32.mrb[22].mxu1 }
 0x29b   : > { %v5480_v30 = vpop.f32.mrb[38].mxu0  ;;  %v5482_v42 = vpop.f32.mrb[23].mxu1  ;;  %v1137_v63 = vsel %vm1115_vm10, %v5478_v29, -inf }
 0x29c   : > { %v5484_v9 = vpop.f32.mrb[39].mxu0  ;;  %v1479_v60 = vsel %vm1115_vm10, %v5480_v30, -inf  ;;  %v1134_v51 = vsel %vm1115_vm10, %v5482_v42, -inf }
 0x29d   : > { %1126 = vmax.xlane.f32.xlu1 %v1125_v31  ;;  %v1476_v21 = vsel %vm1115_vm10, %v5484_v9, -inf }
 0x29e   : > { %1123 = vmax.xlane.f32.xlu0 %v1122_v12  ;;  %v5492_v41 = vpop.f32.mrb[24].mxu1 }
 0x29f   : > { %v5490_v13 = vpop.f32.mrb[40].mxu0  ;;  %v5498_v48 = vpop.f32.mrb[25].mxu1  ;;  %v1143_v12 = vsel %vm1115_vm10, %v5492_v41, -inf }
 0x2a0   : > { %v5496_v45 = vpop.f32.mrb[41].mxu0  ;;  %v1485_v56 = vsel %vm1115_vm10, %v5490_v13, -inf }
 0x2a1   : > { %1474 = vmax.xlane.f32.xlu1 %v1473_v49  ;;  %v1482_v25 = vsel %vm1115_vm10, %v5496_v45, -inf }
 0x2a2   : > { %1471 = vmax.xlane.f32.xlu0 %v1470_v5  ;;  %v5504_v53 = vpop.f32.mrb[26].mxu1  ;;  %v1140_v5 = vsel %vm1115_vm10, %v5498_v48, -inf }
 0x2a3   : > { %v5502_v50 = vpop.f32.mrb[42].mxu0  ;;  %v5510_v40 = vpop.f32.mrb[27].mxu1 }
 0x2a4   : > { %v5508_v55 = vpop.f32.mrb[43].mxu0 }
 0x2a5   : > { %1132 = vmax.xlane.f32.xlu1 %v1131_v54 }
 0x2a6   : > { %1129 = vmax.xlane.f32.xlu0 %v1128_v59  ;;  %v5516_v17 = vpop.f32.mrb[28].mxu1  ;;  %v1491_v59 = vsel %vm1115_vm10, %v5502_v50, -inf }
 0x2a7   : > { %v5514_v7 = vpop.f32.mrb[44].mxu0  ;;  %v5522_v38 = vpop.f32.mrb[29].mxu1  ;;  %v1155_v36 = vsel %vm1115_vm10, %v5516_v17, -inf }
 0x2a8   : > { %v5520_v62 = vpop.f32.mrb[45].mxu0 }
 0x2a9   : > { %1480 = vmax.xlane.f32.xlu1 %v1479_v60 }
 0x2aa   : > { %1477 = vmax.xlane.f32.xlu0 %v1476_v21  ;;  %v5528_v34 = vpop.f32.mrb[30].mxu1  ;;  %v1488_v21 = vsel %vm1115_vm10, %v5508_v55, -inf }
 0x2ab   : > { %v5526_v24 = vpop.f32.mrb[46].mxu0  ;;  %v5534_v35 = vpop.f32.mrb[31].mxu1 }
 0x2ac   : > { %v5532_v0 = vpop.f32.mrb[47].mxu0 }
 0x2ad   : > { %1138 = vmax.xlane.f32.xlu1 %v1137_v63 }
 0x2ae   : > { %1135 = vmax.xlane.f32.xlu0 %v1134_v51  ;;  %v1149_v51 = vsel %vm1115_vm10, %v5504_v53, -inf }
 0x2b0   : > { %v5538_v44 = vpop.f32.mrb[48].mxu0 }
 0x2b1   : > { %v5542_v23 = vpop.f32.mrb[49].mxu0  ;;  %1486 = vmax.xlane.f32.xlu1 %v1485_v56 }
 0x2b2   : > { %1483 = vmax.xlane.f32.xlu0 %v1482_v25  ;;  %v1146_v25 = vsel %vm1115_vm10, %v5510_v40, -inf }
 0x2b4   : > { %v5546_v31 = vpop.f32.mrb[50].mxu0 }
 0x2b5   : > { %v5550_v49 = vpop.f32.mrb[51].mxu0  ;;  %1144 = vmax.xlane.f32.xlu1 %v1143_v12  ;;  %v1497_v12 = vsel %vm1115_vm10, %v5514_v7, -inf }
 0x2b6   : > { %6357 = vst [vmem:[#allocation20_spill] sm:$0xff] %v5550_v49  ;;  %1141 = vmax.xlane.f32.xlu0 %v1140_v5 }
 0x2b8   : > { %v5554_v54 = vpop.f32.mrb[52].mxu0 }
 0x2b9   : > { %v5558_v60 = vpop.f32.mrb[53].mxu0  ;;  %1492 = vmax.xlane.f32.xlu1 %v1491_v59  ;;  %v1494_v59 = vsel %vm1115_vm10, %v5520_v62, -inf }
 0x2ba   : > { %6358 = vst [vmem:[#allocation21_spill] sm:$0xff] %v5558_v60  ;;  %1489 = vmax.xlane.f32.xlu0 %v1488_v21 }
 0x2bc   : > { %v5562_v63 = vpop.f32.mrb[54].mxu0 }
 0x2bd   : > { %v5566_v56 = vpop.f32.mrb[55].mxu0  ;;  %1150 = vmax.xlane.f32.xlu1 %v1149_v51 }
 0x2be   : > { %6359 = vst [vmem:[#allocation22_spill] sm:$0xff] %v5566_v56  ;;  %1147 = vmax.xlane.f32.xlu0 %v1146_v25  ;;  %v1152_v25 = vsel %vm1115_vm10, %v5522_v38, -inf }
 0x2c0   : > { %v5572_v5 = vpop.f32.mrb[56].mxu0 }
 0x2c1   : > { %1498 = vmax.xlane.f32.xlu1 %v1497_v12  ;;  %v5576_v21 = vpop.f32.mrb[57].mxu0  ;;  %v1503_v12 = vsel %vm1115_vm10, %v5526_v24, -inf }
 0x2c2   : > { %6360 = vst [vmem:[#allocation23_spill] sm:$0xff] %v5576_v21  ;;  %1495 = vmax.xlane.f32.xlu0 %v1494_v59  ;;  %v1500_v59 = vsel %vm1115_vm10, %v5532_v0, -inf }
 0x2c4   : > { %v5580_v51 = vpop.f32.mrb[58].mxu0 }
 0x2c5   : > { %1156 = vmax.xlane.f32.xlu1 %v1155_v36  ;;  %v5584_v47 = vpop.f32.mrb[59].mxu0  ;;  %v1161_v36 = vsel %vm1115_vm10, %v5528_v34, -inf }
 0x2c6   : > { %6361 = vst [vmem:[#allocation24_spill] sm:$0xff] %v5584_v47  ;;  %1153 = vmax.xlane.f32.xlu0 %v1152_v25  ;;  %v1158_v25 = vsel %vm1115_vm10, %v5534_v35, -inf }
 0x2c8   : > { %v5588_v20 = vpop.f32.mrb[60].mxu0 }
 0x2c9   : > { %1504 = vmax.xlane.f32.xlu1 %v1503_v12  ;;  %v5592_v27 = vpop.f32.mrb[61].mxu0  ;;  %v2189_v12 = vsel %vm1115_vm10, %v5538_v44, -inf }
 0x2ca   : > { %6362 = vst [vmem:[#allocation25_spill] sm:$0xff] %v5592_v27  ;;  %1501 = vmax.xlane.f32.xlu0 %v1500_v59  ;;  %v2186_v59 = vsel %vm1115_vm10, %v5542_v23, -inf }
 0x2cc   : > { %v5596_v16 = vpop.f32.mrb[62].mxu0 }
 0x2cd   : > { %1162 = vmax.xlane.f32.xlu1 %v1161_v36  ;;  %v5598_v18 = vpop.f32.mrb[63].mxu0  ;;  %v2195_v36 = vsel %vm1115_vm10, %v5546_v31, -inf }
 0x2ce   : > { %1159 = vmax.xlane.f32.xlu0 %v1158_v25  ;;  %v2192_v25 = vsel %vm1115_vm10, %v5550_v49, -inf }
 0x2d0   : > { %v5602_v28 = vpop.f32.mrb[64].mxu0 }
 0x2d1   : > { %v5606_v39 = vpop.f32.mrb[65].mxu0  ;;  %2190 = vmax.xlane.f32.xlu1 %v2189_v12  ;;  %v2201_v12 = vsel %vm1115_vm10, %v5554_v54, -inf }
 0x2d2   : > { %6363 = vst [vmem:[#allocation26_spill] sm:$0xff] %v5606_v39  ;;  %2187 = vmax.xlane.f32.xlu0 %v2186_v59  ;;  %v2198_v59 = vsel %vm1115_vm10, %v5558_v60, -inf }
 0x2d4   : > { %v5610_v46 = vpop.f32.mrb[66].mxu0 }
 0x2d5   : > { %v5614_v11 = vpop.f32.mrb[67].mxu0  ;;  %2196 = vmax.xlane.f32.xlu1 %v2195_v36  ;;  %v2207_v36 = vsel %vm1115_vm10, %v5562_v63, -inf }
 0x2d6   : > { %6364 = vst [vmem:[#allocation27_spill] sm:$0xff] %v5614_v11  ;;  %2193 = vmax.xlane.f32.xlu0 %v2192_v25  ;;  %v2204_v25 = vsel %vm1115_vm10, %v5566_v56, -inf }
 0x2d8   : > { %v5618_v52 = vpop.f32.mrb[68].mxu0 }
 0x2d9   : > { %v5622_v26 = vpop.f32.mrb[69].mxu0  ;;  %2202 = vmax.xlane.f32.xlu1 %v2201_v12  ;;  %v2213_v12 = vsel %vm1115_vm10, %v5572_v5, -inf }
 0x2da   : > { %6365 = vst [vmem:[#allocation28_spill] sm:$0xff] %v5622_v26  ;;  %2199 = vmax.xlane.f32.xlu0 %v2198_v59  ;;  %v2210_v59 = vsel %vm1115_vm10, %v5576_v21, -inf  ;;  %v2222_v21 = vsel %vm1115_vm10, %v5592_v27, -inf  ;;  %v2746_v27 = vsel %vm1115_vm10, %v5610_v46, -inf }
 0x2dc   : > { %v5626_v43 = vpop.f32.mrb[70].mxu0 }
 0x2dd   : > { %v5630_v10 = vpop.f32.mrb[71].mxu0  ;;  %2208 = vmax.xlane.f32.xlu1 %v2207_v36  ;;  %v2219_v36 = vsel %vm1115_vm10, %v5580_v51, -inf }
 0x2de   : > { %6366 = vst [vmem:[#allocation29_spill] sm:$0xff] %v5630_v10  ;;  %2205 = vmax.xlane.f32.xlu0 %v2204_v25  ;;  %v2216_v25 = vsel %vm1115_vm10, %v5584_v47, -inf  ;;  %v2740_v47 = vsel %vm1115_vm10, %v5602_v28, -inf }
 0x2e0   : > { %v5634_v2 = vpop.f32.mrb[72].mxu0 }
 0x2e1   : > { %6367 = vst [vmem:[#allocation30_spill] sm:$0xff] %v5634_v2  ;;  %v5638_v3 = vpop.f32.mrb[73].mxu0  ;;  %2214 = vmax.xlane.f32.xlu1 %v2213_v12  ;;  %v2225_v12 = vsel %vm1115_vm10, %v5588_v20, -inf }
 0x2e2   : > { %6368 = vst [vmem:[#allocation31_spill] sm:$0xff] %v5638_v3  ;;  %2211 = vmax.xlane.f32.xlu0 %v2210_v59 }
 0x2e4   : > { %v5642_v22 = vpop.f32.mrb[74].mxu0 }
 0x2e5   : > { %6369 = vst [vmem:[#allocation32_spill] sm:$0xff] %v5642_v22  ;;  %v5646_v8 = vpop.f32.mrb[75].mxu0  ;;  %2220 = vmax.xlane.f32.xlu1 %v2219_v36  ;;  %v2231_v36 = vsel %vm1115_vm10, %v5596_v16, -inf }
 0x2e6   : > { %2217 = vmax.xlane.f32.xlu0 %v2216_v25  ;;  %v2228_v25 = vsel %vm1115_vm10, %v5598_v18, -inf }
 0x2e8   : > { %v5650_v56 = vpop.f32.mrb[76].mxu0 }
 0x2e9   : > { %v5654_v60 = vpop.f32.mrb[77].mxu0  ;;  %2226 = vmax.xlane.f32.xlu1 %v2225_v12  ;;  %v2737_v12 = vsel %vm1115_vm10, %v5606_v39, -inf }
 0x2ec   : > { %v5656_v59 = vpop.f32.mrb[78].mxu0 }
 0x2ed   : > { %v5660_v49 = vpop.f32.mrb[79].mxu0  ;;  %2223 = vmax.xlane.f32.xlu1 %v2222_v21  ;;  %v2743_v21 = vsel %vm1115_vm10, %v5614_v11, -inf  ;;  %v2770_v11 = vsel %vm1115_vm10, %v5642_v22, -inf }
 0x2f1   : > { %2232 = vmax.xlane.f32.xlu1 %v2231_v36  ;;  %v2752_v36 = vsel %vm1115_vm10, %v5618_v52, -inf }
 0x2f5   : > { %2229 = vmax.xlane.f32.xlu1 %v2228_v25  ;;  %v2749_v25 = vsel %vm1115_vm10, %v5622_v26, -inf }
 0x2f9   : > { %2741 = vmax.xlane.f32.xlu1 %v2740_v47  ;;  %v2758_v47 = vsel %vm1115_vm10, %v5626_v43, -inf }
 0x2fd   : > { %2738 = vmax.xlane.f32.xlu1 %v2737_v12  ;;  %v2755_v12 = vsel %vm1115_vm10, %v5630_v10, -inf }
 0x301   : > { %2747 = vmax.xlane.f32.xlu1 %v2746_v27  ;;  %v2764_v27 = vsel %vm1115_vm10, %v5634_v2, -inf }
 0x305   : > { %2744 = vmax.xlane.f32.xlu1 %v2743_v21  ;;  %v2761_v21 = vsel %vm1115_vm10, %v5638_v3, -inf  ;;  %v2767_v3 = vsel %vm1115_vm10, %v5646_v8, -inf }
 0x309   : > { %2753 = vmax.xlane.f32.xlu1 %v2752_v36 }
 0x30d   : > { %2750 = vmax.xlane.f32.xlu1 %v2749_v25 }
 0x311   : > { %2759 = vmax.xlane.f32.xlu1 %v2758_v47 }
 0x315   : > { %2756 = vmax.xlane.f32.xlu1 %v2755_v12 }
 0x319   : > { %2765 = vmax.xlane.f32.xlu1 %v2764_v27 }
 0x31d   : > { %2762 = vmax.xlane.f32.xlu1 %v2761_v21 }
 0x31e   : > { %v1463_v36 = vpop.xlane.xlu1 %1462 }
 0x31f   : > { %v1507_v26 = vsub.f32 %v5444_v61, %v1463_v36  ;;  %v1460_v25 = vpop.xlane.xlu0 %1459 }
 0x320   : > { %v1506_v39 = vsub.f32 %v5448_v19, %v1460_v25 }
 0x321   : > { %v1524_v47 = vmul.f32 1.442695, %v1507_v26  ;;  %2771 = vmax.xlane.f32.xlu1 %v2770_v11  ;;  %v2776_v26 = vsel %vm1115_vm10, %v5650_v56, -inf }
 0x322   : > { %v1121_v12 = vpop.xlane.xlu1 %1120  ;;  %v1522_v21 = vmul.f32 1.442695, %v1506_v39 }
 0x323   : > { %4505 = vpow2.f32 %v1524_v47  ;;  %v1165_v10 = vsub.f32 %v5442_v37, %v1121_v12  ;;  %v1118_v27 = vpop.xlane.xlu0 %1117  ;;  %v2779_v12 = vsel %vm1115_vm10, %v5660_v49, -inf }
 0x324   : > { %v1164_v61 = vsub.f32 %v5446_v33, %v1118_v27 }
 0x325   : > { %v1182_v2 = vmul.f32 1.442695, %v1165_v10  ;;  %2768 = vmax.xlane.f32.xlu1 %v2767_v3  ;;  %v2773_v10 = vsel %vm1115_vm10, %v5654_v60, -inf }
 0x326   : > { %v1469_v36 = vpop.xlane.xlu1 %1468  ;;  %v1180_v11 = vmul.f32 1.442695, %v1164_v61 }
 0x327   : > { %4507 = vpow2.f32 %v1182_v2  ;;  %v1466_v22 = vpop.xlane.xlu0 %1465  ;;  %v1509_v19 = vsub.f32 %v5456_v15, %v1469_v36 }
 0x328   : > { %4509 = vpow2.f32 %v1522_v21  ;;  %v1508_v2 = vsub.f32 %v5460_v32, %v1466_v22 }
 0x329   : > { %2777 = vmax.xlane.f32.xlu1 %v2776_v26  ;;  %4511 = vpow2.f32 %v1180_v11  ;;  %v1528_v3 = vmul.f32 1.442695, %v1509_v19  ;;  %v2782_v19 = vsel %vm1115_vm10, %v5656_v59, -inf }
 0x32a   : > { %v5697_v37 = vpop.xlane.xlu1 %1126  ;;  %v1526_v21 = vmul.f32 1.442695, %v1508_v2 }
 0x32b   : > { %v5699_v25 = vpop.xlane.xlu0 %1123  ;;  %4513 = vpow2.f32 %v1528_v3 }
 0x32c   : > { %4515 = vpow2.f32 %v1526_v21 }
 0x32d   : > { %v5703_v39 = vpop.eup %4505  ;;  %2774 = vmax.xlane.f32.xlu1 %v2773_v10 }
 0x32e   : > { %v1475_v33 = vpop.xlane.xlu1 %1474  ;;  %v1557_v47 = vsel %vm1115_vm10, %v5703_v39, 0.0 }
 0x32f   : > { %v1472_v15 = vpop.xlane.xlu0 %1471  ;;  %1558 = vadd.xlane.f32.xlu0 %v1557_v47  ;;  %v1511_v61 = vsub.f32 %v5468_v4, %v1475_v33 }
 0x330   : > { %v1510_v3 = vsub.f32 %v5472_v14, %v1472_v15 }
 0x331   : > { %v5710_v27 = vpop.eup %4507  ;;  %2780 = vmax.xlane.f32.xlu1 %v2779_v12  ;;  %v1532_v10 = vmul.f32 1.442695, %v1511_v61 }
 0x332   : > { %6370 = vst [vmem:[#allocation33_spill] sm:$0xff] %v5710_v27  ;;  %v1133_v36 = vpop.xlane.xlu1 %1132  ;;  %v1215_v22 = vsel %vm1115_vm10, %v5710_v27, 0.0  ;;  %v5715_v32 = vpop.eup %4509  ;;  %v1530_v12 = vmul.f32 1.442695, %v1510_v3 }
 0x333   : > { %v1169_v26 = vsub.f32 %v5466_v1, %v1133_v36  ;;  %v5718_v11 = vpop.xlane.xlu0 %1129  ;;  %1216 = vadd.xlane.f32.xlu0 %v1215_v22  ;;  %v1554_v33 = vsel %vm1115_vm10, %v5715_v32, 0.0  ;;  %v5725_v47 = vpop.eup %4511 }
 0x334   : > { %v1212_v21 = vsel %vm1115_vm10, %v5725_v47, 0.0 }
 0x335   : > { %v1190_v4 = vmul.f32 1.442695, %v1169_v26  ;;  %2783 = vmax.xlane.f32.xlu1 %v2782_v19  ;;  %v5730_v14 = vpop.eup %4513 }
 0x336   : > { %v1481_v2 = vpop.xlane.xlu1 %1480  ;;  %v5738_v3 = vpop.eup %4515 }
 0x337   : > { %4517 = vpow2.f32 %v1190_v4  ;;  %v1478_v1 = vpop.xlane.xlu0 %1477  ;;  %1555 = vadd.xlane.f32.xlu0 %v1554_v33  ;;  %v1513_v36 = vsub.f32 %v5480_v30, %v1481_v2  ;;  %v1563_v30 = vsel %vm1115_vm10, %v5730_v14, 0.0 }
 0x338   : > { %4519 = vpow2.f32 %v1532_v10  ;;  %v1512_v19 = vsub.f32 %v5484_v9, %v1478_v1  ;;  %v1560_v1 = vsel %vm1115_vm10, %v5738_v3, 0.0 }
 0x339   : > { %4521 = vpow2.f32 %v1530_v12  ;;  %v1536_v26 = vmul.f32 1.442695, %v1513_v36 }
 0x33a   : > { %v1139_v22 = vpop.xlane.xlu1 %1138 }
 0x33b   : > { %v1171_v15 = vsub.f32 %v5478_v29, %v1139_v22  ;;  %v5733_v61 = vpop.xlane.xlu0 %1135  ;;  %1213 = vadd.xlane.f32.xlu0 %v1212_v21  ;;  %v1534_v29 = vmul.f32 1.442695, %v1512_v19 }
 0x33d   : > { %v1194_v4 = vmul.f32 1.442695, %v1171_v15 }
 0x33e   : > { %v1487_v10 = vpop.xlane.xlu1 %1486 }
 0x33f   : > { %4523 = vpow2.f32 %v1194_v4  ;;  %v1484_v2 = vpop.xlane.xlu0 %1483  ;;  %1564 = vadd.xlane.f32.xlu0 %v1563_v30  ;;  %v1515_v22 = vsub.f32 %v5490_v13, %v1487_v10 }
 0x340   : > { %4525 = vpow2.f32 %v1536_v26  ;;  %v1514_v19 = vsub.f32 %v5496_v45, %v1484_v2 }
 0x341   : > { %v5740_v33 = vpop.eup %4517  ;;  %4527 = vpow2.f32 %v1534_v29  ;;  %v1540_v26 = vmul.f32 1.442695, %v1515_v22 }
 0x342   : > { %6371 = vst [vmem:[#allocation34_spill] sm:$0xff] %v5740_v33  ;;  %v1145_v12 = vpop.xlane.xlu1 %1144  ;;  %v1227_v9 = vsel %vm1115_vm10, %v5740_v33, 0.0  ;;  %v5747_v36 = vpop.eup %4519 }
 0x343   : > { %v1173_v21 = vsub.f32 %v5492_v41, %v1145_v12  ;;  %v5750_v15 = vpop.xlane.xlu0 %1141  ;;  %1228 = vadd.xlane.f32.xlu1 %v1227_v9  ;;  %1561 = vadd.xlane.f32.xlu0 %v1560_v1  ;;  %v1569_v10 = vsel %vm1115_vm10, %v5747_v36, 0.0  ;;  %v5755_v30 = vpop.eup %4521  ;;  %v1538_v41 = vmul.f32 1.442695, %v1514_v19 }
 0x344   : > { %v1566_v2 = vsel %vm1115_vm10, %v5755_v30, 0.0 }
 0x345   : > { %v1198_v13 = vmul.f32 1.442695, %v1173_v21 }
 0x346   : > { %v1493_v4 = vpop.xlane.xlu1 %1492 }
 0x347   : > { %4529 = vpow2.f32 %v1198_v13  ;;  %v1490_v33 = vpop.xlane.xlu0 %1489  ;;  %1570 = vadd.xlane.f32.xlu0 %v1569_v10  ;;  %v1517_v12 = vsub.f32 %v5502_v50, %v1493_v4 }
 0x348   : > { %4531 = vpow2.f32 %v1540_v26  ;;  %v1516_v26 = vsub.f32 %v5508_v55, %v1490_v33 }
 0x349   : > { %v5757_v27 = vpop.eup %4523  ;;  %4533 = vpow2.f32 %v1538_v41  ;;  %v1544_v21 = vmul.f32 1.442695, %v1517_v12 }
 0x34a   : > { %6372 = vst [vmem:[#allocation35_spill] sm:$0xff] %v5757_v27  ;;  %v1151_v29 = vpop.xlane.xlu1 %1150  ;;  %v1233_v45 = vsel %vm1115_vm10, %v5757_v27, 0.0  ;;  %v5764_v22 = vpop.eup %4525 }
 0x34b   : > { %v1175_v9 = vsub.f32 %v5504_v53, %v1151_v29  ;;  %v5767_v1 = vpop.xlane.xlu0 %1147  ;;  %1234 = vadd.xlane.f32.xlu1 %v1233_v45  ;;  %1567 = vadd.xlane.f32.xlu0 %v1566_v2  ;;  %v1575_v13 = vsel %vm1115_vm10, %v5764_v22, 0.0  ;;  %v5772_v4 = vpop.eup %4527  ;;  %v1542_v53 = vmul.f32 1.442695, %v1516_v26 }
 0x34c   : > { %v1572_v33 = vsel %vm1115_vm10, %v5772_v4, 0.0 }
 0x34d   : > { %v1202_v50 = vmul.f32 1.442695, %v1175_v9 }
 0x34e   : > { %v1499_v19 = vpop.xlane.xlu1 %1498 }
 0x34f   : > { %4535 = vpow2.f32 %v1202_v50  ;;  %v1496_v10 = vpop.xlane.xlu0 %1495  ;;  %1576 = vadd.xlane.f32.xlu0 %v1575_v13  ;;  %v1519_v29 = vsub.f32 %v5514_v7, %v1499_v19 }
 0x350   : > { %4537 = vpow2.f32 %v1544_v21  ;;  %v1518_v21 = vsub.f32 %v5520_v62, %v1496_v10 }
 0x351   : > { %v5774_v27 = vpop.eup %4529  ;;  %4539 = vpow2.f32 %v1542_v53  ;;  %v1548_v9 = vmul.f32 1.442695, %v1519_v29 }
 0x352   : > { %v1157_v41 = vpop.xlane.xlu1 %1156  ;;  %v1239_v55 = vsel %vm1115_vm10, %v5774_v27, 0.0  ;;  %v5781_v12 = vpop.eup %4531 }
 0x353   : > { %v1177_v45 = vsub.f32 %v5516_v17, %v1157_v41  ;;  %1240 = vadd.xlane.f32.xlu1 %v1239_v55  ;;  %1573 = vadd.xlane.f32.xlu0 %v1572_v33  ;;  %v5784_v2 = vpop.xlane.xlu0 %1153  ;;  %v1581_v50 = vsel %vm1115_vm10, %v5781_v12, 0.0  ;;  %v5789_v19 = vpop.eup %4533  ;;  %v1546_v17 = vmul.f32 1.442695, %v1518_v21 }
 0x354   : > { %v1578_v10 = vsel %vm1115_vm10, %v5789_v19, 0.0 }
 0x355   : > { %v1206_v7 = vmul.f32 1.442695, %v1177_v45 }
 0x356   : > { %v1505_v26 = vpop.xlane.xlu1 %1504 }
 0x357   : > { %4541 = vpow2.f32 %v1206_v7  ;;  %1582 = vadd.xlane.f32.xlu0 %v1581_v50  ;;  %v1521_v41 = vsub.f32 %v5526_v24, %v1505_v26  ;;  %v1502_v55 = vpop.xlane.xlu0 %1501 }
 0x358   : > { %4543 = vpow2.f32 %v1548_v9  ;;  %v1520_v9 = vsub.f32 %v5532_v0, %v1502_v55 }
 0x359   : > { %v5791_v13 = vpop.eup %4535  ;;  %4545 = vpow2.f32 %v1546_v17  ;;  %v1552_v45 = vmul.f32 1.442695, %v1521_v41 }
 0x35a   : > { %6373 = vst [vmem:[#allocation36_spill] sm:$0xff] %v5791_v13  ;;  %v1163_v53 = vpop.xlane.xlu1 %1162  ;;  %v1245_v62 = vsel %vm1115_vm10, %v5791_v13, 0.0  ;;  %v5798_v29 = vpop.eup %4537  ;;  %v1550_v17 = vmul.f32 1.442695, %v1520_v9 }
 0x35b   : > { %v1179_v33 = vsub.f32 %v5528_v34, %v1163_v53  ;;  %1246 = vadd.xlane.f32.xlu1 %v1245_v62  ;;  %1579 = vadd.xlane.f32.xlu0 %v1578_v10  ;;  %v1587_v7 = vsel %vm1115_vm10, %v5798_v29, 0.0  ;;  %v5804_v26 = vpop.eup %4539  ;;  %v1166_v34 = vsub.f32 %v5458_v58, %v5699_v25  ;;  %v1167_v58 = vsub.f32 %v5454_v57, %v5697_v37 }
 0x35c   : > { %v1584_v53 = vsel %vm1115_vm10, %v5804_v26, 0.0  ;;  %v1168_v57 = vsub.f32 %v5470_v6, %v5718_v11  ;;  %v1170_v6 = vsub.f32 %v5482_v42, %v5733_v61  ;;  %v1172_v61 = vsub.f32 %v5498_v48, %v5750_v15 }
 0x35d   : > { %v1210_v21 = vmul.f32 1.442695, %v1179_v33  ;;  %v1184_v25 = vmul.f32 1.442695, %v1166_v34  ;;  %v1174_v15 = vsub.f32 %v5510_v40, %v5767_v1  ;;  %v1176_v40 = vsub.f32 %v5522_v38, %v5784_v2 }
 0x35e   : > { %v2191_v24 = vpop.xlane.xlu1 %2190  ;;  %v1192_v42 = vmul.f32 1.442695, %v1170_v6  ;;  %v1196_v48 = vmul.f32 1.442695, %v1172_v61 }
 0x35f   : > { %4547 = vpow2.f32 %v1210_v21  ;;  %v2235_v50 = vsub.f32 %v5538_v44, %v2191_v24  ;;  %1588 = vadd.xlane.f32.xlu0 %v1587_v7 }
 0x360   : > { %4549 = vpow2.f32 %v1552_v45 }
 0x361   : > { %v5807_v13 = vpop.eup %4541  ;;  %v2252_v41 = vmul.f32 1.442695, %v2235_v50 }
 0x362   : > { %v2197_v0 = vpop.xlane.xlu1 %2196  ;;  %v1251_v55 = vsel %vm1115_vm10, %v5807_v13, 0.0  ;;  %v5815_v62 = vpop.eup %4543 }
 0x363   : > { %4551 = vpow2.f32 %v2252_v41  ;;  %v2237_v44 = vsub.f32 %v5546_v31, %v2197_v0  ;;  %1252 = vadd.xlane.f32.xlu1 %v1251_v55  ;;  %1585 = vadd.xlane.f32.xlu0 %v1584_v53  ;;  %v1593_v45 = vsel %vm1115_vm10, %v5815_v62, 0.0  ;;  %v5822_v9 = vpop.eup %4545  ;;  %v1186_v31 = vmul.f32 1.442695, %v1167_v58  ;;  %v5840_v55 = vpop.xlane.xlu0 %1159 }
 0x364   : > { %4553 = vpow2.f32 %v1550_v17  ;;  %v1590_v34 = vsel %vm1115_vm10, %v5822_v9, 0.0  ;;  %v1188_v0 = vmul.f32 1.442695, %v1168_v57  ;;  %v1178_v38 = vsub.f32 %v5534_v35, %v5840_v55 }
 0x365   : > { %v2256_v10 = vmul.f32 1.442695, %v2237_v44 }
 0x366   : > { %v2203_v33 = vpop.xlane.xlu1 %2202 }
 0x367   : > { %4555 = vpow2.f32 %v2256_v10  ;;  %v2239_v21 = vsub.f32 %v5554_v54, %v2203_v33  ;;  %1594 = vadd.xlane.f32.xlu0 %v1593_v45 }
 0x368   : > { %4557 = vpow2.f32 %v1184_v25 }
 0x369   : > { %v5825_v24 = vpop.eup %4547  ;;  %v2260_v37 = vmul.f32 1.442695, %v2239_v21 }
 0x36a   : > { %v2209_v7 = vpop.xlane.xlu1 %2208  ;;  %v1257_v50 = vsel %vm1115_vm10, %v5825_v24, 0.0  ;;  %v5833_v17 = vpop.eup %4549 }
 0x36b   : > { %4559 = vpow2.f32 %v2260_v37  ;;  %v2241_v54 = vsub.f32 %v5562_v63, %v2209_v7  ;;  %1258 = vadd.xlane.f32.xlu1 %v1257_v50  ;;  %1591 = vadd.xlane.f32.xlu0 %v1590_v34  ;;  %v1599_v58 = vsel %vm1115_vm10, %v5833_v17, 0.0  ;;  %v2188_v37 = vpop.xlane.xlu0 %2187 }
 0x36c   : > { %4561 = vpow2.f32 %v1186_v31  ;;  %v2234_v35 = vsub.f32 %v5542_v23, %v2188_v37 }
 0x36d   : > { %v5836_v41 = vpop.eup %4551  ;;  %v2264_v11 = vmul.f32 1.442695, %v2241_v54 }
 0x36e   : > { %v2215_v53 = vpop.xlane.xlu1 %2214  ;;  %v2285_v44 = vsel %vm1115_vm10, %v5836_v41, 0.0  ;;  %v5846_v63 = vpop.eup %4553 }
 0x36f   : > { %4563 = vpow2.f32 %v2264_v11  ;;  %v2243_v25 = vsub.f32 %v5572_v5, %v2215_v53  ;;  %2286 = vadd.xlane.f32.xlu1 %v2285_v44  ;;  %1600 = vadd.xlane.f32.xlu0 %v1599_v58  ;;  %v1596_v31 = vsel %vm1115_vm10, %v5846_v63, 0.0  ;;  %v1200_v53 = vmul.f32 1.442695, %v1174_v15  ;;  %v2194_v44 = vpop.xlane.xlu0 %2193 }
 0x370   : > { %4565 = vpow2.f32 %v1188_v0 }
 0x371   : > { %v5849_v10 = vpop.eup %4555  ;;  %v2268_v33 = vmul.f32 1.442695, %v2243_v25 }
 0x372   : > { %v2221_v45 = vpop.xlane.xlu1 %2220  ;;  %v2291_v21 = vsel %vm1115_vm10, %v5849_v10, 0.0  ;;  %v5857_v57 = vpop.eup %4557 }
 0x373   : > { %4567 = vpow2.f32 %v2268_v33  ;;  %v2245_v5 = vsub.f32 %v5580_v51, %v2221_v45  ;;  %2292 = vadd.xlane.f32.xlu1 %v2291_v21  ;;  %1597 = vadd.xlane.f32.xlu0 %v1596_v31  ;;  %v1218_v0 = vsel %vm1115_vm10, %v5857_v57, 0.0  ;;  %v1204_v33 = vmul.f32 1.442695, %v1176_v40  ;;  %v6375_v40 = vld [vmem:[#allocation20_spill] sm:$0xff] }
 0x374   : > { %4569 = vpow2.f32 %v1192_v42  ;;  %v2236_v23 = vsub.f32 %v6375_v40, %v2194_v44 }
 0x375   : > { %v5860_v7 = vpop.eup %4559  ;;  %v2272_v50 = vmul.f32 1.442695, %v2245_v5 }
 0x376   : > { %v2227_v34 = vpop.xlane.xlu1 %2226  ;;  %v2297_v54 = vsel %vm1115_vm10, %v5860_v7, 0.0  ;;  %v5868_v6 = vpop.eup %4561 }
 0x377   : > { %4571 = vpow2.f32 %v2272_v50  ;;  %v2247_v51 = vsub.f32 %v5588_v20, %v2227_v34  ;;  %2298 = vadd.xlane.f32.xlu1 %v2297_v54  ;;  %1219 = vadd.xlane.f32.xlu0 %v1218_v0  ;;  %v1221_v42 = vsel %vm1115_vm10, %v5868_v6, 0.0  ;;  %v1208_v50 = vmul.f32 1.442695, %v1178_v38 }
 0x378   : > { %4573 = vpow2.f32 %v1196_v48  ;;  %v2200_v48 = vpop.xlane.xlu0 %2199 }
 0x379   : > { %v5871_v11 = vpop.eup %4563  ;;  %v2276_v1 = vmul.f32 1.442695, %v2247_v51 }
 0x37a   : > { %v5875_v58 = vpop.xlane.xlu1 %2223  ;;  %v2303_v25 = vsel %vm1115_vm10, %v5871_v11, 0.0  ;;  %v5881_v20 = vpop.eup %4565 }
 0x37b   : > { %4575 = vpow2.f32 %v2276_v1  ;;  %2304 = vadd.xlane.f32.xlu1 %v2303_v25  ;;  %1222 = vadd.xlane.f32.xlu0 %v1221_v42  ;;  %v1224_v21 = vsel %vm1115_vm10, %v5881_v20, 0.0 }
 0x37c   : > { %4577 = vpow2.f32 %v1200_v53  ;;  %v2250_v53 = vmul.f32 1.442695, %v2234_v35  ;;  %v2206_v37 = vpop.xlane.xlu0 %2205 }
 0x37d   : > { %v5883_v61 = vpop.eup %4567  ;;  %4579 = vpow2.f32 %v1204_v33 }
 0x37e   : > { %v2233_v2 = vpop.xlane.xlu1 %2232  ;;  %v2309_v45 = vsel %vm1115_vm10, %v5883_v61, 0.0  ;;  %v5891_v31 = vpop.eup %4569 }
 0x37f   : > { %v2249_v5 = vsub.f32 %v5596_v16, %v2233_v2  ;;  %2310 = vadd.xlane.f32.xlu1 %v2309_v45  ;;  %1225 = vadd.xlane.f32.xlu0 %v1224_v21  ;;  %v1230_v0 = vsel %vm1115_vm10, %v5891_v31, 0.0  ;;  %v2254_v2 = vmul.f32 1.442695, %v2236_v23  ;;  %v6376_v45 = vld [vmem:[#allocation21_spill] sm:$0xff] }
 0x380   : > { %v2238_v21 = vsub.f32 %v6376_v45, %v2200_v48 }
 0x381   : > { %v5894_v15 = vpop.eup %4571  ;;  %v2280_v55 = vmul.f32 1.442695, %v2249_v5 }
 0x382   : > { %v5897_v34 = vpop.xlane.xlu1 %2229  ;;  %v2315_v54 = vsel %vm1115_vm10, %v5894_v15, 0.0  ;;  %v5903_v51 = vpop.eup %4573 }
 0x383   : > { %4581 = vpow2.f32 %v2280_v55  ;;  %2316 = vadd.xlane.f32.xlu1 %v2315_v54  ;;  %1231 = vadd.xlane.f32.xlu0 %v1230_v0  ;;  %v1236_v42 = vsel %vm1115_vm10, %v5903_v51, 0.0  ;;  %v2212_v55 = vpop.xlane.xlu0 %2211  ;;  %v6378_v0 = vld [vmem:[#allocation22_spill] sm:$0xff] }
 0x384   : > { %4583 = vpow2.f32 %v1208_v50 }
 0x385   : > { %v5905_v16 = vpop.eup %4575  ;;  %4585 = vpow2.f32 %v2250_v53  ;;  %v2240_v53 = vsub.f32 %v6378_v0, %v2206_v37 }
 0x386   : > { %6374 = vst [vmem:[#allocation37_spill] sm:$0xff] %v5905_v16  ;;  %v2742_v1 = vpop.xlane.xlu1 %2741  ;;  %v2321_v25 = vsel %vm1115_vm10, %v5905_v16, 0.0  ;;  %v5912_v33 = vpop.eup %4577 }
 0x387   : > { %v2786_v38 = vsub.f32 %v5602_v28, %v2742_v1  ;;  %2322 = vadd.xlane.f32.xlu1 %v2321_v25  ;;  %1237 = vadd.xlane.f32.xlu0 %v1236_v42  ;;  %v1242_v50 = vsel %vm1115_vm10, %v5912_v33, 0.0  ;;  %v5920_v35 = vpop.eup %4579  ;;  %v2258_v28 = vmul.f32 1.442695, %v2238_v21  ;;  %v2262_v42 = vmul.f32 1.442695, %v2240_v53  ;;  %v2218_v21 = vpop.xlane.xlu0 %2217 }
 0x388   : > { %v1248_v23 = vsel %vm1115_vm10, %v5920_v35, 0.0 }
 0x389   : > { %v2803_v5 = vmul.f32 1.442695, %v2786_v38  ;;  %v6379_v38 = vld [vmem:[#allocation23_spill] sm:$0xff] }
 0x38a   : > { %v5916_v44 = vpop.xlane.xlu1 %2738 }
 0x38b   : > { %4587 = vpow2.f32 %v2803_v5  ;;  %1243 = vadd.xlane.f32.xlu0 %v1242_v50 }
 0x38c   : > { %4589 = vpow2.f32 %v2254_v2  ;;  %v2242_v2 = vsub.f32 %v6379_v38, %v2212_v55 }
 0x38d   : > { %v5922_v54 = vpop.eup %4581  ;;  %4591 = vpow2.f32 %v2258_v28 }
 0x38e   : > { %6377 = vst [vmem:[#allocation20_spill] sm:$0xff] %v5922_v54  ;;  %v2748_v40 = vpop.xlane.xlu1 %2747  ;;  %v2327_v48 = vsel %vm1115_vm10, %v5922_v54, 0.0  ;;  %v5929_v1 = vpop.eup %4583 }
 0x38f   : > { %v2788_v25 = vsub.f32 %v5610_v46, %v2748_v40  ;;  %2328 = vadd.xlane.f32.xlu1 %v2327_v48  ;;  %1249 = vadd.xlane.f32.xlu0 %v1248_v23  ;;  %v1254_v5 = vsel %vm1115_vm10, %v5929_v1, 0.0  ;;  %v5935_v50 = vpop.eup %4585  ;;  %v2266_v46 = vmul.f32 1.442695, %v2242_v2  ;;  %v6381_v40 = vld [vmem:[#allocation24_spill] sm:$0xff] }
 0x390   : > { %v2244_v48 = vsub.f32 %v6381_v40, %v2218_v21  ;;  %v2282_v53 = vsel %vm1115_vm10, %v5935_v50, 0.0 }
 0x391   : > { %v2807_v45 = vmul.f32 1.442695, %v2788_v25 }
 0x392   : > { %v2745_v37 = vpop.xlane.xlu1 %2744  ;;  %v2270_v38 = vmul.f32 1.442695, %v2244_v48 }
 0x393   : > { %4593 = vpow2.f32 %v2807_v45  ;;  %1255 = vadd.xlane.f32.xlu0 %v1254_v5 }
 0x394   : > { %4595 = vpow2.f32 %v2262_v42  ;;  %v6382_v42 = vld [vmem:[#allocation25_spill] sm:$0xff] }
 0x395   : > { %v5937_v0 = vpop.eup %4587  ;;  %4597 = vpow2.f32 %v2266_v46  ;;  %v2246_v2 = vsub.f32 %v6382_v42, %v5875_v58  ;;  %v2248_v46 = vsub.f32 %v5598_v18, %v5897_v34 }
 0x396   : > { %6380 = vst [vmem:[#allocation21_spill] sm:$0xff] %v5937_v0  ;;  %v2754_v28 = vpop.xlane.xlu1 %2753  ;;  %v2836_v55 = vsel %vm1115_vm10, %v5937_v0, 0.0  ;;  %v5944_v23 = vpop.eup %4589 }
 0x397   : > { %v2790_v25 = vsub.f32 %v5618_v52, %v2754_v28  ;;  %2837 = vadd.xlane.f32.xlu1 %v2836_v55  ;;  %2283 = vadd.xlane.f32.xlu0 %v2282_v53  ;;  %v2288_v5 = vsel %vm1115_vm10, %v5944_v23, 0.0  ;;  %v5951_v40 = vpop.eup %4591  ;;  %v2274_v52 = vmul.f32 1.442695, %v2246_v2 }
 0x398   : > { %v2294_v28 = vsel %vm1115_vm10, %v5951_v40, 0.0 }
 0x399   : > { %v2811_v45 = vmul.f32 1.442695, %v2790_v25  ;;  %v2278_v25 = vmul.f32 1.442695, %v2248_v46 }
 0x39a   : > { %v2751_v21 = vpop.xlane.xlu1 %2750 }
 0x39b   : > { %4599 = vpow2.f32 %v2811_v45  ;;  %2289 = vadd.xlane.f32.xlu0 %v2288_v5 }
 0x39c   : > { %4601 = vpow2.f32 %v2270_v38  ;;  %v6384_v38 = vld [vmem:[#allocation26_spill] sm:$0xff] }
 0x39d   : > { %v5953_v0 = vpop.eup %4593  ;;  %4603 = vpow2.f32 %v2274_v52  ;;  %v2785_v42 = vsub.f32 %v6384_v38, %v5916_v44 }
 0x39e   : > { %6383 = vst [vmem:[#allocation22_spill] sm:$0xff] %v5953_v0  ;;  %v2760_v48 = vpop.xlane.xlu1 %2759  ;;  %v2842_v58 = vsel %vm1115_vm10, %v5953_v0, 0.0  ;;  %v5961_v55 = vpop.eup %4595 }
 0x39f   : > { %v2792_v53 = vsub.f32 %v5626_v43, %v2760_v48  ;;  %2843 = vadd.xlane.f32.xlu1 %v2842_v58  ;;  %2295 = vadd.xlane.f32.xlu0 %v2294_v28  ;;  %v2300_v34 = vsel %vm1115_vm10, %v5961_v55, 0.0  ;;  %v5968_v45 = vpop.eup %4597  ;;  %v2801_v43 = vmul.f32 1.442695, %v2785_v42  ;;  %v6386_v48 = vld [vmem:[#allocation27_spill] sm:$0xff] }
 0x3a0   : > { %v2787_v58 = vsub.f32 %v6386_v48, %v2745_v37  ;;  %v2306_v44 = vsel %vm1115_vm10, %v5968_v45, 0.0 }
 0x3a1   : > { %v2815_v2 = vmul.f32 1.442695, %v2792_v53  ;;  %v6387_v53 = vld [vmem:[#allocation30_spill] sm:$0xff] }
 0x3a2   : > { %v2757_v18 = vpop.xlane.xlu1 %2756 }
 0x3a3   : > { %4605 = vpow2.f32 %v2815_v2  ;;  %2301 = vadd.xlane.f32.xlu0 %v2300_v34  ;;  %v2805_v2 = vmul.f32 1.442695, %v2787_v58  ;;  %v6388_v34 = vld [vmem:[#allocation28_spill] sm:$0xff] }
 0x3a4   : > { %4607 = vpow2.f32 %v2278_v25  ;;  %v2789_v25 = vsub.f32 %v6388_v34, %v2751_v21 }
 0x3a5   : > { %v5970_v5 = vpop.eup %4599  ;;  %4609 = vpow2.f32 %v2801_v43 }
 0x3a6   : > { %6385 = vst [vmem:[#allocation23_spill] sm:$0xff] %v5970_v5  ;;  %v2766_v52 = vpop.xlane.xlu1 %2765  ;;  %v2848_v46 = vsel %vm1115_vm10, %v5970_v5, 0.0  ;;  %v5977_v28 = vpop.eup %4601  ;;  %v2809_v54 = vmul.f32 1.442695, %v2789_v25 }
 0x3a7   : > { %v2794_v38 = vsub.f32 %v6387_v53, %v2766_v52  ;;  %2849 = vadd.xlane.f32.xlu1 %v2848_v46  ;;  %2307 = vadd.xlane.f32.xlu0 %v2306_v44  ;;  %v2312_v37 = vsel %vm1115_vm10, %v5977_v28, 0.0  ;;  %v5983_v48 = vpop.eup %4603  ;;  %v6390_v52 = vld [vmem:[#allocation29_spill] sm:$0xff]  ;;  %v6391_v53 = vld [vmem:[#allocation32_spill] sm:$0xff] }
 0x3a8   : > { %v2791_v46 = vsub.f32 %v6390_v52, %v2757_v18  ;;  %v2318_v21 = vsel %vm1115_vm10, %v5983_v48, 0.0 }
 0x3a9   : > { %v2819_v42 = vmul.f32 1.442695, %v2794_v38 }
 0x3aa   : > { %v2763_v0 = vpop.xlane.xlu1 %2762  ;;  %v2813_v34 = vmul.f32 1.442695, %v2791_v46 }
 0x3ab   : > { %4611 = vpow2.f32 %v2819_v42  ;;  %2313 = vadd.xlane.f32.xlu0 %v2312_v37  ;;  %v6392_v42 = vld [vmem:[#allocation31_spill] sm:$0xff] }
 0x3ac   : > { %4613 = vpow2.f32 %v2805_v2  ;;  %v2793_v2 = vsub.f32 %v6392_v42, %v2763_v0 }
 0x3ad   : > { %v5985_v5 = vpop.eup %4605  ;;  %4615 = vpow2.f32 %v2809_v54 }
 0x3ae   : > { %6389 = vst [vmem:[#allocation24_spill] sm:$0xff] %v5985_v5  ;;  %v2772_v44 = vpop.xlane.xlu1 %2771  ;;  %v2854_v43 = vsel %vm1115_vm10, %v5985_v5, 0.0  ;;  %v5992_v58 = vpop.eup %4607  ;;  %v2817_v16 = vmul.f32 1.442695, %v2793_v2 }
 0x3af   : > { %v2796_v38 = vsub.f32 %v6391_v53, %v2772_v44  ;;  %2855 = vadd.xlane.f32.xlu1 %v2854_v43  ;;  %2319 = vadd.xlane.f32.xlu0 %v2318_v21  ;;  %v2324_v18 = vsel %vm1115_vm10, %v5992_v58, 0.0  ;;  %v5998_v52 = vpop.eup %4609 }
 0x3b0   : > { %v2833_v0 = vsel %vm1115_vm10, %v5998_v52, 0.0 }
 0x3b1   : > { %v2823_v25 = vmul.f32 1.442695, %v2796_v38 }
 0x3b2   : > { %v2769_v37 = vpop.xlane.xlu1 %2768 }
 0x3b3   : > { %4617 = vpow2.f32 %v2823_v25  ;;  %2325 = vadd.xlane.f32.xlu0 %v2324_v18  ;;  %v2795_v44 = vsub.f32 %v5646_v8, %v2769_v37 }
 0x3b4   : > { %4619 = vpow2.f32 %v2813_v34 }
 0x3b5   : > { %v6000_v5 = vpop.eup %4611  ;;  %4621 = vpow2.f32 %v2817_v16  ;;  %v2821_v53 = vmul.f32 1.442695, %v2795_v44 }
 0x3b6   : > { %v2778_v43 = vpop.xlane.xlu1 %2777  ;;  %v2860_v54 = vsel %vm1115_vm10, %v6000_v5, 0.0  ;;  %v6007_v46 = vpop.eup %4613 }
 0x3b7   : > { %v2798_v21 = vsub.f32 %v5650_v56, %v2778_v43  ;;  %2861 = vadd.xlane.f32.xlu1 %v2860_v54  ;;  %2834 = vadd.xlane.f32.xlu0 %v2833_v0  ;;  %v2839_v8 = vsel %vm1115_vm10, %v6007_v46, 0.0  ;;  %v6012_v42 = vpop.eup %4615 }
 0x3b8   : > { %v2845_v44 = vsel %vm1115_vm10, %v6012_v42, 0.0 }
 0x3b9   : > { %v2827_v38 = vmul.f32 1.442695, %v2798_v21 }
 0x3ba   : > { %v2775_v34 = vpop.xlane.xlu1 %2774 }
 0x3bb   : > { %4623 = vpow2.f32 %v2827_v38  ;;  %v2797_v2 = vsub.f32 %v5654_v60, %v2775_v34  ;;  %2840 = vadd.xlane.f32.xlu0 %v2839_v8 }
 0x3bc   : > { %v1559_v25 = vpop.xlane.xlu0 %1558  ;;  %4625 = vpow2.f32 %v2821_v53 }
 0x3bd   : > { %v6015_v37 = vpop.eup %4617  ;;  %v2825_v56 = vmul.f32 1.442695, %v2797_v2 }
 0x3be   : > { %v2781_v18 = vpop.xlane.xlu1 %2780  ;;  %v2866_v16 = vsel %vm1115_vm10, %v6015_v37, 0.0  ;;  %v6021_v43 = vpop.eup %4619 }
 0x3bf   : > { %v2799_v54 = vsub.f32 %v5660_v49, %v2781_v18  ;;  %2867 = vadd.xlane.f32.xlu1 %v2866_v16  ;;  %2846 = vadd.xlane.f32.xlu0 %v2845_v44  ;;  %4627 = vpow2.f32 %v2825_v56  ;;  %v2851_v53 = vsel %vm1115_vm10, %v6021_v43, 0.0  ;;  %v6028_v38 = vpop.eup %4621 }
 0x3c0   : > { %v6024_v60 = vpop.xlane.xlu0 %1216  ;;  %4629 = vrcp.f32 %v1559_v25  ;;  %v2857_v18 = vsel %vm1115_vm10, %v6028_v38, 0.0 }
 0x3c1   : > { %v2829_v0 = vmul.f32 1.442695, %v2799_v54 }
 0x3c2   : > { %v2784_v21 = vpop.xlane.xlu1 %2783 }
 0x3c3   : > { %v2800_v34 = vsub.f32 %v5656_v59, %v2784_v21  ;;  %2852 = vadd.xlane.f32.xlu0 %v2851_v53  ;;  %4631 = vpow2.f32 %v2829_v0 }
 0x3c4   : > { %v1556_v8 = vpop.xlane.xlu0 %1555 }
 0x3c5   : > { %v6031_v2 = vpop.eup %4623  ;;  %v2831_v49 = vmul.f32 1.442695, %v2800_v34  ;;  %4633 = vrcp.f32 %v1556_v8 }
 0x3c6   : > { %6393 = vst [vmem:[#allocation25_spill] sm:$0xff] %v6031_v2  ;;  %v2872_v56 = vsel %vm1115_vm10, %v6031_v2, 0.0  ;;  %v6037_v16 = vpop.eup %4625 }
 0x3c7   : > { %4635 = vpow2.f32 %v2831_v49  ;;  %2873 = vadd.xlane.f32.xlu1 %v2872_v56  ;;  %2858 = vadd.xlane.f32.xlu0 %v2857_v18  ;;  %v2863_v59 = vsel %vm1115_vm10, %v6037_v16, 0.0 }
 0x3c8   : > { %v6039_v25 = vpop.xlane.xlu0 %1213 }
 0x3c9   : > { %v6043_v44 = vpop.eup %4627 }
 0x3ca   : > { %v4630_v0 = vpop.eup %4629  ;;  %v2869_v53 = vsel %vm1115_vm10, %v6043_v44, 0.0 }
 0x3cb   : > { %2864 = vadd.xlane.f32.xlu0 %v2863_v59  ;;  %v1619_v18 = vmul.f32 %v4630_v0, %v5703_v39  ;;  %v6396_v39 = vld [vmem:[#allocation14_spill] sm:$0xff] }
 0x3cc   : > { %v1565_v54 = vpop.xlane.xlu0 %1564 }
 0x3cd   : > { %v6045_v21 = vpop.eup %4631  ;;  %4637 = vrcp.f32 %v1565_v54 }
 0x3ce   : > { %v2875_v2 = vsel %vm1115_vm10, %v6045_v21, 0.0 }
 0x3cf   : > { %v4634_v34 = vpop.eup %4633  ;;  %2870 = vadd.xlane.f32.xlu0 %v2869_v53 }
 0x3d0   : > { %v1562_v8 = vpop.xlane.xlu0 %1561  ;;  %v1618_v49 = vmul.f32 %v4634_v34, %v5715_v32  ;;  %v6394_v32 = vld [vmem:[#allocation8_spill] sm:$0xff]  ;;  %v6395_v34 = vld [vmem:[#allocation11_spill] sm:$0xff] }
 0x3d1   : > { %v6050_v56 = vpop.eup %4635  ;;  %4639 = vrcp.f32 %v1562_v8 }
 0x3d2   : > { %3912 = vmatprep.mubr.msk.f32.mxu1 %vm1115_vm10, %v1618_v49  ;;  %v2878_v59 = vsel %vm1115_vm10, %v6050_v56, 0.0 }
 0x3d3   : > { %2879 = vadd.xlane.f32.xlu1 %v2878_v59  ;;  %2876 = vadd.xlane.f32.xlu0 %v2875_v2 }
 0x3d4   : > { %3913 = vmatmul.mubr.msk.f32.vlgmr.msra.gmra.mrb[32].mxu1 %vm1115_vm10, %v1619_v18  ;;  %v1571_v53 = vpop.xlane.xlu0 %1570  ;;  %v6397_v18 = vld [vmem:[#allocation17_spill] sm:$0xff] }
 0x3d5   : > { %4307 = vmatpush3.bf16.msra.mxu1 %v6394_v32  ;;  %4641 = vrcp.f32 %v1571_v53  ;;  %v6398_v32 = vld [vmem:[#allocation9_spill] sm:$0xff] }
 0x3d6   : > { %4309 = vmatprep.subr.bf16.mxu1 %v6395_v34 }
 0x3d7   : > { %v4638_v0 = vpop.eup %4637 }
 0x3d8   : > { %v1568_v54 = vpop.xlane.xlu0 %1567  ;;  %v1621_v59 = vmul.f32 %v4638_v0, %v5730_v14 }
 0x3d9   : > { %4311 = vmatpush3.bf16.msra.mxu1 %v6395_v34  ;;  %4643 = vrcp.f32 %v1568_v54 }
 0x3da   : > { %4313 = vmatprep.subr.bf16.mxu1 %v6396_v39 }
 0x3db   : > { %v4640_v8 = vpop.eup %4639 }
 0x3dc   : > { %v1577_v49 = vpop.xlane.xlu0 %1576  ;;  %v1620_v2 = vmul.f32 %v4640_v8, %v5738_v3 }
 0x3dd   : > { %4315 = vmatpush3.bf16.msra.mxu1 %v6396_v39  ;;  %4645 = vrcp.f32 %v1577_v49 }
 0x3de   : > { %4317 = vmatprep.subr.bf16.mxu1 %v6397_v18  ;;  %3915 = vmatprep.mubr.msk.f32.mxu1 %vm1115_vm10, %v1620_v2 }
 0x3df   : > { %3916 = vmatmul.mubr.msk.f32.gmra.mrb[34].mxu1 %vm1115_vm10, %v1621_v59  ;;  %v4642_v34 = vpop.eup %4641 }
 0x3e0   : > { %v1574_v53 = vpop.xlane.xlu0 %1573  ;;  %v1623_v8 = vmul.f32 %v4642_v34, %v5747_v36  ;;  %v3122_v36 = vld [vmem:[%s6293_s5] sm:$0xff]  ;;  %v3124_v34 = vld [vmem:[%s6293_s5 + $0x10] sm:$0xff] }
 0x3e1   : > { %4319 = vmatpush3.bf16.msra.mxu1 %v6397_v18  ;;  %4647 = vrcp.f32 %v1574_v53  ;;  %v3123_v53 = vld [vmem:[%s6293_s5 + $0x8] sm:$0xff] }
 0x3e2   : > { %4337 = vmatprep.subr.bf16.mxu1 %v6398_v32 }
 0x3e3   : > { %v4644_v54 = vpop.eup %4643 }
 0x3e4   : > { %v1583_v39 = vpop.xlane.xlu0 %1582  ;;  %v1622_v3 = vmul.f32 %v4644_v54, %v5755_v30 }
 0x3e5   : > { %4649 = vrcp.f32 %v1583_v39  ;;  %v3126_v39 = vld [vmem:[%s6293_s5 + $0x20] sm:$0xff] }
 0x3e6   : > { %3918 = vmatprep.mubr.msk.f32.mxu1 %vm1115_vm10, %v1622_v3  ;;  %v3127_v3 = vld [vmem:[%s6293_s5 + $0x28] sm:$0xff] }
 0x3e7   : > { %3919 = vmatmul.mubr.msk.f32.gmra.mrb[36].mxu1 %vm1115_vm10, %v1623_v8  ;;  %v4646_v0 = vpop.eup %4645 }
 0x3e8   : > { %v1580_v14 = vpop.xlane.xlu0 %1579  ;;  %v1625_v59 = vmul.f32 %v4646_v0, %v5764_v22  ;;  %v3125_v22 = vld [vmem:[%s6293_s5 + $0x18] sm:$0xff] }
 0x3e9   : > { %4651 = vrcp.f32 %v1580_v14  ;;  %v4388_v54 = vpack.c.bf16 %v3125_v22, %v3124_v34 }
 0x3eb   : > { %v4648_v49 = vpop.eup %4647 }
 0x3ec   : > { %v1589_v2 = vpop.xlane.xlu0 %1588  ;;  %v1624_v18 = vmul.f32 %v4648_v49, %v5772_v4  ;;  %v4384_v4 = vpack.c.bf16 %v3123_v53, %v3122_v36  ;;  %v3131_v53 = vld [vmem:[%s6293_s5 + $0x48] sm:$0xff] }
 0x3ed   : > { %4653 = vrcp.f32 %v1589_v2  ;;  %v4392_v2 = vpack.c.bf16 %v3127_v3, %v3126_v39 }
 0x3ee   : > { %3921 = vmatprep.mubr.msk.f32.mxu1 %vm1115_vm10, %v1624_v18  ;;  %4385 = vmatprep.subr.bf16.mxu0 %v4384_v4 }
 0x3ef   : > { %3922 = vmatmul.mubr.msk.f32.gmra.mrb[38].mxu1 %vm1115_vm10, %v1625_v59  ;;  %v4650_v8 = vpop.eup %4649  ;;  %4387 = vmatpush3.bf16.msra.mxu0 %v4384_v4  ;;  %v3128_v59 = vld [vmem:[%s6293_s5 + $0x30] sm:$0xff]  ;;  %v1229_v4 = vpop.xlane.xlu1 %1228 }
 0x3f0   : > { %v1586_v30 = vpop.xlane.xlu0 %1585  ;;  %4389 = vmatprep.subr.bf16.mxu0 %v4388_v54  ;;  %v1627_v18 = vmul.f32 %v4650_v8, %v5781_v12  ;;  %v3130_v12 = vld [vmem:[%s6293_s5 + $0x40] sm:$0xff] }
 0x3f1   : > { %4655 = vrcp.f32 %v1586_v30  ;;  %v3129_v30 = vld [vmem:[%s6293_s5 + $0x38] sm:$0xff] }
 0x3f3   : > { %v4652_v14 = vpop.eup %4651  ;;  %4391 = vmatpush3.bf16.msra.mxu0 %v4388_v54  ;;  %v4400_v54 = vpack.c.bf16 %v3131_v53, %v3130_v12 }
 0x3f4   : > { %v1595_v0 = vpop.xlane.xlu0 %1594  ;;  %v1626_v49 = vmul.f32 %v4652_v14, %v5789_v19  ;;  %4393 = vmatprep.subr.bf16.mxu0 %v4392_v2  ;;  %v4396_v19 = vpack.c.bf16 %v3129_v30, %v3128_v59  ;;  %v3132_v14 = vld [vmem:[%s6293_s5 + $0x50] sm:$0xff] }
 0x3f5   : > { %4657 = vrcp.f32 %v1595_v0  ;;  %v3133_v0 = vld [vmem:[%s6293_s5 + $0x58] sm:$0xff] }
 0x3f6   : > { %3924 = vmatprep.mubr.msk.f32.mxu1 %vm1115_vm10, %v1626_v49  ;;  %v1235_v49 = vpop.xlane.xlu1 %1234 }
 0x3f7   : > { %3925 = vmatmul.mubr.msk.f32.gmra.mrb[40].mxu1 %vm1115_vm10, %v1627_v18  ;;  %v4654_v34 = vpop.eup %4653  ;;  %4395 = vmatpush3.bf16.msra.mxu0 %v4392_v2  ;;  %v3134_v2 = vld [vmem:[%s6293_s5 + $0x60] sm:$0xff]  ;;  %v3135_v18 = vld [vmem:[%s6293_s5 + $0x68] sm:$0xff] }
 0x3f8   : > { %v1592_v36 = vpop.xlane.xlu0 %1591  ;;  %4397 = vmatprep.subr.bf16.mxu0 %v4396_v19  ;;  %v1629_v8 = vmul.f32 %v4654_v34, %v5798_v29  ;;  %v4404_v29 = vpack.c.bf16 %v3133_v0, %v3132_v14  ;;  %v4408_v12 = vpack.c.bf16 %v3135_v18, %v3134_v2  ;;  %v3136_v34 = vld [vmem:[%s6293_s5 + $0x70] sm:$0xff] }
 0x3f9   : > { %4659 = vrcp.f32 %v1592_v36 }
 0x3fa   : > { %4661 = vrcp.f32 %v6039_v25  ;;  %v1241_v30 = vpop.xlane.xlu1 %1240 }
 0x3fb   : > { %v4656_v22 = vpop.eup %4655  ;;  %4399 = vmatpush3.bf16.msra.mxu0 %v4396_v19 }
 0x3fc   : > { %v1601_v39 = vpop.xlane.xlu0 %1600  ;;  %v1628_v3 = vmul.f32 %v4656_v22, %v5804_v26  ;;  %4401 = vmatprep.subr.bf16.mxu0 %v4400_v54  ;;  %v3137_v22 = vld [vmem:[%s6293_s5 + $0x78] sm:$0xff] }
 0x3fd   : > { %4663 = vrcp.f32 %v1601_v39 }
 0x3fe   : > { %3927 = vmatprep.mubr.msk.f32.mxu1 %vm1115_vm10, %v1628_v3  ;;  %v1247_v39 = vpop.xlane.xlu1 %1246 }
 0x3ff   : > { %3928 = vmatmul.mubr.msk.f32.gmra.mrb[42].mxu1 %vm1115_vm10, %v1629_v8  ;;  %v4658_v59 = vpop.eup %4657  ;;  %4403 = vmatpush3.bf16.msra.mxu0 %v4400_v54 }
 0x400   : > { %v1598_v26 = vpop.xlane.xlu0 %1597  ;;  %4405 = vmatprep.subr.bf16.mxu0 %v4404_v29  ;;  %v1631_v53 = vmul.f32 %v4658_v59, %v5815_v62 }
 0x401   : > { %4665 = vrcp.f32 %v1598_v26 }
 0x402   : > { %4667 = vrcp.f32 %v6024_v60  ;;  %v1253_v54 = vpop.xlane.xlu1 %1252 }
 0x403   : > { %v4660_v36 = vpop.eup %4659  ;;  %4407 = vmatpush3.bf16.msra.mxu0 %v4404_v29 }
 0x404   : > { %v1220_v25 = vpop.xlane.xlu0 %1219  ;;  %v1630_v19 = vmul.f32 %v4660_v36, %v5822_v9  ;;  %4409 = vmatprep.subr.bf16.mxu0 %v4408_v12  ;;  %v4412_v9 = vpack.c.bf16 %v3137_v22, %v3136_v34  ;;  %v4662_v3 = vpop.eup %4661  ;;  %v6401_v22 = vld [vmem:[#allocation15_spill] sm:$0xff] }
 0x405   : > { %4669 = vrcp.f32 %v1220_v25  ;;  %v1276_v29 = vmul.f32 %v4662_v3, %v5725_v47 }
 0x406   : > { %3930 = vmatprep.mubr.msk.f32.mxu1 %vm1115_vm10, %v1630_v19  ;;  %v1259_v18 = vpop.xlane.xlu1 %1258 }
 0x407   : > { %3931 = vmatmul.mubr.msk.f32.gmra.mrb[44].mxu1 %vm1115_vm10, %v1631_v53  ;;  %v4664_v62 = vpop.eup %4663  ;;  %4411 = vmatpush3.bf16.msra.mxu0 %v4408_v12 }
 0x408   : > { %v1223_v60 = vpop.xlane.xlu0 %1222  ;;  %4413 = vmatprep.subr.bf16.mxu0 %v4412_v9  ;;  %v1633_v26 = vmul.f32 %v4664_v62, %v5833_v17 }
 0x409   : > { %4671 = vrcp.f32 %v1223_v60 }
 0x40a   : > { %4673 = vrcp.f32 %v1229_v4  ;;  %v6399_v4 = vld [vmem:[#allocation33_spill] sm:$0xff]  ;;  %v2287_v12 = vpop.xlane.xlu1 %2286 }
 0x40b   : > { %v4666_v8 = vpop.eup %4665  ;;  %4415 = vmatpush3.bf16.msra.mxu0 %v4412_v9 }
 0x40c   : > { %v1226_v14 = vpop.xlane.xlu0 %1225  ;;  %v1632_v0 = vmul.f32 %v4666_v8, %v5846_v63  ;;  %v4668_v2 = vpop.eup %4667  ;;  %v6403_v8 = vld [vmem:[#allocation18_spill] sm:$0xff] }
 0x40d   : > { %4675 = vrcp.f32 %v1226_v14  ;;  %v1277_v63 = vmul.f32 %v4668_v2, %v6399_v4 }
 0x40e   : > { %3933 = vmatprep.mubr.msk.f32.mxu1 %vm1115_vm10, %v1632_v0  ;;  %4677 = vrcp.f32 %v1235_v49  ;;  %v6400_v49 = vld [vmem:[#allocation12_spill] sm:$0xff] }
 0x40f   : > { %v4670_v59 = vpop.eup %4669  ;;  %3934 = vmatmul.mubr.msk.f32.gmra.mrb[46].mxu1 %vm1115_vm10, %v1633_v26 }
 0x410   : > { %v1232_v36 = vpop.xlane.xlu0 %1231  ;;  %3952 = vmatprep.mubr.msk.f32.mxu1 %vm1115_vm10, %v1276_v29  ;;  %v1278_v25 = vmul.f32 %v4670_v59, %v5857_v57  ;;  %v6405_v59 = vld [vmem:[#allocation10_spill] sm:$0xff] }
 0x411   : > { %4679 = vrcp.f32 %v1232_v36 }
 0x412   : > { %4681 = vrcp.f32 %v1241_v30 }
 0x413   : > { %v4672_v17 = vpop.eup %4671  ;;  %3953 = vmatmul.mubr.msk.f32.vlgmr.msra.gmra.mrb[32].mxu1 %vm1115_vm10, %v1277_v63 }
 0x414   : > { %v1238_v19 = vpop.xlane.xlu0 %1237  ;;  %4339 = vmatpush3.bf16.msra.mxu1 %v6398_v32  ;;  %3955 = vmatprep.mubr.msk.f32.mxu1 %vm1115_vm10, %v1278_v25  ;;  %v1279_v47 = vmul.f32 %v4672_v17, %v5868_v6  ;;  %v4674_v53 = vpop.eup %4673  ;;  %v6402_v32 = vld [vmem:[#allocation34_spill] sm:$0xff]  ;;  %v6406_v25 = vld [vmem:[#allocation36_spill] sm:$0xff] }
 0x415   : > { %4341 = vmatprep.subr.bf16.mxu1 %v6400_v49  ;;  %4683 = vrcp.f32 %v1238_v19  ;;  %v1281_v60 = vmul.f32 %v4674_v53, %v6402_v32  ;;  %v2293_v6 = vpop.xlane.xlu1 %2292 }
 0x416   : > { %4685 = vrcp.f32 %v1247_v39 }
 0x417   : > { %v4676_v34 = vpop.eup %4675  ;;  %3956 = vmatmul.mubr.msk.f32.gmra.mrb[34].mxu1 %vm1115_vm10, %v1279_v47 }
 0x418   : > { %v1244_v57 = vpop.xlane.xlu0 %1243  ;;  %4343 = vmatpush3.bf16.msra.mxu1 %v6400_v49  ;;  %v1280_v30 = vmul.f32 %v4676_v34, %v5881_v20  ;;  %v4678_v9 = vpop.eup %4677  ;;  %v6404_v20 = vld [vmem:[#allocation35_spill] sm:$0xff] }
 0x419   : > { %4687 = vrcp.f32 %v1244_v57  ;;  %4345 = vmatprep.subr.bf16.mxu1 %v6401_v22  ;;  %v1283_v14 = vmul.f32 %v4678_v9, %v6404_v20  ;;  %v2299_v29 = vpop.xlane.xlu1 %2298 }
 0x41a   : > { %3958 = vmatprep.mubr.msk.f32.mxu1 %vm1115_vm10, %v1280_v30  ;;  %4689 = vrcp.f32 %v1253_v54 }
 0x41b   : > { %v4680_v3 = vpop.eup %4679  ;;  %3959 = vmatmul.mubr.msk.f32.gmra.mrb[36].mxu1 %vm1115_vm10, %v1281_v60 }
 0x41c   : > { %v1250_v39 = vpop.xlane.xlu0 %1249  ;;  %4347 = vmatpush3.bf16.msra.mxu1 %v6401_v22  ;;  %v1282_v62 = vmul.f32 %v4680_v3, %v5891_v31  ;;  %v4682_v0 = vpop.eup %4681 }
 0x41d   : > { %4349 = vmatprep.subr.bf16.mxu1 %v6403_v8  ;;  %4691 = vrcp.f32 %v1250_v39  ;;  %v1285_v36 = vmul.f32 %v4682_v0, %v5774_v27  ;;  %v2305_v19 = vpop.xlane.xlu1 %2304 }
 0x41e   : > { %3961 = vmatprep.mubr.msk.f32.mxu1 %vm1115_vm10, %v1282_v62  ;;  %4693 = vrcp.f32 %v1259_v18  ;;  %v6407_v62 = vld [vmem:[#allocation13_spill] sm:$0xff] }
 0x41f   : > { %v4684_v26 = vpop.eup %4683  ;;  %3962 = vmatmul.mubr.msk.f32.gmra.mrb[38].mxu1 %vm1115_vm10, %v1283_v14 }
 0x420   : > { %v1256_v2 = vpop.xlane.xlu0 %1255  ;;  %4351 = vmatpush3.bf16.msra.mxu1 %v6403_v8  ;;  %v1284_v54 = vmul.f32 %v4684_v26, %v5903_v51  ;;  %v4686_v31 = vpop.eup %4685  ;;  %v6408_v26 = vld [vmem:[#allocation16_spill] sm:$0xff] }
 0x421   : > { %4695 = vrcp.f32 %v1256_v2  ;;  %4369 = vmatprep.subr.bf16.mxu1 %v6405_v59  ;;  %v1287_v17 = vmul.f32 %v4686_v31, %v6406_v25  ;;  %v2311_v30 = vpop.xlane.xlu1 %2310 }
 0x422   : > { %3964 = vmatprep.mubr.msk.f32.mxu1 %vm1115_vm10, %v1284_v54  ;;  %4697 = vrcp.f32 %v2287_v12 }
 0x423   : > { %v4688_v4 = vpop.eup %4687  ;;  %3965 = vmatmul.mubr.msk.f32.gmra.mrb[40].mxu1 %vm1115_vm10, %v1285_v36 }
 0x424   : > { %v2284_v18 = vpop.xlane.xlu0 %2283  ;;  %v1286_v63 = vmul.f32 %v4688_v4, %v5912_v33  ;;  %v4690_v51 = vpop.eup %4689 }
 0x425   : > { %4699 = vrcp.f32 %v2284_v18  ;;  %v1289_v34 = vmul.f32 %v4690_v51, %v5807_v13  ;;  %v2317_v3 = vpop.xlane.xlu1 %2316 }
 0x426   : > { %3967 = vmatprep.mubr.msk.f32.mxu1 %vm1115_vm10, %v1286_v63  ;;  %4701 = vrcp.f32 %v2293_v6 }
 0x427   : > { %v4692_v47 = vpop.eup %4691  ;;  %3968 = vmatmul.mubr.msk.f32.gmra.mrb[42].mxu1 %vm1115_vm10, %v1287_v17 }
 0x428   : > { %v2290_v27 = vpop.xlane.xlu0 %2289  ;;  %v1288_v49 = vmul.f32 %v4692_v47, %v5920_v35  ;;  %v4694_v53 = vpop.eup %4693 }
 0x429   : > { %4703 = vrcp.f32 %v2290_v27  ;;  %v1291_v22 = vmul.f32 %v4694_v53, %v5825_v24  ;;  %v2323_v14 = vpop.xlane.xlu1 %2322 }
 0x42a   : > { %3970 = vmatprep.mubr.msk.f32.mxu1 %vm1115_vm10, %v1288_v49  ;;  %4705 = vrcp.f32 %v2299_v29 }
 0x42b   : > { %v4696_v33 = vpop.eup %4695  ;;  %3971 = vmatmul.mubr.msk.f32.gmra.mrb[44].mxu1 %vm1115_vm10, %v1289_v34 }
 0x42c   : > { %v2296_v12 = vpop.xlane.xlu0 %2295  ;;  %v1290_v57 = vmul.f32 %v4696_v33, %v5929_v1  ;;  %v4698_v32 = vpop.eup %4697  ;;  %v6410_v33 = vld [vmem:[#allocation37_spill] sm:$0xff] }
 0x42d   : > { %4707 = vrcp.f32 %v2296_v12  ;;  %v2347_v6 = vmul.f32 %v4698_v32, %v5836_v41  ;;  %v2329_v31 = vpop.xlane.xlu1 %2328 }
 0x42e   : > { %3973 = vmatprep.mubr.msk.f32.mxu1 %vm1115_vm10, %v1290_v57  ;;  %4709 = vrcp.f32 %v2305_v19 }
 0x42f   : > { %v4700_v35 = vpop.eup %4699  ;;  %3974 = vmatmul.mubr.msk.f32.gmra.mrb[46].mxu1 %vm1115_vm10, %v1291_v22  ;;  %v6411_v22 = vld [vmem:[#allocation20_spill] sm:$0xff] }
 0x430   : > { %v2302_v13 = vpop.xlane.xlu0 %2301  ;;  %v2346_v60 = vmul.f32 %v4700_v35, %v5935_v50  ;;  %v4702_v9 = vpop.eup %4701 }
 0x431   : > { %4711 = vrcp.f32 %v2302_v13  ;;  %v2349_v50 = vmul.f32 %v4702_v9, %v5849_v10  ;;  %v2838_v18 = vpop.xlane.xlu1 %2837 }
 0x432   : > { %4032 = vmatprep.mubr.msk.f32.mxu1 %vm1115_vm10, %v2346_v60  ;;  %4713 = vrcp.f32 %v2311_v30 }
 0x433   : > { %v4704_v1 = vpop.eup %4703  ;;  %4033 = vmatmul.mubr.msk.f32.vlgmr.msra.gmra.mrb[32].mxu1 %vm1115_vm10, %v2347_v6 }
 0x434   : > { %v2308_v39 = vpop.xlane.xlu0 %2307  ;;  %v2348_v24 = vmul.f32 %v4704_v1, %v5944_v23  ;;  %4371 = vmatpush3.bf16.msra.mxu1 %v6405_v59  ;;  %v4706_v41 = vpop.eup %4705  ;;  %v6409_v59 = vld [vmem:[#allocation19_spill] sm:$0xff]  ;;  %v6412_v1 = vld [vmem:[#allocation21_spill] sm:$0xff] }
 0x435   : > { %4373 = vmatprep.subr.bf16.mxu1 %v6407_v62  ;;  %4715 = vrcp.f32 %v2308_v39  ;;  %v2351_v2 = vmul.f32 %v4706_v41, %v5860_v7  ;;  %v2844_v19 = vpop.xlane.xlu1 %2843 }
 0x436   : > { %4035 = vmatprep.mubr.msk.f32.mxu1 %vm1115_vm10, %v2348_v24  ;;  %4717 = vrcp.f32 %v2317_v3 }
 0x437   : > { %v4708_v8 = vpop.eup %4707  ;;  %4036 = vmatmul.mubr.msk.f32.gmra.mrb[34].mxu1 %vm1115_vm10, %v2349_v50  ;;  %v6413_v50 = vld [vmem:[#allocation22_spill] sm:$0xff] }
 0x438   : > { %v2314_v20 = vpop.xlane.xlu0 %2313  ;;  %4375 = vmatpush3.bf16.msra.mxu1 %v6407_v62  ;;  %v2350_v23 = vmul.f32 %v4708_v8, %v5951_v40  ;;  %v4710_v0 = vpop.eup %4709 }
 0x439   : > { %4719 = vrcp.f32 %v2314_v20  ;;  %4377 = vmatprep.subr.bf16.mxu1 %v6408_v26  ;;  %v2353_v40 = vmul.f32 %v4710_v0, %v5871_v11  ;;  %v2850_v49 = vpop.xlane.xlu1 %2849 }
 0x43a   : > { %4038 = vmatprep.mubr.msk.f32.mxu1 %vm1115_vm10, %v2350_v23  ;;  %4721 = vrcp.f32 %v2323_v14 }
 0x43b   : > { %v4712_v29 = vpop.eup %4711  ;;  %4039 = vmatmul.mubr.msk.f32.gmra.mrb[36].mxu1 %vm1115_vm10, %v2351_v2 }
 0x43c   : > { %v2320_v10 = vpop.xlane.xlu0 %2319  ;;  %v2352_v54 = vmul.f32 %v4712_v29, %v5961_v55  ;;  %4379 = vmatpush3.bf16.msra.mxu1 %v6408_v26  ;;  %v4714_v7 = vpop.eup %4713  ;;  %v6414_v26 = vld [vmem:[#allocation23_spill] sm:$0xff] }
 0x43d   : > { %4381 = vmatprep.subr.bf16.mxu1 %v6409_v59  ;;  %4723 = vrcp.f32 %v2320_v10  ;;  %v2355_v25 = vmul.f32 %v4714_v7, %v5883_v61  ;;  %v2856_v30 = vpop.xlane.xlu1 %2855 }
 0x43e   : > { %4041 = vmatprep.mubr.msk.f32.mxu1 %vm1115_vm10, %v2352_v54  ;;  %4725 = vrcp.f32 %v2329_v31  ;;  %v6415_v54 = vld [vmem:[#allocation24_spill] sm:$0xff] }
 0x43f   : > { %v4716_v36 = vpop.eup %4715  ;;  %4042 = vmatmul.mubr.msk.f32.gmra.mrb[38].mxu1 %vm1115_vm10, %v2353_v40 }
 0x440   : > { %v2326_v4 = vpop.xlane.xlu0 %2325  ;;  %4383 = vmatpush3.bf16.msra.mxu1 %v6409_v59  ;;  %v2354_v55 = vmul.f32 %v4716_v36, %v5968_v45  ;;  %v4718_v63 = vpop.eup %4717 }
 0x441   : > { %4727 = vrcp.f32 %v2326_v4  ;;  %v2357_v47 = vmul.f32 %v4718_v63, %v5894_v15 }
 0x442   : > { %4044 = vmatprep.mubr.msk.f32.mxu1 %vm1115_vm10, %v2354_v55  ;;  %4729 = vrcp.f32 %v2838_v18 }
 0x443   : > { %v4720_v17 = vpop.eup %4719  ;;  %4045 = vmatmul.mubr.msk.f32.gmra.mrb[40].mxu1 %vm1115_vm10, %v2355_v25 }
 0x444   : > { %v2835_v11 = vpop.xlane.xlu0 %2834  ;;  %v2356_v51 = vmul.f32 %v4720_v17, %v5977_v28  ;;  %v4722_v27 = vpop.eup %4721 }
 0x445   : > { %4731 = vrcp.f32 %v2835_v11  ;;  %v2359_v28 = vmul.f32 %v4722_v27, %v6410_v33  ;;  %v2862_v60 = vpop.xlane.xlu1 %2861 }
 0x446   : > { %4047 = vmatprep.mubr.msk.f32.mxu1 %vm1115_vm10, %v2356_v51  ;;  %4733 = vrcp.f32 %v2844_v19 }
 0x447   : > { %v4724_v45 = vpop.eup %4723  ;;  %4048 = vmatmul.mubr.msk.f32.gmra.mrb[42].mxu1 %vm1115_vm10, %v2357_v47 }
 0x448   : > { %v2841_v61 = vpop.xlane.xlu0 %2840  ;;  %v2358_v53 = vmul.f32 %v4724_v45, %v5983_v48  ;;  %v4726_v34 = vpop.eup %4725 }
 0x449   : > { %4735 = vrcp.f32 %v2841_v61  ;;  %v2361_v32 = vmul.f32 %v4726_v34, %v6411_v22  ;;  %v3497_v22 = vld [vmem:[%s6294_s6] ss:$0 sm:$0xff] }
 0x44a   : > { %4050 = vmatprep.mubr.msk.f32.mxu1 %vm1115_vm10, %v2358_v53  ;;  %4737 = vrcp.f32 %v2850_v49 }
 0x44b   : > { %v4728_v12 = vpop.eup %4727  ;;  %4051 = vmatmul.mubr.msk.f32.gmra.mrb[44].mxu1 %vm1115_vm10, %v2359_v28 }
 0x44c   : > { %v2847_v57 = vpop.xlane.xlu0 %2846  ;;  %v2360_v15 = vmul.f32 %v4728_v12, %v5992_v58  ;;  %v4730_v35 = vpop.eup %4729 }
 0x44d   : > { %4739 = vrcp.f32 %v2847_v57  ;;  %v2898_v58 = vmul.f32 %v4730_v35, %v6412_v1  ;;  %v2868_v62 = vpop.xlane.xlu1 %2867 }
 0x44e   : > { %4053 = vmatprep.mubr.msk.f32.mxu1 %vm1115_vm10, %v2360_v15  ;;  %4741 = vrcp.f32 %v2856_v30 }
 0x44f   : > { %v4732_v48 = vpop.eup %4731  ;;  %4054 = vmatmul.mubr.msk.f32.gmra.mrb[46].mxu1 %vm1115_vm10, %v2361_v32 }
 0x450   : > { %v2853_v13 = vpop.xlane.xlu0 %2852  ;;  %v2897_v9 = vmul.f32 %v4732_v48, %v5998_v52  ;;  %v4734_v6 = vpop.eup %4733 }
 0x451   : > { %4743 = vrcp.f32 %v2853_v13  ;;  %v2900_v41 = vmul.f32 %v4734_v6, %v6413_v50  ;;  %v4762_v6 = vld [vmem:[%s4855_s26] sm:$0xff] }
 0x452   : > { %4112 = vmatprep.mubr.msk.f32.mxu1 %vm1115_vm10, %v2897_v9  ;;  %4745 = vrcp.f32 %v2862_v60  ;;  %v4761_v60 = vld [vmem:[%s4855_s26 + $0x8] sm:$0xff] }
 0x453   : > { %v4736_v3 = vpop.eup %4735  ;;  %4113 = vmatmul.mubr.msk.f32.vlgmr.msra.gmra.mrb[32].mxu1 %vm1115_vm10, %v2898_v58 }
 0x454   : > { %v2859_v39 = vpop.xlane.xlu0 %2858  ;;  %v2899_v24 = vmul.f32 %v4736_v3, %v6007_v46  ;;  %v4738_v8 = vpop.eup %4737 }
 0x455   : > { %4747 = vrcp.f32 %v2859_v39  ;;  %v2874_v14 = vpop.xlane.xlu1 %2873  ;;  %v2902_v46 = vmul.f32 %v4738_v8, %v6414_v26 }
 0x456   : > { %4115 = vmatprep.mubr.msk.f32.mxu1 %vm1115_vm10, %v2899_v24  ;;  %4749 = vrcp.f32 %v2868_v62  ;;  %v6417_v62 = vld [vmem:[#allocation3_spill] sm:$0xff] }
 0x457   : > { %v4740_v52 = vpop.eup %4739  ;;  %4116 = vmatmul.mubr.msk.f32.gmra.mrb[34].mxu1 %vm1115_vm10, %v2900_v41  ;;  %v6418_v41 = vld [vmem:[#allocation2_spill] sm:$0xff] }
 0x458   : > { %v2865_v20 = vpop.xlane.xlu0 %2864  ;;  %v2901_v23 = vmul.f32 %v4740_v52, %v6012_v42  ;;  %v4742_v0 = vpop.eup %4741 }
 0x459   : > { %4751 = vrcp.f32 %v2865_v20  ;;  %v2904_v31 = vmul.f32 %v4742_v0, %v6415_v54  ;;  %v6419_v0 = vld [vmem:[#allocation5_spill] sm:$0xff] }
 0x45a   : > { %4118 = vmatprep.mubr.msk.f32.mxu1 %vm1115_vm10, %v2901_v23  ;;  %4753 = vrcp.f32 %v2874_v14 }
 0x45b   : > { %v4744_v2 = vpop.eup %4743  ;;  %4119 = vmatmul.mubr.msk.f32.gmra.mrb[36].mxu1 %vm1115_vm10, %v2902_v46  ;;  %v6420_v46 = vld [vmem:[#allocation4_spill] sm:$0xff] }
 0x45c   : > { %v2871_v29 = vpop.xlane.xlu0 %2870  ;;  %v2903_v10 = vmul.f32 %v4744_v2, %v6021_v43  ;;  %v4746_v59 = vpop.eup %4745 }
 0x45d   : > { %4755 = vrcp.f32 %v2871_v29  ;;  %v2906_v18 = vmul.f32 %v4746_v59, %v6000_v5  ;;  %v6416_v5 = vld [vmem:[#allocation25_spill] sm:$0xff]  ;;  %v6421_v59 = vld [vmem:[#allocation7_spill] sm:$0xff] }
 0x45e   : > { %4121 = vmatprep.mubr.msk.f32.mxu1 %vm1115_vm10, %v2903_v10 }
 0x45f   : > { %v4748_v40 = vpop.eup %4747  ;;  %4122 = vmatmul.mubr.msk.f32.gmra.mrb[38].mxu1 %vm1115_vm10, %v2904_v31 }
 0x460   : > { %v2880_v42 = vpop.xlane.xlu1 %2879  ;;  %v2877_v7 = vpop.xlane.xlu0 %2876  ;;  %v2905_v36 = vmul.f32 %v4748_v40, %v6028_v38 }
 0x461   : > { %4757 = vrcp.f32 %v2880_v42  ;;  %v4750_v4 = vpop.eup %4749  ;;  %v6422_v42 = vld [vmem:[#allocation6_spill] sm:$0xff] }
 0x462   : > { %4759 = vrcp.f32 %v2877_v7  ;;  %4124 = vmatprep.mubr.msk.f32.mxu1 %vm1115_vm10, %v2905_v36  ;;  %v2908_v25 = vmul.f32 %v4750_v4, %v6015_v37 }
 0x463   : > { %v4752_v55 = vpop.eup %4751  ;;  %4125 = vmatmul.mubr.msk.f32.gmra.mrb[40].mxu1 %vm1115_vm10, %v2906_v18 }
 0x464   : > { %v2907_v43 = vmul.f32 %v4752_v55, %v6037_v16  ;;  %v4754_v63 = vpop.eup %4753 }
 0x465   : > { %v2910_v11 = vmul.f32 %v4754_v63, %v6416_v5 }
 0x466   : > { %4127 = vmatprep.mubr.msk.f32.mxu1 %vm1115_vm10, %v2907_v43 }
 0x467   : > { %v4756_v17 = vpop.eup %4755  ;;  %4128 = vmatmul.mubr.msk.f32.gmra.mrb[42].mxu1 %vm1115_vm10, %v2908_v25 }
 0x468   : > { %v2909_v38 = vmul.f32 %v4756_v17, %v6043_v44 }
 0x46a   : > { %4130 = vmatprep.mubr.msk.f32.mxu1 %vm1115_vm10, %v2909_v38 }
 0x46b   : > { %v4758_v51 = vpop.eup %4757  ;;  %4131 = vmatmul.mubr.msk.f32.gmra.mrb[44].mxu1 %vm1115_vm10, %v2910_v11 }
 0x46c   : > { %v4760_v19 = vpop.eup %4759  ;;  %v2912_v16 = vmul.f32 %v4758_v51, %v6050_v56 }
 0x46d   : > { %v2911_v47 = vmul.f32 %v4760_v19, %v6045_v21 }
 0x46f   : > { %4133 = vmatprep.mubr.msk.f32.mxu1 %vm1115_vm10, %v2911_v47 }
 0x470   : > { %4134 = vmatmul.mubr.msk.f32.gmra.mrb[46].mxu1 %vm1115_vm10, %v2912_v16 }
 0x526   : > { %v4114_v37 = vpop.f32.mrb[32].mxu1 }
 0x527   : > { %v3027_v27 = vpop.f32.mrb[33].mxu1 }
 0x528   : > { %4168 = vmatprep.mubr.f32.mxu0 %v3027_v27 }
 0x529   : > { %4169 = vmatmul.mubr.f32.vlgmr.msra.gmra.mrb[80].mxu0 %v4114_v37 }
 0x52a   : > { %v4117_v44 = vpop.f32.mrb[34].mxu1 }
 0x52b   : > { %v3037_v45 = vpop.f32.mrb[35].mxu1 }
 0x52c   : > { %4171 = vmatprep.mubr.f32.mxu0 %v3037_v45 }
 0x52d   : > { %4172 = vmatmul.mubr.f32.gmra.mrb[82].mxu0 %v4117_v44 }
 0x52e   : > { %v4120_v61 = vpop.f32.mrb[36].mxu1 }
 0x52f   : > { %v3047_v49 = vpop.f32.mrb[37].mxu1 }
 0x530   : > { %4174 = vmatprep.mubr.f32.mxu0 %v3047_v49 }
 0x531   : > { %4175 = vmatmul.mubr.f32.gmra.mrb[84].mxu0 %v4120_v61 }
 0x532   : > { %v4123_v53 = vpop.f32.mrb[38].mxu1 }
 0x533   : > { %v3057_v56 = vpop.f32.mrb[39].mxu1 }
 0x534   : > { %4177 = vmatprep.mubr.f32.mxu0 %v3057_v56 }
 0x535   : > { %4178 = vmatmul.mubr.f32.gmra.mrb[86].mxu0 %v4123_v53 }
 0x536   : > { %v4126_v21 = vpop.f32.mrb[40].mxu1 }
 0x537   : > { %v3067_v34 = vpop.f32.mrb[41].mxu1 }
 0x538   : > { %4180 = vmatprep.mubr.f32.mxu0 %v3067_v34 }
 0x539   : > { %4181 = vmatmul.mubr.f32.gmra.mrb[88].mxu0 %v4126_v21 }
 0x53a   : > { %v4129_v33 = vpop.f32.mrb[42].mxu1 }
 0x53b   : > { %v3077_v28 = vpop.f32.mrb[43].mxu1 }
 0x53c   : > { %4183 = vmatprep.mubr.f32.mxu0 %v3077_v28 }
 0x53d   : > { %4184 = vmatmul.mubr.f32.gmra.mrb[90].mxu0 %v4129_v33 }
 0x53e   : > { %v4132_v12 = vpop.f32.mrb[44].mxu1 }
 0x53f   : > { %v3087_v57 = vpop.f32.mrb[45].mxu1 }
 0x540   : > { %4186 = vmatprep.mubr.f32.mxu0 %v3087_v57 }
 0x541   : > { %4187 = vmatmul.mubr.f32.gmra.mrb[92].mxu0 %v4132_v12 }
 0x543   : > { %v4135_v15 = vpop.f32.mrb[46].mxu1 }
 0x544   : > { %v3097_v30 = vpop.f32.mrb[47].mxu1 }
 0x545   : > { %4189 = vmatprep.mubr.f32.mxu0 %v3097_v30 }
 0x546   : > { %4190 = vmatmul.mubr.f32.gmra.mrb[94].mxu0 %v4135_v15 }
 0x5fc   : > { %v4170_v32 = vpop.f32.mrb[80].mxu0 }
 0x5fd   : > { %v3217_v35 = vadd.f32 %v4170_v32, %v3497_v22  ;;  %v3211_v48 = vpop.f32.mrb[81].mxu0 }
 0x5fe   : > { %v3212_v13 = vadd.f32 %v3497_v22, %v3211_v48 }
 0x5ff   : > { %v3291_v9 = vadd.f32 %v4761_v60, %v3217_v35 }
 0x600   : > { %v3290_v1 = vadd.f32 %v4762_v6, %v3212_v13  ;;  %v4173_v58 = vpop.f32.mrb[82].mxu0 }
 0x601   : > { %3299 = vst [vmem:[%s6263_s16 + $0x8] sm:$0xff] %v3291_v9  ;;  %v3227_v3 = vadd.f32 %v4173_v58, %v3497_v22  ;;  %v3221_v39 = vpop.f32.mrb[83].mxu0 }
 0x602   : > { %3298 = vst [vmem:[%s6263_s16] sm:$0xff] %v3290_v1  ;;  %v3222_v24 = vadd.f32 %v3497_v22, %v3221_v39 }
 0x603   : > { %v3293_v50 = vadd.f32 %v3227_v3, %v6417_v62 }
 0x604   : > { %v3292_v8 = vadd.f32 %v3222_v24, %v6418_v41  ;;  %v4176_v52 = vpop.f32.mrb[84].mxu0 }
 0x605   : > { %3301 = vst [vmem:[%s6263_s16 + $0x18] sm:$0xff] %v3293_v50  ;;  %v3237_v20 = vadd.f32 %v4176_v52, %v3497_v22  ;;  %v3231_v14 = vpop.f32.mrb[85].mxu0 }
 0x606   : > { %3300 = vst [vmem:[%s6263_s16 + $0x10] sm:$0xff] %v3292_v8  ;;  %v3232_v23 = vadd.f32 %v3497_v22, %v3231_v14 }
 0x607   : > { %v3295_v26 = vadd.f32 %v3237_v20, %v6419_v0 }
 0x608   : > { %v3294_v2 = vadd.f32 %v3232_v23, %v6420_v46  ;;  %v4179_v29 = vpop.f32.mrb[86].mxu0 }
 0x609   : > { %3303 = vst [vmem:[%s6263_s16 + $0x28] sm:$0xff] %v3295_v26  ;;  %v3247_v10 = vadd.f32 %v4179_v29, %v3497_v22  ;;  %v3241_v54 = vpop.f32.mrb[87].mxu0 }
 0x60a   : > { %3302 = vst [vmem:[%s6263_s16 + $0x20] sm:$0xff] %v3294_v2  ;;  %v3242_v31 = vadd.f32 %v3497_v22, %v3241_v54 }
 0x60b   : > { %v3297_v40 = vadd.f32 %v3247_v10, %v6421_v59 }
 0x60c   : > { %v3296_v7 = vadd.f32 %v3242_v31, %v6422_v42  ;;  %v4182_v36 = vpop.f32.mrb[88].mxu0 }
 0x60d   : > { %3305 = vst [vmem:[%s6263_s16 + $0x38] sm:$0xff] %v3297_v40  ;;  %v3257_v4 = vadd.f32 %v4182_v36, %v3497_v22  ;;  %v3251_v18 = vpop.f32.mrb[89].mxu0 }
 0x60e   : > { %3304 = vst [vmem:[%s6263_s16 + $0x30] sm:$0xff] %v3296_v7  ;;  %v3252_v55 = vadd.f32 %v3497_v22, %v3251_v18 }
 0x60f   : > { %3307 = vst [vmem:[%s338_s18 + $0x8] sm:$0xff] %v3257_v4 }
 0x610   : > { %3306 = vst [vmem:[%s338_s18] sm:$0xff] %v3252_v55  ;;  %v4185_v43 = vpop.f32.mrb[90].mxu0 }
 0x611   : > { %v3267_v63 = vadd.f32 %v4185_v43, %v3497_v22  ;;  %v3261_v25 = vpop.f32.mrb[91].mxu0 }
 0x612   : > { %v3262_v17 = vadd.f32 %v3497_v22, %v3261_v25 }
 0x613   : > { %3309 = vst [vmem:[%s338_s18 + $0x18] sm:$0xff] %v3267_v63 }
 0x614   : > { %3308 = vst [vmem:[%s338_s18 + $0x10] sm:$0xff] %v3262_v17  ;;  %v4188_v38 = vpop.f32.mrb[92].mxu0 }
 0x615   : > { %v3277_v5 = vadd.f32 %v4188_v38, %v3497_v22  ;;  %v3271_v11 = vpop.f32.mrb[93].mxu0 }
 0x616   : > { %v3272_v51 = vadd.f32 %v3497_v22, %v3271_v11 }
 0x617   : > { %3311 = vst [vmem:[%s338_s18 + $0x28] sm:$0xff] %v3277_v5 }
 0x618   : > { %3310 = vst [vmem:[%s338_s18 + $0x20] sm:$0xff] %v3272_v51 }
 0x619   : > { %v4191_v19 = vpop.f32.mrb[94].mxu0 }
 0x61a   : > { %v3287_v16 = vadd.f32 %v4191_v19, %v3497_v22  ;;  %v3281_v47 = vpop.f32.mrb[95].mxu0 }
 0x61b   : > { %v3282_v37 = vadd.f32 %v3497_v22, %v3281_v47 }
 0x61c   : > { %3313 = vst [vmem:[%s338_s18 + $0x38] sm:$0xff] %v3287_v16 }
 0x61d   : > { %3312 = vst [vmem:[%s338_s18 + $0x30] sm:$0xff] %v3282_v37 }
 0x61e PF: > { %s19_s27 = sadd.s32 1, %s4769_s27  }
 0x61f   : > { %p16_p4 = scmp.ge.s32.totalorder %s19_s27, 4  }
 0x621   :  { %18 = sbr.rel (!%p16_p4) target bundleno = 1 (0x1), region = 93 }

</bundles_post_ra>
